<compile_context>
chip_gen: v7x
topology: tpu7x:2x2x1
jax: 0.10.0
libtpu: 0.0.40
codegen_flags: <defaults>
</compile_context>

<pallas_src>
import math
import functools

import jax
import jax.numpy as jnp
from jax import lax
from jax.experimental import pallas as pl
from jax.experimental.pallas import tpu as pltpu

LN_EPS = 1e-5
BN_EPS = 1e-5

# Dtype fed to the MXU (accumulation stays f32).  bf16 is native on v5e/v6e/v7x and
# halves weight HBM traffic / VMEM residency; float32 matches the PyTorch reference
# exactly (LayerNorm / softmax / masking / elementwise math always stays f32).
MXU_DTYPE = jnp.bfloat16


# ----------------------------------------------------------------------------------
# generation-aware compiler knobs
# ----------------------------------------------------------------------------------
@functools.lru_cache(maxsize=None)
def _vmem_limit():
    """Scoped VMEM: ~3/4 of physical, capped at 96 MiB (48 MiB on v7x's 64 MiB)."""
    try:
        cap = int(pltpu.get_tpu_info().vmem_capacity_bytes)
    except Exception:
        cap = 128 * 1024 * 1024
    return int(min(cap * 3 // 4, 96 * 1024 * 1024))


@functools.lru_cache(maxsize=None)
def _single_buffer_ok():
    """Probe once whether constant blocks may be single-buffered (pl.Buffered(1))."""
    try:
        spec = pl.BlockSpec((8, 128), lambda i: (0, 0), pipeline_mode=pl.Buffered(1))

        def _probe(x_ref, o_ref):
            o_ref[...] = x_ref[...] + 1.0

        fn = pl.pallas_call(
            _probe,
            out_shape=jax.ShapeDtypeStruct((16, 128), jnp.float32),
            grid=(2,),
            in_specs=[spec],
            out_specs=pl.BlockSpec((8, 128), lambda i: (i, 0)),
        )
        jax.jit(fn).lower(jnp.zeros((8, 128), jnp.float32)).compile()
        return True
    except Exception:
        return False


def _const_spec(shape):
    """BlockSpec for a grid-invariant (weight) operand; single-buffered if supported."""
    index_map = lambda *_: (0,) * len(shape)
    if _single_buffer_ok():
        return pl.BlockSpec(shape, index_map, pipeline_mode=pl.Buffered(1))
    return pl.BlockSpec(shape, index_map)


def _cparams(semantics):
    return pltpu.CompilerParams(dimension_semantics=semantics,
                                vmem_limit_bytes=_vmem_limit())


# ----------------------------------------------------------------------------------
# shared in-kernel helpers
# ----------------------------------------------------------------------------------
def _mm(a, b):
    """(M,K) @ (K,N) on the MXU with f32 accumulation."""
    return jnp.dot(a.astype(MXU_DTYPE), b.astype(MXU_DTYPE),
                   preferred_element_type=jnp.float32)


def _mm_nt(a, b):
    """Contract the last dim of both operands: (M,K) x (N,K) -> (M,N)."""
    return lax.dot_general(a.astype(MXU_DTYPE), b.astype(MXU_DTYPE),
                           (((1,), (1,)), ((), ())),
                           preferred_element_type=jnp.float32)


def _layer_norm(x, gamma, beta):
    mu = jnp.mean(x, axis=-1, keepdims=True)
    var = jnp.mean((x - mu) ** 2, axis=-1, keepdims=True)
    return (x - mu) * lax.rsqrt(var + LN_EPS) * gamma + beta


def _swish(x):
    return x * jax.nn.sigmoid(x)


def _time_tile(T, max_tile=512):
    """Largest time tile <= max_tile that divides T and keeps sublanes aligned.
    Falls back to the full T when no 8-aligned divisor exists (always correct)."""
    if T <= max_tile:
        return T
    for cand in range(max_tile - max_tile % 8, 7, -8):
        if T % cand == 0:
            return cand
    return T


# ----------------------------------------------------------------------------------
# Kernel 1: FeedForward residual block (time-tiled):  out = x + factor * FF(LN(x))
#           variant 2 additionally fuses the block's final LayerNorm into the epilogue
# ----------------------------------------------------------------------------------
def _ff_compute(x, g, b, w1, b1, w2, b2, module_factor):
    h = _layer_norm(x, g, b)
    h = _mm(h, w1) + b1
    h = _swish(h)
    h = _mm(h, w2) + b2
    return x + module_factor * h


def _ff_residual_kernel(x_ref, g_ref, b_ref, w1_ref, b1_ref, w2_ref, b2_ref, o_ref,
                        *, module_factor):
    o_ref[0] = _ff_compute(x_ref[0], g_ref[...], b_ref[...], w1_ref[...], b1_ref[...],
                           w2_ref[...], b2_ref[...], module_factor)


def _ff_residual_final_ln_kernel(x_ref, g_ref, b_ref, w1_ref, b1_ref, w2_ref, b2_ref,
                                 fg_ref, fb_ref, o_ref, *, module_factor):
    y = _ff_compute(x_ref[0], g_ref[...], b_ref[...], w1_ref[...], b1_ref[...],
                    w2_ref[...], b2_ref[...], module_factor)
    o_ref[0] = _layer_norm(y, fg_ref[...], fb_ref[...])      # fused final LayerNorm


def ff_residual(x, p, module_factor, final_ln=None):
    B, T, D = x.shape
    E = p["w1"].shape[1]
    tT = _time_tile(T, 512)
    bspec = pl.BlockSpec((1, tT, D), lambda b, t: (b, t, 0))

    # pre-cast matmul weights once (not per grid step); biases / LN stay f32
    w1 = p["w1"].astype(MXU_DTYPE)
    w2 = p["w2"].astype(MXU_DTYPE)

    args = [x, p["ln_g"], p["ln_b"], w1, p["b1"], w2, p["b2"]]
    in_specs = [bspec, _const_spec((1, D)), _const_spec((1, D)),
                _const_spec((D, E)), _const_spec((1, E)),
                _const_spec((E, D)), _const_spec((1, D))]
    if final_ln is None:
        kern = functools.partial(_ff_residual_kernel, module_factor=module_factor)
    else:
        args += [final_ln[0], final_ln[1]]
        in_specs += [_const_spec((1, D)), _const_spec((1, D))]
        kern = functools.partial(_ff_residual_final_ln_kernel,
                                 module_factor=module_factor)

    return pl.pallas_call(
        kern,
        out_shape=jax.ShapeDtypeStruct((B, T, D), x.dtype),
        grid=(B, T // tT),
        in_specs=in_specs,
        out_specs=bspec,
        compiler_params=_cparams(("parallel", "parallel")),
    )(*args)


# ----------------------------------------------------------------------------------
# Kernel 2a: time-tiled K/V projection:  k = LN(x)@Wk + bk,  v = LN(x)@Wv + bv
# ----------------------------------------------------------------------------------
def _kv_proj_kernel(x_ref, g_ref, b_ref, wk_ref, bk_ref, wv_ref, bv_ref,
                    k_ref, v_ref):
    ln = _layer_norm(x_ref[0], g_ref[...], b_ref[...])
    k_ref[0] = (_mm(ln, wk_ref[...]) + bk_ref[...]).astype(k_ref.dtype)
    v_ref[0] = (_mm(ln, wv_ref[...]) + bv_ref[...]).astype(v_ref.dtype)


# ----------------------------------------------------------------------------------
# Kernel 2b: query-tiled relative-position MHSA residual block
#   out_tile = x_tile + out_proj( softmax( (content + rel_shift(pos)) / sqrt(D) ) @ V )
# ----------------------------------------------------------------------------------
def _attn_body(x_ref, k_ref, v_ref, pos_l_ref, pos_u_ref, g_ref, b_ref, wq_ref, bq_ref,
               u_ref, vb_ref, wo_ref, bo_ref, o_ref, ctx_ref,
               *, n_head, inv_sqrt_dim, causal):
    x = x_ref[0]                                    # (Tq, D) f32
    Tq, D = x.shape
    T = k_ref.shape[1]
    dh = D // n_head
    q0 = pl.program_id(1) * Tq                      # global row offset of this Q tile

    ln = _layer_norm(x, g_ref[...], b_ref[...])
    q = _mm(ln, wq_ref[...]) + bq_ref[...]
    qu = q + u_ref[...]                             # q + u_bias  (content path)
    qv = q + vb_ref[...]                            # q + v_bias  (position path)

    row = q0 + lax.broadcasted_iota(jnp.int32, (Tq, T), 0)
    col = lax.broadcasted_iota(jnp.int32, (Tq, T), 1)

    for h in range(n_head):                         # static unroll over heads
        # TODO(synk): fold several heads per matmul when dh << 128 (MXU occupancy).
        sl = slice(h * dh, (h + 1) * dh)
        content = _mm_nt(qu[:, sl], k_ref[0, :, sl])                 # (Tq, T)

        # Exact Transformer-XL relative shift: the constant part was pre-applied to
        # the per-Q-tile (lane-padded, pre-transposed) positional table outside; only
        # a per-row strided lane roll (XLU) remains in-kernel.
        pos_l = _mm(qv[:, sl], pos_l_ref[0, sl, :])                  # (Tq, Wp)
        pos_l = pltpu.roll(pos_l, shift=0, axis=1,
                           stride=1, stride_axis=0)[:, :T]
        if causal:
            pos = pos_l                             # entries at col > row are masked
        else:
            pos_u = _mm(qv[:, sl], pos_u_ref[0, sl, :])              # (Tq, Wp)
            pos_u = pltpu.roll(pos_u, shift=0, axis=1,
                               stride=1, stride_axis=0)
            pos_u = jnp.concatenate([pos_u[1:], pos_u[:1]], axis=0)[:, :T]
            pos = jnp.where(col <= row, pos_l,
                            jnp.where(col == row + 1, 0.0, pos_u))

        score = (content + pos) * inv_sqrt_dim
        if causal:
            score = jnp.where(col > row, -1e9, score)                # masked_fill(-1e9)
        score = score - jnp.max(score, axis=-1, keepdims=True)
        e = jnp.exp(score)
        attn = e * pl.reciprocal(jnp.sum(e, axis=-1, keepdims=True), approx=True)
        ctx_ref[:, sl] = _mm(attn, v_ref[0, :, sl])                  # per-head -> scratch

    o_ref[0] = x + _mm(ctx_ref[...], wo_ref[...]) + bo_ref[...]      # out_proj + residual


def _attn_kernel_causal(x_ref, k_ref, v_ref, pos_l_ref, g_ref, b_ref, wq_ref, bq_ref,
                        u_ref, vb_ref, wo_ref, bo_ref, o_ref, ctx_ref,
                        *, n_head, inv_sqrt_dim):
    _attn_body(x_ref, k_ref, v_ref, pos_l_ref, None, g_ref, b_ref, wq_ref, bq_ref,
               u_ref, vb_ref, wo_ref, bo_ref, o_ref, ctx_ref,
               n_head=n_head, inv_sqrt_dim=inv_sqrt_dim, causal=True)


def _attn_kernel_noncausal(x_ref, k_ref, v_ref, pos_l_ref, pos_u_ref, g_ref, b_ref,
                           wq_ref, bq_ref, u_ref, vb_ref, wo_ref, bo_ref, o_ref,
                           ctx_ref, *, n_head, inv_sqrt_dim):
    _attn_body(x_ref, k_ref, v_ref, pos_l_ref, pos_u_ref, g_ref, b_ref, wq_ref, bq_ref,
               u_ref, vb_ref, wo_ref, bo_ref, o_ref, ctx_ref,
               n_head=n_head, inv_sqrt_dim=inv_sqrt_dim, causal=False)


def mhsa_residual(x, p, *, n_head, causal):
    B, T, D = x.shape
    Wp = ((T + 127) // 128) * 128          # lane-dense width for the in-kernel roll
    tT = _time_tile(T, 512)

    # ---- call A: time-tiled K/V projection (stored in MXU dtype) ----
    bspec_t = pl.BlockSpec((1, tT, D), lambda b, t: (b, t, 0))
    k, v = pl.pallas_call(
        _kv_proj_kernel,
        out_shape=(jax.ShapeDtypeStruct((B, T, D), MXU_DTYPE),
                   jax.ShapeDtypeStruct((B, T, D), MXU_DTYPE)),
        grid=(B, T // tT),
        in_specs=[bspec_t, _const_spec((1, D)), _const_spec((1, D)),
                  _const_spec((D, D)), _const_spec((1, D)),
                  _const_spec((D, D)), _const_spec((1, D))],
        out_specs=(bspec_t, bspec_t),
        compiler_params=_cparams(("parallel", "parallel")),
    )(x, p["ln_g"], p["ln_b"],
      p["wk"].astype(MXU_DTYPE), p["bk"], p["wv"].astype(MXU_DTYPE), p["bv"])

    # ---- positional tables: computed ONCE, per-Q-tile pre-rolled, pre-transposed ----
    Tq = T if not causal else _time_tile(T, 256)   # non-causal path needs a full tile
    nQ = T // Tq
    pe = positional_encoding(T, D)
    pos = jnp.dot(pe, p["wp"])                     # pos_proj (no bias), once per call
    pos_pad = jnp.pad(pos, ((0, Wp - T), (0, 0)))
    q0s = [qi * Tq for qi in range(nQ)]
    # lower-triangle table: tbl[m] = pos_pad[(m - q0 + T - 1) mod Wp]
    tbl_l = jnp.stack([jnp.roll(pos_pad, q0 - (T - 1), axis=0) for q0 in q0s])
    posT_l = jnp.transpose(tbl_l, (0, 2, 1)).astype(MXU_DTYPE)       # (nQ, D, Wp)

    args = [x, k, v, posT_l]
    pos_specs = [pl.BlockSpec((1, D, Wp), lambda b, qi: (qi, 0, 0))]
    if causal:
        kern = functools.partial(_attn_kernel_causal, n_head=n_head,
                                 inv_sqrt_dim=1.0 / math.sqrt(D))
    else:
        tbl_u = jnp.stack([jnp.roll(pos_pad, q0 + 1, axis=0) for q0 in q0s])
        posT_u = jnp.transpose(tbl_u, (0, 2, 1)).astype(MXU_DTYPE)
        args.append(posT_u)
        pos_specs.append(pl.BlockSpec((1, D, Wp), lambda b, qi: (qi, 0, 0)))
        kern = functools.partial(_attn_kernel_noncausal, n_head=n_head,
                                 inv_sqrt_dim=1.0 / math.sqrt(D))

    args += [p["ln_g"], p["ln_b"], p["wq"].astype(MXU_DTYPE), p["bq"],
             p["u"].reshape(1, D), p["v"].reshape(1, D),
             p["wo"].astype(MXU_DTYPE), p["bo"]]

    x_q_spec = pl.BlockSpec((1, Tq, D), lambda b, qi: (b, qi, 0))
    kv_spec = pl.BlockSpec((1, T, D), lambda b, qi: (b, 0, 0))
    in_specs = ([x_q_spec, kv_spec, kv_spec] + pos_specs +
                [_const_spec((1, D)), _const_spec((1, D)),
                 _const_spec((D, D)), _const_spec((1, D)),
                 _const_spec((1, D)), _const_spec((1, D)),
                 _const_spec((D, D)), _const_spec((1, D))])

    # TODO(synk): KV-axis online-softmax (flash) tiling for very long T; a causal
    # version would also skip fully-masked KV blocks.
    return pl.pallas_call(
        kern,
        out_shape=jax.ShapeDtypeStruct((B, T, D), x.dtype),
        grid=(B, nQ),
        in_specs=in_specs,
        out_specs=x_q_spec,
        scratch_shapes=[pltpu.VMEM((Tq, D), jnp.float32)],
        compiler_params=_cparams(("parallel", "parallel")),
    )(*args)


# ----------------------------------------------------------------------------------
# Kernel 3: Conformer convolution module + residual
#   LN -> pointwise(D->2D) -> GLU -> causal depthwise conv(K) -> BN(eval) -> Swish
#      -> pointwise(D->D) ; out = x + conv(x)
# ----------------------------------------------------------------------------------
def _conv_residual_kernel(x_ref, g_ref, be_ref, w1_ref, b1_ref, dw_ref, bns_ref,
                          bnsh_ref, w2_ref, b2_ref, o_ref, *, kernel_size):
    x = x_ref[0]                                    # (T, D) f32
    T, D = x.shape
    K = kernel_size

    ln = _layer_norm(x, g_ref[...], be_ref[...])
    h2 = _mm(ln, w1_ref[...]) + b1_ref[...]         # pointwise conv D -> 2D
    h = h2[:, :D] * jax.nn.sigmoid(h2[:, D:])       # GLU over the channel dim

    # causal depthwise conv: per-tap sublane roll (XLU) + masked VPU multiply-add.
    # out[i] = sum_t w[t] * h[i - (K-1) + t]   (zero for negative time indices)
    w = dw_ref[...]                                 # (K, D) f32
    row = lax.broadcasted_iota(jnp.int32, (T, 1), 0)
    acc = h * w[K - 1, :]                           # tap with zero time shift
    for t in range(K - 1):                          # static unroll
        s = K - 1 - t                               # shift of this tap
        if s >= T:
            continue                                # tap only ever reads zero padding
        shifted = pltpu.roll(h, shift=s, axis=0)    # sublane rotate
        acc = acc + jnp.where(row >= s, shifted, 0.0) * w[t, :]

    # BatchNorm1d (eval): running stats folded into scale/shift outside the kernel
    h = acc * bns_ref[...] + bnsh_ref[...]
    h = _swish(h)
    h = _mm(h, w2_ref[...]) + b2_ref[...]
    o_ref[0] = x + h


def conv_residual(x, p, kernel_size=31):
    B, T, D = x.shape
    bspec = pl.BlockSpec((1, T, D), lambda b: (b, 0, 0))

    # fold BatchNorm1d (eval) running stats + affine into one scale/shift
    bn_scale = p["bn_g"] * lax.rsqrt(p["bn_var"] + BN_EPS)
    bn_shift = p["bn_b"] - p["bn_mean"] * bn_scale

    kern = functools.partial(_conv_residual_kernel, kernel_size=kernel_size)
    # TODO(synk): halo-tiled time blocking (tile T with a K-1 overlap) for very long T
    # and an extra parallel grid axis when B is small.
    return pl.pallas_call(
        kern,
        out_shape=jax.ShapeDtypeStruct((B, T, D), x.dtype),
        grid=(B,),
        in_specs=[bspec, _const_spec((1, D)), _const_spec((1, D)),
                  _const_spec((D, 2 * D)), _const_spec((1, 2 * D)),
                  _const_spec((kernel_size, D)),
                  _const_spec((1, D)), _const_spec((1, D)),
                  _const_spec((D, D)), _const_spec((1, D))],
        out_specs=bspec,
        compiler_params=_cparams(("parallel",)),
    )(x, p["ln_g"], p["ln_b"],
      p["pw1_w"].astype(MXU_DTYPE), p["pw1_b"],
      p["dw_w"], bn_scale, bn_shift,
      p["pw2_w"].astype(MXU_DTYPE), p["pw2_b"])


# ----------------------------------------------------------------------------------
# plain-JAX glue (positional encoding table / parameters)
# ----------------------------------------------------------------------------------
def positional_encoding(length, d_model):
    pos = jnp.arange(length, dtype=jnp.float32)[:, None]
    div = jnp.exp(jnp.arange(0, d_model, 2, dtype=jnp.float32)
                  * (-math.log(10000.0) / d_model))
    pe = jnp.zeros((length, d_model), jnp.float32)
    pe = pe.at[:, 0::2].set(jnp.sin(pos * div))
    pe = pe.at[:, 1::2].set(jnp.cos(pos * div))
    return pe


def transformer_layer(x, params, *, n_head, is_casual=True):
    # 1) FeedForward residual (module_factor = 0.5), time-tiled
    x = ff_residual(x, params["ff1"], 0.5)
    # 2) Relative-position multi-head self-attention (+ residual), Q-tiled
    x = mhsa_residual(x, params["mhsa"], n_head=n_head, causal=is_casual)
    # 3) Conformer convolution module (+ residual), kernel_size = 31
    x = conv_residual(x, params["conv"], kernel_size=31)
    # 4) FeedForward residual (0.5) with the final LayerNorm fused into its epilogue
    return ff_residual(x, params["ff2"], 0.5,
                       final_ln=(params["ln_g"], params["ln_b"]))


def _uniform(key, shape, fan_in):
    a = 1.0 / math.sqrt(fan_in)
    return jax.random.uniform(key, shape, jnp.float32, minval=-a, maxval=a)


def init_params(key, D, n_head, ff_expansion=4, kernel_size=31):
    E = D * ff_expansion
    dh = D // n_head
    keys = iter(jax.random.split(key, 32))
    ones = lambda n: jnp.ones((1, n), jnp.float32)
    zeros = lambda n: jnp.zeros((1, n), jnp.float32)

    def make_ff():
        return dict(ln_g=ones(D), ln_b=zeros(D),
                    w1=_uniform(next(keys), (D, E), D), b1=zeros(E),
                    w2=_uniform(next(keys), (E, D), E), b2=zeros(D))

    ff1, ff2 = make_ff(), make_ff()
    mhsa = dict(
        ln_g=ones(D), ln_b=zeros(D),
        wq=_uniform(next(keys), (D, D), D), bq=zeros(D),
        wk=_uniform(next(keys), (D, D), D), bk=zeros(D),
        wv=_uniform(next(keys), (D, D), D), bv=zeros(D),
        wp=_uniform(next(keys), (D, D), D),                   # pos_proj, no bias
        u=_uniform(next(keys), (n_head, dh), D),
        v=_uniform(next(keys), (n_head, dh), D),
        wo=_uniform(next(keys), (D, D), D), bo=zeros(D),
    )
    conv = dict(
        ln_g=ones(D), ln_b=zeros(D),
        pw1_w=_uniform(next(keys), (D, 2 * D), D),
        pw1_b=_uniform(next(keys), (1, 2 * D), D),
        dw_w=_uniform(next(keys), (kernel_size, D), kernel_size),  # depthwise, no bias
        bn_g=ones(D), bn_b=zeros(D),
        bn_mean=zeros(D), bn_var=ones(D),                          # running statistics
        pw2_w=_uniform(next(keys), (D, D), D),
        pw2_b=_uniform(next(keys), (1, D), D),
    )
    return dict(ff1=ff1, mhsa=mhsa, conv=conv, ff2=ff2, ln_g=ones(D), ln_b=zeros(D))


if __name__ == "__main__":
    B, T, D, H = 2, 16, 32, 4            # batch, time, in_chan, n_head
    key = jax.random.PRNGKey(0)
    kx, kp = jax.random.split(key)
    x = jax.random.normal(kx, (B, T, D), jnp.float32)
    params = init_params(kp, D, H)

    # warm the hardware probes outside of tracing
    _ = _vmem_limit()
    _ = _single_buffer_ok()

    fwd = jax.jit(functools.partial(transformer_layer, n_head=H, is_casual=True))
    out = fwd(x, params)
    jax.block_until_ready(out)

    assert out.shape == (B, T, D)
    assert bool(jnp.all(jnp.isfinite(out)))
    print("KERNEL_OK")
</pallas_src>

<mosaic_0001>
module attributes {stable_mosaic.version = 11 : i64} {
  func.func @_ff_residual_kernel(%arg0: i32, %arg1: i32, %arg2: memref<1x16x32xf32, #tpu.memory_space<vmem>>, %arg3: memref<1x32xf32, #tpu.memory_space<vmem>>, %arg4: memref<1x32xf32, #tpu.memory_space<vmem>>, %arg5: memref<32x128xbf16, #tpu.memory_space<vmem>>, %arg6: memref<1x128xf32, #tpu.memory_space<vmem>>, %arg7: memref<128x32xbf16, #tpu.memory_space<vmem>>, %arg8: memref<1x32xf32, #tpu.memory_space<vmem>>, %arg9: memref<1x16x32xf32, #tpu.memory_space<vmem>>) attributes {dimension_semantics = [#tpu.dimension_semantics<parallel>, #tpu.dimension_semantics<parallel>], iteration_bounds = array<i64: 2, 1>, scalar_prefetch = 0 : i64, scratch_operands = 0 : i64, tpu.core_type = #tpu.core_type<tc>, window_params = [{transform_indices = @transform_0, window_bounds = array<i64: 1, 16, 32>}, {pipeline_mode = #tpu.pipeline_mode<synchronous>, transform_indices = @transform_1, window_bounds = array<i64: 1, 32>}, {pipeline_mode = #tpu.pipeline_mode<synchronous>, transform_indices = @transform_2, window_bounds = array<i64: 1, 32>}, {pipeline_mode = #tpu.pipeline_mode<synchronous>, transform_indices = @transform_3, window_bounds = array<i64: 32, 128>}, {pipeline_mode = #tpu.pipeline_mode<synchronous>, transform_indices = @transform_4, window_bounds = array<i64: 1, 128>}, {pipeline_mode = #tpu.pipeline_mode<synchronous>, transform_indices = @transform_5, window_bounds = array<i64: 128, 32>}, {pipeline_mode = #tpu.pipeline_mode<synchronous>, transform_indices = @transform_6, window_bounds = array<i64: 1, 32>}, {transform_indices = @transform_7, window_bounds = array<i64: 1, 16, 32>}]} {
    %c0 = arith.constant 0 : index
    %c0_0 = arith.constant 0 : index
    %c0_1 = arith.constant 0 : index
    %0 = vector.load %arg2[%c0, %c0_0, %c0_1] : memref<1x16x32xf32, #tpu.memory_space<vmem>>, vector<1x16x32xf32>
    %1 = vector.shape_cast %0 : vector<1x16x32xf32> to vector<16x32xf32>
    %c0_2 = arith.constant 0 : index
    %c0_3 = arith.constant 0 : index
    %2 = vector.load %arg3[%c0_2, %c0_3] : memref<1x32xf32, #tpu.memory_space<vmem>>, vector<1x32xf32>
    %c0_4 = arith.constant 0 : index
    %c0_5 = arith.constant 0 : index
    %3 = vector.load %arg4[%c0_4, %c0_5] : memref<1x32xf32, #tpu.memory_space<vmem>>, vector<1x32xf32>
    %c0_6 = arith.constant 0 : index
    %c0_7 = arith.constant 0 : index
    %4 = vector.load %arg5[%c0_6, %c0_7] : memref<32x128xbf16, #tpu.memory_space<vmem>>, vector<32x128xbf16>
    %c0_8 = arith.constant 0 : index
    %c0_9 = arith.constant 0 : index
    %5 = vector.load %arg6[%c0_8, %c0_9] : memref<1x128xf32, #tpu.memory_space<vmem>>, vector<1x128xf32>
    %c0_10 = arith.constant 0 : index
    %c0_11 = arith.constant 0 : index
    %6 = vector.load %arg7[%c0_10, %c0_11] : memref<128x32xbf16, #tpu.memory_space<vmem>>, vector<128x32xbf16>
    %c0_12 = arith.constant 0 : index
    %c0_13 = arith.constant 0 : index
    %7 = vector.load %arg8[%c0_12, %c0_13] : memref<1x32xf32, #tpu.memory_space<vmem>>, vector<1x32xf32>
    %cst = arith.constant dense<0.000000e+00> : vector<16xf32>
    %8 = vector.multi_reduction <add>, %1, %cst [1] : vector<16x32xf32> to vector<16xf32>
    %9 = vector.shape_cast %8 : vector<16xf32> to vector<16x1xf32>
    %cst_14 = arith.constant 3.200000e+01 : f32
    %10 = vector.broadcast %cst_14 : f32 to vector<16x1xf32>
    %11 = arith.divf %9, %10 : vector<16x1xf32>
    %12 = vector.broadcast %11 : vector<16x1xf32> to vector<16x32xf32>
    %13 = arith.subf %1, %12 : vector<16x32xf32>
    %14 = arith.mulf %13, %13 : vector<16x32xf32>
    %cst_15 = arith.constant dense<0.000000e+00> : vector<16xf32>
    %15 = vector.multi_reduction <add>, %14, %cst_15 [1] : vector<16x32xf32> to vector<16xf32>
    %16 = vector.shape_cast %15 : vector<16xf32> to vector<16x1xf32>
    %cst_16 = arith.constant 3.200000e+01 : f32
    %17 = vector.broadcast %cst_16 : f32 to vector<16x1xf32>
    %18 = arith.divf %16, %17 : vector<16x1xf32>
    %19 = vector.broadcast %11 : vector<16x1xf32> to vector<16x32xf32>
    %20 = arith.subf %1, %19 : vector<16x32xf32>
    %cst_17 = arith.constant 9.99999974E-6 : f32
    %21 = vector.broadcast %cst_17 : f32 to vector<16x1xf32>
    %22 = arith.addf %18, %21 : vector<16x1xf32>
    %23 = math.rsqrt %22 : vector<16x1xf32>
    %24 = vector.broadcast %23 : vector<16x1xf32> to vector<16x32xf32>
    %25 = arith.mulf %20, %24 : vector<16x32xf32>
    %26 = vector.broadcast %2 : vector<1x32xf32> to vector<16x32xf32>
    %27 = arith.mulf %25, %26 : vector<16x32xf32>
    %28 = vector.broadcast %3 : vector<1x32xf32> to vector<16x32xf32>
    %29 = arith.addf %27, %28 : vector<16x32xf32>
    %30 = arith.truncf %29 : vector<16x32xf32> to vector<16x32xbf16>
    %cst_18 = arith.constant dense<0.000000e+00> : vector<16x128xf32>
    %31 = tpu.matmul %30, %4, %cst_18 {dimension_numbers = #tpu.dot_dimension_numbers<[1], [0], [0], [1], [0, 0, 1, 1], [], []>} : vector<16x32xbf16>, vector<32x128xbf16>, vector<16x128xf32> -> vector<16x128xf32>
    %32 = vector.broadcast %5 : vector<1x128xf32> to vector<16x128xf32>
    %33 = arith.addf %31, %32 : vector<16x128xf32>
    %34 = arith.negf %33 : vector<16x128xf32>
    %35 = math.exp %34 : vector<16x128xf32>
    %cst_19 = arith.constant 1.000000e+00 : f32
    %36 = vector.broadcast %cst_19 : f32 to vector<16x128xf32>
    %37 = arith.addf %36, %35 : vector<16x128xf32>
    %38 = arith.divf %36, %37 : vector<16x128xf32>
    %39 = arith.mulf %33, %38 : vector<16x128xf32>
    %40 = arith.truncf %39 : vector<16x128xf32> to vector<16x128xbf16>
    %cst_20 = arith.constant dense<0.000000e+00> : vector<16x32xf32>
    %41 = tpu.matmul %40, %6, %cst_20 {dimension_numbers = #tpu.dot_dimension_numbers<[1], [0], [0], [1], [0, 0, 1, 1], [], []>} : vector<16x128xbf16>, vector<128x32xbf16>, vector<16x32xf32> -> vector<16x32xf32>
    %42 = vector.broadcast %7 : vector<1x32xf32> to vector<16x32xf32>
    %43 = arith.addf %41, %42 : vector<16x32xf32>
    %cst_21 = arith.constant 5.000000e-01 : f32
    %44 = vector.broadcast %cst_21 : f32 to vector<16x32xf32>
    %45 = arith.mulf %44, %43 : vector<16x32xf32>
    %46 = arith.addf %1, %45 : vector<16x32xf32>
    %c0_22 = arith.constant 0 : index
    %c0_23 = arith.constant 0 : index
    %c0_24 = arith.constant 0 : index
    %47 = vector.load %arg9[%c0_22, %c0_23, %c0_24] : memref<1x16x32xf32, #tpu.memory_space<vmem>>, vector<1x16x32xf32>
    %48 = vector.shape_cast %47 : vector<1x16x32xf32> to vector<16x32xf32>
    %49 = vector.shape_cast %46 : vector<16x32xf32> to vector<1x16x32xf32>
    tpu.vector_store %arg9[%c0_22, %c0_23, %c0_24], %49 {strides = array<i32>} : memref<1x16x32xf32, #tpu.memory_space<vmem>>, vector<1x16x32xf32>,
    return
  }
  func.func @transform_0(%arg0: i32, %arg1: i32) -> (i32, i32, i32) {
    %c0_i32 = arith.constant 0 : i32
    %c0_i32_0 = arith.constant 0 : i32
    return %arg0, %arg1, %c0_i32 : i32, i32, i32
  }
  func.func @transform_1(%arg0: i32, %arg1: i32) -> (i32, i32) {
    %c0_i32 = arith.constant 0 : i32
    %c0_i32_0 = arith.constant 0 : i32
    %c0_i32_1 = arith.constant 0 : i32
    return %c0_i32, %c0_i32_0 : i32, i32
  }
  func.func @transform_2(%arg0: i32, %arg1: i32) -> (i32, i32) {
    %c0_i32 = arith.constant 0 : i32
    %c0_i32_0 = arith.constant 0 : i32
    %c0_i32_1 = arith.constant 0 : i32
    return %c0_i32, %c0_i32_0 : i32, i32
  }
  func.func @transform_3(%arg0: i32, %arg1: i32) -> (i32, i32) {
    %c0_i32 = arith.constant 0 : i32
    %c0_i32_0 = arith.constant 0 : i32
    %c0_i32_1 = arith.constant 0 : i32
    return %c0_i32, %c0_i32_0 : i32, i32
  }
  func.func @transform_4(%arg0: i32, %arg1: i32) -> (i32, i32) {
    %c0_i32 = arith.constant 0 : i32
    %c0_i32_0 = arith.constant 0 : i32
    %c0_i32_1 = arith.constant 0 : i32
    return %c0_i32, %c0_i32_0 : i32, i32
  }
  func.func @transform_5(%arg0: i32, %arg1: i32) -> (i32, i32) {
    %c0_i32 = arith.constant 0 : i32
    %c0_i32_0 = arith.constant 0 : i32
    %c0_i32_1 = arith.constant 0 : i32
    return %c0_i32, %c0_i32_0 : i32, i32
  }
  func.func @transform_6(%arg0: i32, %arg1: i32) -> (i32, i32) {
    %c0_i32 = arith.constant 0 : i32
    %c0_i32_0 = arith.constant 0 : i32
    %c0_i32_1 = arith.constant 0 : i32
    return %c0_i32, %c0_i32_0 : i32, i32
  }
  func.func @transform_7(%arg0: i32, %arg1: i32) -> (i32, i32, i32) {
    %c0_i32 = arith.constant 0 : i32
    %c0_i32_0 = arith.constant 0 : i32
    return %arg0, %arg1, %c0_i32 : i32, i32, i32
  }
}

module attributes {stable_mosaic.version = 11 : i64} {
  func.func @_kv_proj_kernel(%arg0: i32, %arg1: i32, %arg2: memref<1x16x32xf32, #tpu.memory_space<vmem>>, %arg3: memref<1x32xf32, #tpu.memory_space<vmem>>, %arg4: memref<1x32xf32, #tpu.memory_space<vmem>>, %arg5: memref<32x32xbf16, #tpu.memory_space<vmem>>, %arg6: memref<1x32xf32, #tpu.memory_space<vmem>>, %arg7: memref<32x32xbf16, #tpu.memory_space<vmem>>, %arg8: memref<1x32xf32, #tpu.memory_space<vmem>>, %arg9: memref<1x16x32xbf16, #tpu.memory_space<vmem>>, %arg10: memref<1x16x32xbf16, #tpu.memory_space<vmem>>) attributes {dimension_semantics = [#tpu.dimension_semantics<parallel>, #tpu.dimension_semantics<parallel>], iteration_bounds = array<i64: 2, 1>, scalar_prefetch = 0 : i64, scratch_operands = 0 : i64, tpu.core_type = #tpu.core_type<tc>, window_params = [{transform_indices = @transform_0, window_bounds = array<i64: 1, 16, 32>}, {pipeline_mode = #tpu.pipeline_mode<synchronous>, transform_indices = @transform_1, window_bounds = array<i64: 1, 32>}, {pipeline_mode = #tpu.pipeline_mode<synchronous>, transform_indices = @transform_2, window_bounds = array<i64: 1, 32>}, {pipeline_mode = #tpu.pipeline_mode<synchronous>, transform_indices = @transform_3, window_bounds = array<i64: 32, 32>}, {pipeline_mode = #tpu.pipeline_mode<synchronous>, transform_indices = @transform_4, window_bounds = array<i64: 1, 32>}, {pipeline_mode = #tpu.pipeline_mode<synchronous>, transform_indices = @transform_5, window_bounds = array<i64: 32, 32>}, {pipeline_mode = #tpu.pipeline_mode<synchronous>, transform_indices = @transform_6, window_bounds = array<i64: 1, 32>}, {transform_indices = @transform_7, window_bounds = array<i64: 1, 16, 32>}, {transform_indices = @transform_8, window_bounds = array<i64: 1, 16, 32>}]} {
    %c0 = arith.constant 0 : index
    %c0_0 = arith.constant 0 : index
    %c0_1 = arith.constant 0 : index
    %0 = vector.load %arg2[%c0, %c0_0, %c0_1] : memref<1x16x32xf32, #tpu.memory_space<vmem>>, vector<1x16x32xf32>
    %1 = vector.shape_cast %0 : vector<1x16x32xf32> to vector<16x32xf32>
    %c0_2 = arith.constant 0 : index
    %c0_3 = arith.constant 0 : index
    %2 = vector.load %arg3[%c0_2, %c0_3] : memref<1x32xf32, #tpu.memory_space<vmem>>, vector<1x32xf32>
    %c0_4 = arith.constant 0 : index
    %c0_5 = arith.constant 0 : index
    %3 = vector.load %arg4[%c0_4, %c0_5] : memref<1x32xf32, #tpu.memory_space<vmem>>, vector<1x32xf32>
    %cst = arith.constant dense<0.000000e+00> : vector<16xf32>
    %4 = vector.multi_reduction <add>, %1, %cst [1] : vector<16x32xf32> to vector<16xf32>
    %5 = vector.shape_cast %4 : vector<16xf32> to vector<16x1xf32>
    %cst_6 = arith.constant 3.200000e+01 : f32
    %6 = vector.broadcast %cst_6 : f32 to vector<16x1xf32>
    %7 = arith.divf %5, %6 : vector<16x1xf32>
    %8 = vector.broadcast %7 : vector<16x1xf32> to vector<16x32xf32>
    %9 = arith.subf %1, %8 : vector<16x32xf32>
    %10 = arith.mulf %9, %9 : vector<16x32xf32>
    %cst_7 = arith.constant dense<0.000000e+00> : vector<16xf32>
    %11 = vector.multi_reduction <add>, %10, %cst_7 [1] : vector<16x32xf32> to vector<16xf32>
    %12 = vector.shape_cast %11 : vector<16xf32> to vector<16x1xf32>
    %cst_8 = arith.constant 3.200000e+01 : f32
    %13 = vector.broadcast %cst_8 : f32 to vector<16x1xf32>
    %14 = arith.divf %12, %13 : vector<16x1xf32>
    %15 = vector.broadcast %7 : vector<16x1xf32> to vector<16x32xf32>
    %16 = arith.subf %1, %15 : vector<16x32xf32>
    %cst_9 = arith.constant 9.99999974E-6 : f32
    %17 = vector.broadcast %cst_9 : f32 to vector<16x1xf32>
    %18 = arith.addf %14, %17 : vector<16x1xf32>
    %19 = math.rsqrt %18 : vector<16x1xf32>
    %20 = vector.broadcast %19 : vector<16x1xf32> to vector<16x32xf32>
    %21 = arith.mulf %16, %20 : vector<16x32xf32>
    %22 = vector.broadcast %2 : vector<1x32xf32> to vector<16x32xf32>
    %23 = arith.mulf %21, %22 : vector<16x32xf32>
    %24 = vector.broadcast %3 : vector<1x32xf32> to vector<16x32xf32>
    %25 = arith.addf %23, %24 : vector<16x32xf32>
    %c0_10 = arith.constant 0 : index
    %c0_11 = arith.constant 0 : index
    %26 = vector.load %arg5[%c0_10, %c0_11] : memref<32x32xbf16, #tpu.memory_space<vmem>>, vector<32x32xbf16>
    %27 = arith.truncf %25 : vector<16x32xf32> to vector<16x32xbf16>
    %cst_12 = arith.constant dense<0.000000e+00> : vector<16x32xf32>
    %28 = tpu.matmul %27, %26, %cst_12 {dimension_numbers = #tpu.dot_dimension_numbers<[1], [0], [0], [1], [0, 0, 1, 1], [], []>} : vector<16x32xbf16>, vector<32x32xbf16>, vector<16x32xf32> -> vector<16x32xf32>
    %c0_13 = arith.constant 0 : index
    %c0_14 = arith.constant 0 : index
    %29 = vector.load %arg6[%c0_13, %c0_14] : memref<1x32xf32, #tpu.memory_space<vmem>>, vector<1x32xf32>
    %30 = vector.broadcast %29 : vector<1x32xf32> to vector<16x32xf32>
    %31 = arith.addf %28, %30 : vector<16x32xf32>
    %32 = arith.truncf %31 : vector<16x32xf32> to vector<16x32xbf16>
    %c0_15 = arith.constant 0 : index
    %c0_16 = arith.constant 0 : index
    %c0_17 = arith.constant 0 : index
    %33 = vector.load %arg9[%c0_15, %c0_16, %c0_17] : memref<1x16x32xbf16, #tpu.memory_space<vmem>>, vector<1x16x32xbf16>
    %34 = vector.shape_cast %33 : vector<1x16x32xbf16> to vector<16x32xbf16>
    %35 = vector.shape_cast %32 : vector<16x32xbf16> to vector<1x16x32xbf16>
    tpu.vector_store %arg9[%c0_15, %c0_16, %c0_17], %35 {strides = array<i32>} : memref<1x16x32xbf16, #tpu.memory_space<vmem>>, vector<1x16x32xbf16>,
    %c0_18 = arith.constant 0 : index
    %c0_19 = arith.constant 0 : index
    %36 = vector.load %arg7[%c0_18, %c0_19] : memref<32x32xbf16, #tpu.memory_space<vmem>>, vector<32x32xbf16>
    %37 = arith.truncf %25 : vector<16x32xf32> to vector<16x32xbf16>
    %cst_20 = arith.constant dense<0.000000e+00> : vector<16x32xf32>
    %38 = tpu.matmul %37, %36, %cst_20 {dimension_numbers = #tpu.dot_dimension_numbers<[1], [0], [0], [1], [0, 0, 1, 1], [], []>} : vector<16x32xbf16>, vector<32x32xbf16>, vector<16x32xf32> -> vector<16x32xf32>
    %c0_21 = arith.constant 0 : index
    %c0_22 = arith.constant 0 : index
    %39 = vector.load %arg8[%c0_21, %c0_22] : memref<1x32xf32, #tpu.memory_space<vmem>>, vector<1x32xf32>
    %40 = vector.broadcast %39 : vector<1x32xf32> to vector<16x32xf32>
    %41 = arith.addf %38, %40 : vector<16x32xf32>
    %42 = arith.truncf %41 : vector<16x32xf32> to vector<16x32xbf16>
    %c0_23 = arith.constant 0 : index
    %c0_24 = arith.constant 0 : index
    %c0_25 = arith.constant 0 : index
    %43 = vector.load %arg10[%c0_23, %c0_24, %c0_25] : memref<1x16x32xbf16, #tpu.memory_space<vmem>>, vector<1x16x32xbf16>
    %44 = vector.shape_cast %43 : vector<1x16x32xbf16> to vector<16x32xbf16>
    %45 = vector.shape_cast %42 : vector<16x32xbf16> to vector<1x16x32xbf16>
    tpu.vector_store %arg10[%c0_23, %c0_24, %c0_25], %45 {strides = array<i32>} : memref<1x16x32xbf16, #tpu.memory_space<vmem>>, vector<1x16x32xbf16>,
    return
  }
  func.func @transform_0(%arg0: i32, %arg1: i32) -> (i32, i32, i32) {
    %c0_i32 = arith.constant 0 : i32
    %c0_i32_0 = arith.constant 0 : i32
    return %arg0, %arg1, %c0_i32 : i32, i32, i32
  }
  func.func @transform_1(%arg0: i32, %arg1: i32) -> (i32, i32) {
    %c0_i32 = arith.constant 0 : i32
    %c0_i32_0 = arith.constant 0 : i32
    %c0_i32_1 = arith.constant 0 : i32
    return %c0_i32, %c0_i32_0 : i32, i32
  }
  func.func @transform_2(%arg0: i32, %arg1: i32) -> (i32, i32) {
    %c0_i32 = arith.constant 0 : i32
    %c0_i32_0 = arith.constant 0 : i32
    %c0_i32_1 = arith.constant 0 : i32
    return %c0_i32, %c0_i32_0 : i32, i32
  }
  func.func @transform_3(%arg0: i32, %arg1: i32) -> (i32, i32) {
    %c0_i32 = arith.constant 0 : i32
    %c0_i32_0 = arith.constant 0 : i32
    %c0_i32_1 = arith.constant 0 : i32
    return %c0_i32, %c0_i32_0 : i32, i32
  }
  func.func @transform_4(%arg0: i32, %arg1: i32) -> (i32, i32) {
    %c0_i32 = arith.constant 0 : i32
    %c0_i32_0 = arith.constant 0 : i32
    %c0_i32_1 = arith.constant 0 : i32
    return %c0_i32, %c0_i32_0 : i32, i32
  }
  func.func @transform_5(%arg0: i32, %arg1: i32) -> (i32, i32) {
    %c0_i32 = arith.constant 0 : i32
    %c0_i32_0 = arith.constant 0 : i32
    %c0_i32_1 = arith.constant 0 : i32
    return %c0_i32, %c0_i32_0 : i32, i32
  }
  func.func @transform_6(%arg0: i32, %arg1: i32) -> (i32, i32) {
    %c0_i32 = arith.constant 0 : i32
    %c0_i32_0 = arith.constant 0 : i32
    %c0_i32_1 = arith.constant 0 : i32
    return %c0_i32, %c0_i32_0 : i32, i32
  }
  func.func @transform_7(%arg0: i32, %arg1: i32) -> (i32, i32, i32) {
    %c0_i32 = arith.constant 0 : i32
    %c0_i32_0 = arith.constant 0 : i32
    return %arg0, %arg1, %c0_i32 : i32, i32, i32
  }
  func.func @transform_8(%arg0: i32, %arg1: i32) -> (i32, i32, i32) {
    %c0_i32 = arith.constant 0 : i32
    %c0_i32_0 = arith.constant 0 : i32
    return %arg0, %arg1, %c0_i32 : i32, i32, i32
  }
}

module attributes {stable_mosaic.version = 11 : i64} {
  func.func @_attn_kernel_causal(%arg0: i32, %arg1: i32, %arg2: memref<1x16x32xf32, #tpu.memory_space<vmem>>, %arg3: memref<1x16x32xbf16, #tpu.memory_space<vmem>>, %arg4: memref<1x16x32xbf16, #tpu.memory_space<vmem>>, %arg5: memref<1x32x128xbf16, #tpu.memory_space<vmem>>, %arg6: memref<1x32xf32, #tpu.memory_space<vmem>>, %arg7: memref<1x32xf32, #tpu.memory_space<vmem>>, %arg8: memref<32x32xbf16, #tpu.memory_space<vmem>>, %arg9: memref<1x32xf32, #tpu.memory_space<vmem>>, %arg10: memref<1x32xf32, #tpu.memory_space<vmem>>, %arg11: memref<1x32xf32, #tpu.memory_space<vmem>>, %arg12: memref<32x32xbf16, #tpu.memory_space<vmem>>, %arg13: memref<1x32xf32, #tpu.memory_space<vmem>>, %arg14: memref<1x16x32xf32, #tpu.memory_space<vmem>>, %arg15: memref<16x32xf32, #tpu.memory_space<vmem>>) attributes {dimension_semantics = [#tpu.dimension_semantics<parallel>, #tpu.dimension_semantics<parallel>], iteration_bounds = array<i64: 2, 1>, scalar_prefetch = 0 : i64, scratch_operands = 1 : i64, tpu.core_type = #tpu.core_type<tc>, window_params = [{transform_indices = @transform_0, window_bounds = array<i64: 1, 16, 32>}, {transform_indices = @transform_1, window_bounds = array<i64: 1, 16, 32>}, {transform_indices = @transform_2, window_bounds = array<i64: 1, 16, 32>}, {transform_indices = @transform_3, window_bounds = array<i64: 1, 32, 128>}, {pipeline_mode = #tpu.pipeline_mode<synchronous>, transform_indices = @transform_4, window_bounds = array<i64: 1, 32>}, {pipeline_mode = #tpu.pipeline_mode<synchronous>, transform_indices = @transform_5, window_bounds = array<i64: 1, 32>}, {pipeline_mode = #tpu.pipeline_mode<synchronous>, transform_indices = @transform_6, window_bounds = array<i64: 32, 32>}, {pipeline_mode = #tpu.pipeline_mode<synchronous>, transform_indices = @transform_7, window_bounds = array<i64: 1, 32>}, {pipeline_mode = #tpu.pipeline_mode<synchronous>, transform_indices = @transform_8, window_bounds = array<i64: 1, 32>}, {pipeline_mode = #tpu.pipeline_mode<synchronous>, transform_indices = @transform_9, window_bounds = array<i64: 1, 32>}, {pipeline_mode = #tpu.pipeline_mode<synchronous>, transform_indices = @transform_10, window_bounds = array<i64: 32, 32>}, {pipeline_mode = #tpu.pipeline_mode<synchronous>, transform_indices = @transform_11, window_bounds = array<i64: 1, 32>}, {transform_indices = @transform_12, window_bounds = array<i64: 1, 16, 32>}]} {
    %c0 = arith.constant 0 : index
    %c0_0 = arith.constant 0 : index
    %c0_1 = arith.constant 0 : index
    %0 = vector.load %arg2[%c0, %c0_0, %c0_1] : memref<1x16x32xf32, #tpu.memory_space<vmem>>, vector<1x16x32xf32>
    %1 = vector.shape_cast %0 : vector<1x16x32xf32> to vector<16x32xf32>
    %c16_i32 = arith.constant 16 : i32
    %2 = arith.muli %arg1, %c16_i32 : i32
    %c0_2 = arith.constant 0 : index
    %c0_3 = arith.constant 0 : index
    %3 = vector.load %arg6[%c0_2, %c0_3] : memref<1x32xf32, #tpu.memory_space<vmem>>, vector<1x32xf32>
    %c0_4 = arith.constant 0 : index
    %c0_5 = arith.constant 0 : index
    %4 = vector.load %arg7[%c0_4, %c0_5] : memref<1x32xf32, #tpu.memory_space<vmem>>, vector<1x32xf32>
    %cst = arith.constant dense<0.000000e+00> : vector<16xf32>
    %5 = vector.multi_reduction <add>, %1, %cst [1] : vector<16x32xf32> to vector<16xf32>
    %6 = vector.shape_cast %5 : vector<16xf32> to vector<16x1xf32>
    %cst_6 = arith.constant 3.200000e+01 : f32
    %7 = vector.broadcast %cst_6 : f32 to vector<16x1xf32>
    %8 = arith.divf %6, %7 : vector<16x1xf32>
    %9 = vector.broadcast %8 : vector<16x1xf32> to vector<16x32xf32>
    %10 = arith.subf %1, %9 : vector<16x32xf32>
    %11 = arith.mulf %10, %10 : vector<16x32xf32>
    %cst_7 = arith.constant dense<0.000000e+00> : vector<16xf32>
    %12 = vector.multi_reduction <add>, %11, %cst_7 [1] : vector<16x32xf32> to vector<16xf32>
    %13 = vector.shape_cast %12 : vector<16xf32> to vector<16x1xf32>
    %cst_8 = arith.constant 3.200000e+01 : f32
    %14 = vector.broadcast %cst_8 : f32 to vector<16x1xf32>
    %15 = arith.divf %13, %14 : vector<16x1xf32>
    %16 = vector.broadcast %8 : vector<16x1xf32> to vector<16x32xf32>
    %17 = arith.subf %1, %16 : vector<16x32xf32>
    %cst_9 = arith.constant 9.99999974E-6 : f32
    %18 = vector.broadcast %cst_9 : f32 to vector<16x1xf32>
    %19 = arith.addf %15, %18 : vector<16x1xf32>
    %20 = math.rsqrt %19 : vector<16x1xf32>
    %21 = vector.broadcast %20 : vector<16x1xf32> to vector<16x32xf32>
    %22 = arith.mulf %17, %21 : vector<16x32xf32>
    %23 = vector.broadcast %3 : vector<1x32xf32> to vector<16x32xf32>
    %24 = arith.mulf %22, %23 : vector<16x32xf32>
    %25 = vector.broadcast %4 : vector<1x32xf32> to vector<16x32xf32>
    %26 = arith.addf %24, %25 : vector<16x32xf32>
    %c0_10 = arith.constant 0 : index
    %c0_11 = arith.constant 0 : index
    %27 = vector.load %arg8[%c0_10, %c0_11] : memref<32x32xbf16, #tpu.memory_space<vmem>>, vector<32x32xbf16>
    %28 = arith.truncf %26 : vector<16x32xf32> to vector<16x32xbf16>
    %cst_12 = arith.constant dense<0.000000e+00> : vector<16x32xf32>
    %29 = tpu.matmul %28, %27, %cst_12 {dimension_numbers = #tpu.dot_dimension_numbers<[1], [0], [0], [1], [0, 0, 1, 1], [], []>} : vector<16x32xbf16>, vector<32x32xbf16>, vector<16x32xf32> -> vector<16x32xf32>
    %c0_13 = arith.constant 0 : index
    %c0_14 = arith.constant 0 : index
    %30 = vector.load %arg9[%c0_13, %c0_14] : memref<1x32xf32, #tpu.memory_space<vmem>>, vector<1x32xf32>
    %31 = vector.broadcast %30 : vector<1x32xf32> to vector<16x32xf32>
    %32 = arith.addf %29, %31 : vector<16x32xf32>
    %c0_15 = arith.constant 0 : index
    %c0_16 = arith.constant 0 : index
    %33 = vector.load %arg10[%c0_15, %c0_16] : memref<1x32xf32, #tpu.memory_space<vmem>>, vector<1x32xf32>
    %34 = vector.broadcast %33 : vector<1x32xf32> to vector<16x32xf32>
    %35 = arith.addf %32, %34 : vector<16x32xf32>
    %c0_17 = arith.constant 0 : index
    %c0_18 = arith.constant 0 : index
    %36 = vector.load %arg11[%c0_17, %c0_18] : memref<1x32xf32, #tpu.memory_space<vmem>>, vector<1x32xf32>
    %37 = vector.broadcast %36 : vector<1x32xf32> to vector<16x32xf32>
    %38 = arith.addf %32, %37 : vector<16x32xf32>
    %39 = tpu.iota {dimensions = array<i32: 0>} : vector<16x16xi32>
    %40 = vector.broadcast %2 : i32 to vector<16x16xi32>
    %41 = arith.addi %40, %39 : vector<16x16xi32>
    %42 = tpu.iota {dimensions = array<i32: 1>} : vector<16x16xi32>
    %43 = vector.extract_strided_slice %35 {offsets = [0, 0], sizes = [16, 8], strides = [1, 1]} : vector<16x32xf32> to vector<16x8xf32>
    %c0_19 = arith.constant 0 : index
    %c0_20 = arith.constant 0 : index
    %c0_21 = arith.constant 0 : index
    %44 = vector.load %arg3[%c0_19, %c0_20, %c0_21] : memref<1x16x32xbf16, #tpu.memory_space<vmem>>, vector<1x16x8xbf16>
    %45 = vector.shape_cast %44 : vector<1x16x8xbf16> to vector<16x8xbf16>
    %46 = arith.truncf %43 : vector<16x8xf32> to vector<16x8xbf16>
    %cst_22 = arith.constant dense<0.000000e+00> : vector<16x16xf32>
    %47 = tpu.matmul %46, %45, %cst_22 {dimension_numbers = #tpu.dot_dimension_numbers<[1], [1], [0], [0], [0, 0, 1, 0], [], []>} : vector<16x8xbf16>, vector<16x8xbf16>, vector<16x16xf32> -> vector<16x16xf32>
    %48 = vector.extract_strided_slice %38 {offsets = [0, 0], sizes = [16, 8], strides = [1, 1]} : vector<16x32xf32> to vector<16x8xf32>
    %c0_23 = arith.constant 0 : index
    %c0_24 = arith.constant 0 : index
    %c0_25 = arith.constant 0 : index
    %49 = vector.load %arg5[%c0_23, %c0_24, %c0_25] : memref<1x32x128xbf16, #tpu.memory_space<vmem>>, vector<1x8x128xbf16>
    %50 = vector.shape_cast %49 : vector<1x8x128xbf16> to vector<8x128xbf16>
    %51 = arith.truncf %48 : vector<16x8xf32> to vector<16x8xbf16>
    %cst_26 = arith.constant dense<0.000000e+00> : vector<16x128xf32>
    %52 = tpu.matmul %51, %50, %cst_26 {dimension_numbers = #tpu.dot_dimension_numbers<[1], [0], [0], [1], [0, 0, 1, 1], [], []>} : vector<16x8xbf16>, vector<8x128xbf16>, vector<16x128xf32> -> vector<16x128xf32>
    %c0_i32 = arith.constant 0 : i32
    %53 = tpu.dynamic_rotate %52 by %c0_i32 dim 1 {stride = 1 : si32, stride_dimension = 0 : si32} : vector<16x128xf32>, i32 -> vector<16x128xf32>
    %54 = vector.extract_strided_slice %53 {offsets = [0, 0], sizes = [16, 16], strides = [1, 1]} : vector<16x128xf32> to vector<16x16xf32>
    %55 = arith.addf %47, %54 : vector<16x16xf32>
    %cst_27 = arith.constant 0.176776692 : f32
    %56 = vector.broadcast %cst_27 : f32 to vector<16x16xf32>
    %57 = arith.mulf %55, %56 : vector<16x16xf32>
    %58 = arith.cmpi sgt, %42, %41 : vector<16x16xi32>
    %cst_28 = arith.constant -1.000000e+09 : f32
    %59 = vector.broadcast %cst_28 : f32 to vector<16x16xf32>
    %60 = arith.select %58, %59, %57 : vector<16x16xi1>, vector<16x16xf32>
    %cst_29 = arith.constant dense<0xFF800000> : vector<16xf32>
    %61 = vector.multi_reduction <maximumf>, %60, %cst_29 [1] : vector<16x16xf32> to vector<16xf32>
    %62 = vector.shape_cast %61 : vector<16xf32> to vector<16x1xf32>
    %63 = vector.broadcast %62 : vector<16x1xf32> to vector<16x16xf32>
    %64 = arith.subf %60, %63 : vector<16x16xf32>
    %65 = math.exp %64 : vector<16x16xf32>
    %cst_30 = arith.constant dense<0.000000e+00> : vector<16xf32>
    %66 = vector.multi_reduction <add>, %65, %cst_30 [1] : vector<16x16xf32> to vector<16xf32>
    %67 = vector.shape_cast %66 : vector<16xf32> to vector<16x1xf32>
    %68 = tpu.reciprocal %67 {approx = true} : vector<16x1xf32> -> vector<16x1xf32>
    %69 = vector.broadcast %68 : vector<16x1xf32> to vector<16x16xf32>
    %70 = arith.mulf %65, %69 : vector<16x16xf32>
    %c0_31 = arith.constant 0 : index
    %c0_32 = arith.constant 0 : index
    %c0_33 = arith.constant 0 : index
    %71 = vector.load %arg4[%c0_31, %c0_32, %c0_33] : memref<1x16x32xbf16, #tpu.memory_space<vmem>>, vector<1x16x8xbf16>
    %72 = vector.shape_cast %71 : vector<1x16x8xbf16> to vector<16x8xbf16>
    %73 = arith.truncf %70 : vector<16x16xf32> to vector<16x16xbf16>
    %cst_34 = arith.constant dense<0.000000e+00> : vector<16x8xf32>
    %74 = tpu.matmul %73, %72, %cst_34 {dimension_numbers = #tpu.dot_dimension_numbers<[1], [0], [0], [1], [0, 0, 1, 1], [], []>} : vector<16x16xbf16>, vector<16x8xbf16>, vector<16x8xf32> -> vector<16x8xf32>
    %c0_35 = arith.constant 0 : index
    %c0_36 = arith.constant 0 : index
    %75 = vector.load %arg15[%c0_35, %c0_36] : memref<16x32xf32, #tpu.memory_space<vmem>>, vector<16x8xf32>
    tpu.vector_store %arg15[%c0_35, %c0_36], %74 {strides = array<i32>} : memref<16x32xf32, #tpu.memory_space<vmem>>, vector<16x8xf32>,
    %76 = vector.extract_strided_slice %35 {offsets = [0, 8], sizes = [16, 8], strides = [1, 1]} : vector<16x32xf32> to vector<16x8xf32>
    %c0_37 = arith.constant 0 : index
    %c0_38 = arith.constant 0 : index
    %c8 = arith.constant 8 : index
    %77 = vector.load %arg3[%c0_37, %c0_38, %c8] : memref<1x16x32xbf16, #tpu.memory_space<vmem>>, vector<1x16x8xbf16>
    %78 = vector.shape_cast %77 : vector<1x16x8xbf16> to vector<16x8xbf16>
    %79 = arith.truncf %76 : vector<16x8xf32> to vector<16x8xbf16>
    %cst_39 = arith.constant dense<0.000000e+00> : vector<16x16xf32>
    %80 = tpu.matmul %79, %78, %cst_39 {dimension_numbers = #tpu.dot_dimension_numbers<[1], [1], [0], [0], [0, 0, 1, 0], [], []>} : vector<16x8xbf16>, vector<16x8xbf16>, vector<16x16xf32> -> vector<16x16xf32>
    %81 = vector.extract_strided_slice %38 {offsets = [0, 8], sizes = [16, 8], strides = [1, 1]} : vector<16x32xf32> to vector<16x8xf32>
    %c0_40 = arith.constant 0 : index
    %c8_41 = arith.constant 8 : index
    %c0_42 = arith.constant 0 : index
    %82 = vector.load %arg5[%c0_40, %c8_41, %c0_42] : memref<1x32x128xbf16, #tpu.memory_space<vmem>>, vector<1x8x128xbf16>
    %83 = vector.shape_cast %82 : vector<1x8x128xbf16> to vector<8x128xbf16>
    %84 = arith.truncf %81 : vector<16x8xf32> to vector<16x8xbf16>
    %cst_43 = arith.constant dense<0.000000e+00> : vector<16x128xf32>
    %85 = tpu.matmul %84, %83, %cst_43 {dimension_numbers = #tpu.dot_dimension_numbers<[1], [0], [0], [1], [0, 0, 1, 1], [], []>} : vector<16x8xbf16>, vector<8x128xbf16>, vector<16x128xf32> -> vector<16x128xf32>
    %c0_i32_44 = arith.constant 0 : i32
    %86 = tpu.dynamic_rotate %85 by %c0_i32_44 dim 1 {stride = 1 : si32, stride_dimension = 0 : si32} : vector<16x128xf32>, i32 -> vector<16x128xf32>
    %87 = vector.extract_strided_slice %86 {offsets = [0, 0], sizes = [16, 16], strides = [1, 1]} : vector<16x128xf32> to vector<16x16xf32>
    %88 = arith.addf %80, %87 : vector<16x16xf32>
    %cst_45 = arith.constant 0.176776692 : f32
    %89 = vector.broadcast %cst_45 : f32 to vector<16x16xf32>
    %90 = arith.mulf %88, %89 : vector<16x16xf32>
    %91 = arith.cmpi sgt, %42, %41 : vector<16x16xi32>
    %cst_46 = arith.constant -1.000000e+09 : f32
    %92 = vector.broadcast %cst_46 : f32 to vector<16x16xf32>
    %93 = arith.select %91, %92, %90 : vector<16x16xi1>, vector<16x16xf32>
    %cst_47 = arith.constant dense<0xFF800000> : vector<16xf32>
    %94 = vector.multi_reduction <maximumf>, %93, %cst_47 [1] : vector<16x16xf32> to vector<16xf32>
    %95 = vector.shape_cast %94 : vector<16xf32> to vector<16x1xf32>
    %96 = vector.broadcast %95 : vector<16x1xf32> to vector<16x16xf32>
    %97 = arith.subf %93, %96 : vector<16x16xf32>
    %98 = math.exp %97 : vector<16x16xf32>
    %cst_48 = arith.constant dense<0.000000e+00> : vector<16xf32>
    %99 = vector.multi_reduction <add>, %98, %cst_48 [1] : vector<16x16xf32> to vector<16xf32>
    %100 = vector.shape_cast %99 : vector<16xf32> to vector<16x1xf32>
    %101 = tpu.reciprocal %100 {approx = true} : vector<16x1xf32> -> vector<16x1xf32>
    %102 = vector.broadcast %101 : vector<16x1xf32> to vector<16x16xf32>
    %103 = arith.mulf %98, %102 : vector<16x16xf32>
    %c0_49 = arith.constant 0 : index
    %c0_50 = arith.constant 0 : index
    %c8_51 = arith.constant 8 : index
    %104 = vector.load %arg4[%c0_49, %c0_50, %c8_51] : memref<1x16x32xbf16, #tpu.memory_space<vmem>>, vector<1x16x8xbf16>
    %105 = vector.shape_cast %104 : vector<1x16x8xbf16> to vector<16x8xbf16>
    %106 = arith.truncf %103 : vector<16x16xf32> to vector<16x16xbf16>
    %cst_52 = arith.constant dense<0.000000e+00> : vector<16x8xf32>
    %107 = tpu.matmul %106, %105, %cst_52 {dimension_numbers = #tpu.dot_dimension_numbers<[1], [0], [0], [1], [0, 0, 1, 1], [], []>} : vector<16x16xbf16>, vector<16x8xbf16>, vector<16x8xf32> -> vector<16x8xf32>
    %c0_53 = arith.constant 0 : index
    %c8_54 = arith.constant 8 : index
    %108 = vector.load %arg15[%c0_53, %c8_54] : memref<16x32xf32, #tpu.memory_space<vmem>>, vector<16x8xf32>
    tpu.vector_store %arg15[%c0_53, %c8_54], %107 {strides = array<i32>} : memref<16x32xf32, #tpu.memory_space<vmem>>, vector<16x8xf32>,
    %109 = vector.extract_strided_slice %35 {offsets = [0, 16], sizes = [16, 8], strides = [1, 1]} : vector<16x32xf32> to vector<16x8xf32>
    %c0_55 = arith.constant 0 : index
    %c0_56 = arith.constant 0 : index
    %c16 = arith.constant 16 : index
    %110 = vector.load %arg3[%c0_55, %c0_56, %c16] : memref<1x16x32xbf16, #tpu.memory_space<vmem>>, vector<1x16x8xbf16>
    %111 = vector.shape_cast %110 : vector<1x16x8xbf16> to vector<16x8xbf16>
    %112 = arith.truncf %109 : vector<16x8xf32> to vector<16x8xbf16>
    %cst_57 = arith.constant dense<0.000000e+00> : vector<16x16xf32>
    %113 = tpu.matmul %112, %111, %cst_57 {dimension_numbers = #tpu.dot_dimension_numbers<[1], [1], [0], [0], [0, 0, 1, 0], [], []>} : vector<16x8xbf16>, vector<16x8xbf16>, vector<16x16xf32> -> vector<16x16xf32>
    %114 = vector.extract_strided_slice %38 {offsets = [0, 16], sizes = [16, 8], strides = [1, 1]} : vector<16x32xf32> to vector<16x8xf32>
    %c0_58 = arith.constant 0 : index
    %c16_59 = arith.constant 16 : index
    %c0_60 = arith.constant 0 : index
    %115 = vector.load %arg5[%c0_58, %c16_59, %c0_60] : memref<1x32x128xbf16, #tpu.memory_space<vmem>>, vector<1x8x128xbf16>
    %116 = vector.shape_cast %115 : vector<1x8x128xbf16> to vector<8x128xbf16>
    %117 = arith.truncf %114 : vector<16x8xf32> to vector<16x8xbf16>
    %cst_61 = arith.constant dense<0.000000e+00> : vector<16x128xf32>
    %118 = tpu.matmul %117, %116, %cst_61 {dimension_numbers = #tpu.dot_dimension_numbers<[1], [0], [0], [1], [0, 0, 1, 1], [], []>} : vector<16x8xbf16>, vector<8x128xbf16>, vector<16x128xf32> -> vector<16x128xf32>
    %c0_i32_62 = arith.constant 0 : i32
    %119 = tpu.dynamic_rotate %118 by %c0_i32_62 dim 1 {stride = 1 : si32, stride_dimension = 0 : si32} : vector<16x128xf32>, i32 -> vector<16x128xf32>
    %120 = vector.extract_strided_slice %119 {offsets = [0, 0], sizes = [16, 16], strides = [1, 1]} : vector<16x128xf32> to vector<16x16xf32>
    %121 = arith.addf %113, %120 : vector<16x16xf32>
    %cst_63 = arith.constant 0.176776692 : f32
    %122 = vector.broadcast %cst_63 : f32 to vector<16x16xf32>
    %123 = arith.mulf %121, %122 : vector<16x16xf32>
    %124 = arith.cmpi sgt, %42, %41 : vector<16x16xi32>
    %cst_64 = arith.constant -1.000000e+09 : f32
    %125 = vector.broadcast %cst_64 : f32 to vector<16x16xf32>
    %126 = arith.select %124, %125, %123 : vector<16x16xi1>, vector<16x16xf32>
    %cst_65 = arith.constant dense<0xFF800000> : vector<16xf32>
    %127 = vector.multi_reduction <maximumf>, %126, %cst_65 [1] : vector<16x16xf32> to vector<16xf32>
    %128 = vector.shape_cast %127 : vector<16xf32> to vector<16x1xf32>
    %129 = vector.broadcast %128 : vector<16x1xf32> to vector<16x16xf32>
    %130 = arith.subf %126, %129 : vector<16x16xf32>
    %131 = math.exp %130 : vector<16x16xf32>
    %cst_66 = arith.constant dense<0.000000e+00> : vector<16xf32>
    %132 = vector.multi_reduction <add>, %131, %cst_66 [1] : vector<16x16xf32> to vector<16xf32>
    %133 = vector.shape_cast %132 : vector<16xf32> to vector<16x1xf32>
    %134 = tpu.reciprocal %133 {approx = true} : vector<16x1xf32> -> vector<16x1xf32>
    %135 = vector.broadcast %134 : vector<16x1xf32> to vector<16x16xf32>
    %136 = arith.mulf %131, %135 : vector<16x16xf32>
    %c0_67 = arith.constant 0 : index
    %c0_68 = arith.constant 0 : index
    %c16_69 = arith.constant 16 : index
    %137 = vector.load %arg4[%c0_67, %c0_68, %c16_69] : memref<1x16x32xbf16, #tpu.memory_space<vmem>>, vector<1x16x8xbf16>
    %138 = vector.shape_cast %137 : vector<1x16x8xbf16> to vector<16x8xbf16>
    %139 = arith.truncf %136 : vector<16x16xf32> to vector<16x16xbf16>
    %cst_70 = arith.constant dense<0.000000e+00> : vector<16x8xf32>
    %140 = tpu.matmul %139, %138, %cst_70 {dimension_numbers = #tpu.dot_dimension_numbers<[1], [0], [0], [1], [0, 0, 1, 1], [], []>} : vector<16x16xbf16>, vector<16x8xbf16>, vector<16x8xf32> -> vector<16x8xf32>
    %c0_71 = arith.constant 0 : index
    %c16_72 = arith.constant 16 : index
    %141 = vector.load %arg15[%c0_71, %c16_72] : memref<16x32xf32, #tpu.memory_space<vmem>>, vector<16x8xf32>
    tpu.vector_store %arg15[%c0_71, %c16_72], %140 {strides = array<i32>} : memref<16x32xf32, #tpu.memory_space<vmem>>, vector<16x8xf32>,
    %142 = vector.extract_strided_slice %35 {offsets = [0, 24], sizes = [16, 8], strides = [1, 1]} : vector<16x32xf32> to vector<16x8xf32>
    %c0_73 = arith.constant 0 : index
    %c0_74 = arith.constant 0 : index
    %c24 = arith.constant 24 : index
    %143 = vector.load %arg3[%c0_73, %c0_74, %c24] : memref<1x16x32xbf16, #tpu.memory_space<vmem>>, vector<1x16x8xbf16>
    %144 = vector.shape_cast %143 : vector<1x16x8xbf16> to vector<16x8xbf16>
    %145 = arith.truncf %142 : vector<16x8xf32> to vector<16x8xbf16>
    %cst_75 = arith.constant dense<0.000000e+00> : vector<16x16xf32>
    %146 = tpu.matmul %145, %144, %cst_75 {dimension_numbers = #tpu.dot_dimension_numbers<[1], [1], [0], [0], [0, 0, 1, 0], [], []>} : vector<16x8xbf16>, vector<16x8xbf16>, vector<16x16xf32> -> vector<16x16xf32>
    %147 = vector.extract_strided_slice %38 {offsets = [0, 24], sizes = [16, 8], strides = [1, 1]} : vector<16x32xf32> to vector<16x8xf32>
    %c0_76 = arith.constant 0 : index
    %c24_77 = arith.constant 24 : index
    %c0_78 = arith.constant 0 : index
    %148 = vector.load %arg5[%c0_76, %c24_77, %c0_78] : memref<1x32x128xbf16, #tpu.memory_space<vmem>>, vector<1x8x128xbf16>
    %149 = vector.shape_cast %148 : vector<1x8x128xbf16> to vector<8x128xbf16>
    %150 = arith.truncf %147 : vector<16x8xf32> to vector<16x8xbf16>
    %cst_79 = arith.constant dense<0.000000e+00> : vector<16x128xf32>
    %151 = tpu.matmul %150, %149, %cst_79 {dimension_numbers = #tpu.dot_dimension_numbers<[1], [0], [0], [1], [0, 0, 1, 1], [], []>} : vector<16x8xbf16>, vector<8x128xbf16>, vector<16x128xf32> -> vector<16x128xf32>
    %c0_i32_80 = arith.constant 0 : i32
    %152 = tpu.dynamic_rotate %151 by %c0_i32_80 dim 1 {stride = 1 : si32, stride_dimension = 0 : si32} : vector<16x128xf32>, i32 -> vector<16x128xf32>
    %153 = vector.extract_strided_slice %152 {offsets = [0, 0], sizes = [16, 16], strides = [1, 1]} : vector<16x128xf32> to vector<16x16xf32>
    %154 = arith.addf %146, %153 : vector<16x16xf32>
    %cst_81 = arith.constant 0.176776692 : f32
    %155 = vector.broadcast %cst_81 : f32 to vector<16x16xf32>
    %156 = arith.mulf %154, %155 : vector<16x16xf32>
    %157 = arith.cmpi sgt, %42, %41 : vector<16x16xi32>
    %cst_82 = arith.constant -1.000000e+09 : f32
    %158 = vector.broadcast %cst_82 : f32 to vector<16x16xf32>
    %159 = arith.select %157, %158, %156 : vector<16x16xi1>, vector<16x16xf32>
    %cst_83 = arith.constant dense<0xFF800000> : vector<16xf32>
    %160 = vector.multi_reduction <maximumf>, %159, %cst_83 [1] : vector<16x16xf32> to vector<16xf32>
    %161 = vector.shape_cast %160 : vector<16xf32> to vector<16x1xf32>
    %162 = vector.broadcast %161 : vector<16x1xf32> to vector<16x16xf32>
    %163 = arith.subf %159, %162 : vector<16x16xf32>
    %164 = math.exp %163 : vector<16x16xf32>
    %cst_84 = arith.constant dense<0.000000e+00> : vector<16xf32>
    %165 = vector.multi_reduction <add>, %164, %cst_84 [1] : vector<16x16xf32> to vector<16xf32>
    %166 = vector.shape_cast %165 : vector<16xf32> to vector<16x1xf32>
    %167 = tpu.reciprocal %166 {approx = true} : vector<16x1xf32> -> vector<16x1xf32>
    %168 = vector.broadcast %167 : vector<16x1xf32> to vector<16x16xf32>
    %169 = arith.mulf %164, %168 : vector<16x16xf32>
    %c0_85 = arith.constant 0 : index
    %c0_86 = arith.constant 0 : index
    %c24_87 = arith.constant 24 : index
    %170 = vector.load %arg4[%c0_85, %c0_86, %c24_87] : memref<1x16x32xbf16, #tpu.memory_space<vmem>>, vector<1x16x8xbf16>
    %171 = vector.shape_cast %170 : vector<1x16x8xbf16> to vector<16x8xbf16>
    %172 = arith.truncf %169 : vector<16x16xf32> to vector<16x16xbf16>
    %cst_88 = arith.constant dense<0.000000e+00> : vector<16x8xf32>
    %173 = tpu.matmul %172, %171, %cst_88 {dimension_numbers = #tpu.dot_dimension_numbers<[1], [0], [0], [1], [0, 0, 1, 1], [], []>} : vector<16x16xbf16>, vector<16x8xbf16>, vector<16x8xf32> -> vector<16x8xf32>
    %c0_89 = arith.constant 0 : index
    %c24_90 = arith.constant 24 : index
    %174 = vector.load %arg15[%c0_89, %c24_90] : memref<16x32xf32, #tpu.memory_space<vmem>>, vector<16x8xf32>
    tpu.vector_store %arg15[%c0_89, %c24_90], %173 {strides = array<i32>} : memref<16x32xf32, #tpu.memory_space<vmem>>, vector<16x8xf32>,
    %c0_91 = arith.constant 0 : index
    %c0_92 = arith.constant 0 : index
    %175 = vector.load %arg15[%c0_91, %c0_92] : memref<16x32xf32, #tpu.memory_space<vmem>>, vector<16x32xf32>
    %c0_93 = arith.constant 0 : index
    %c0_94 = arith.constant 0 : index
    %176 = vector.load %arg12[%c0_93, %c0_94] : memref<32x32xbf16, #tpu.memory_space<vmem>>, vector<32x32xbf16>
    %177 = arith.truncf %175 : vector<16x32xf32> to vector<16x32xbf16>
    %cst_95 = arith.constant dense<0.000000e+00> : vector<16x32xf32>
    %178 = tpu.matmul %177, %176, %cst_95 {dimension_numbers = #tpu.dot_dimension_numbers<[1], [0], [0], [1], [0, 0, 1, 1], [], []>} : vector<16x32xbf16>, vector<32x32xbf16>, vector<16x32xf32> -> vector<16x32xf32>
    %179 = arith.addf %1, %178 : vector<16x32xf32>
    %c0_96 = arith.constant 0 : index
    %c0_97 = arith.constant 0 : index
    %180 = vector.load %arg13[%c0_96, %c0_97] : memref<1x32xf32, #tpu.memory_space<vmem>>, vector<1x32xf32>
    %181 = vector.broadcast %180 : vector<1x32xf32> to vector<16x32xf32>
    %182 = arith.addf %179, %181 : vector<16x32xf32>
    %c0_98 = arith.constant 0 : index
    %c0_99 = arith.constant 0 : index
    %c0_100 = arith.constant 0 : index
    %183 = vector.load %arg14[%c0_98, %c0_99, %c0_100] : memref<1x16x32xf32, #tpu.memory_space<vmem>>, vector<1x16x32xf32>
    %184 = vector.shape_cast %183 : vector<1x16x32xf32> to vector<16x32xf32>
    %185 = vector.shape_cast %182 : vector<16x32xf32> to vector<1x16x32xf32>
    tpu.vector_store %arg14[%c0_98, %c0_99, %c0_100], %185 {strides = array<i32>} : memref<1x16x32xf32, #tpu.memory_space<vmem>>, vector<1x16x32xf32>,
    return
  }
  func.func @transform_0(%arg0: i32, %arg1: i32) -> (i32, i32, i32) {
    %c0_i32 = arith.constant 0 : i32
    %c0_i32_0 = arith.constant 0 : i32
    return %arg0, %arg1, %c0_i32 : i32, i32, i32
  }
  func.func @transform_1(%arg0: i32, %arg1: i32) -> (i32, i32, i32) {
    %c0_i32 = arith.constant 0 : i32
    %c0_i32_0 = arith.constant 0 : i32
    %c0_i32_1 = arith.constant 0 : i32
    return %arg0, %c0_i32, %c0_i32_0 : i32, i32, i32
  }
  func.func @transform_2(%arg0: i32, %arg1: i32) -> (i32, i32, i32) {
    %c0_i32 = arith.constant 0 : i32
    %c0_i32_0 = arith.constant 0 : i32
    %c0_i32_1 = arith.constant 0 : i32
    return %arg0, %c0_i32, %c0_i32_0 : i32, i32, i32
  }
  func.func @transform_3(%arg0: i32, %arg1: i32) -> (i32, i32, i32) {
    %c0_i32 = arith.constant 0 : i32
    %c0_i32_0 = arith.constant 0 : i32
    %c0_i32_1 = arith.constant 0 : i32
    return %arg1, %c0_i32, %c0_i32_0 : i32, i32, i32
  }
  func.func @transform_4(%arg0: i32, %arg1: i32) -> (i32, i32) {
    %c0_i32 = arith.constant 0 : i32
    %c0_i32_0 = arith.constant 0 : i32
    %c0_i32_1 = arith.constant 0 : i32
    return %c0_i32, %c0_i32_0 : i32, i32
  }
  func.func @transform_5(%arg0: i32, %arg1: i32) -> (i32, i32) {
    %c0_i32 = arith.constant 0 : i32
    %c0_i32_0 = arith.constant 0 : i32
    %c0_i32_1 = arith.constant 0 : i32
    return %c0_i32, %c0_i32_0 : i32, i32
  }
  func.func @transform_6(%arg0: i32, %arg1: i32) -> (i32, i32) {
    %c0_i32 = arith.constant 0 : i32
    %c0_i32_0 = arith.constant 0 : i32
    %c0_i32_1 = arith.constant 0 : i32
    return %c0_i32, %c0_i32_0 : i32, i32
  }
  func.func @transform_7(%arg0: i32, %arg1: i32) -> (i32, i32) {
    %c0_i32 = arith.constant 0 : i32
    %c0_i32_0 = arith.constant 0 : i32
    %c0_i32_1 = arith.constant 0 : i32
    return %c0_i32, %c0_i32_0 : i32, i32
  }
  func.func @transform_8(%arg0: i32, %arg1: i32) -> (i32, i32) {
    %c0_i32 = arith.constant 0 : i32
    %c0_i32_0 = arith.constant 0 : i32
    %c0_i32_1 = arith.constant 0 : i32
    return %c0_i32, %c0_i32_0 : i32, i32
  }
  func.func @transform_9(%arg0: i32, %arg1: i32) -> (i32, i32) {
    %c0_i32 = arith.constant 0 : i32
    %c0_i32_0 = arith.constant 0 : i32
    %c0_i32_1 = arith.constant 0 : i32
    return %c0_i32, %c0_i32_0 : i32, i32
  }
  func.func @transform_10(%arg0: i32, %arg1: i32) -> (i32, i32) {
    %c0_i32 = arith.constant 0 : i32
    %c0_i32_0 = arith.constant 0 : i32
    %c0_i32_1 = arith.constant 0 : i32
    return %c0_i32, %c0_i32_0 : i32, i32
  }
  func.func @transform_11(%arg0: i32, %arg1: i32) -> (i32, i32) {
    %c0_i32 = arith.constant 0 : i32
    %c0_i32_0 = arith.constant 0 : i32
    %c0_i32_1 = arith.constant 0 : i32
    return %c0_i32, %c0_i32_0 : i32, i32
  }
  func.func @transform_12(%arg0: i32, %arg1: i32) -> (i32, i32, i32) {
    %c0_i32 = arith.constant 0 : i32
    %c0_i32_0 = arith.constant 0 : i32
    return %arg0, %arg1, %c0_i32 : i32, i32, i32
  }
}

module attributes {stable_mosaic.version = 11 : i64} {
  func.func @_conv_residual_kernel(%arg0: i32, %arg1: memref<1x16x32xf32, #tpu.memory_space<vmem>>, %arg2: memref<1x32xf32, #tpu.memory_space<vmem>>, %arg3: memref<1x32xf32, #tpu.memory_space<vmem>>, %arg4: memref<32x64xbf16, #tpu.memory_space<vmem>>, %arg5: memref<1x64xf32, #tpu.memory_space<vmem>>, %arg6: memref<31x32xf32, #tpu.memory_space<vmem>>, %arg7: memref<1x32xf32, #tpu.memory_space<vmem>>, %arg8: memref<1x32xf32, #tpu.memory_space<vmem>>, %arg9: memref<32x32xbf16, #tpu.memory_space<vmem>>, %arg10: memref<1x32xf32, #tpu.memory_space<vmem>>, %arg11: memref<1x16x32xf32, #tpu.memory_space<vmem>>) attributes {dimension_semantics = [#tpu.dimension_semantics<parallel>], iteration_bounds = array<i64: 2>, scalar_prefetch = 0 : i64, scratch_operands = 0 : i64, tpu.core_type = #tpu.core_type<tc>, window_params = [{transform_indices = @transform_0, window_bounds = array<i64: 1, 16, 32>}, {pipeline_mode = #tpu.pipeline_mode<synchronous>, transform_indices = @transform_1, window_bounds = array<i64: 1, 32>}, {pipeline_mode = #tpu.pipeline_mode<synchronous>, transform_indices = @transform_2, window_bounds = array<i64: 1, 32>}, {pipeline_mode = #tpu.pipeline_mode<synchronous>, transform_indices = @transform_3, window_bounds = array<i64: 32, 64>}, {pipeline_mode = #tpu.pipeline_mode<synchronous>, transform_indices = @transform_4, window_bounds = array<i64: 1, 64>}, {pipeline_mode = #tpu.pipeline_mode<synchronous>, transform_indices = @transform_5, window_bounds = array<i64: 31, 32>}, {pipeline_mode = #tpu.pipeline_mode<synchronous>, transform_indices = @transform_6, window_bounds = array<i64: 1, 32>}, {pipeline_mode = #tpu.pipeline_mode<synchronous>, transform_indices = @transform_7, window_bounds = array<i64: 1, 32>}, {pipeline_mode = #tpu.pipeline_mode<synchronous>, transform_indices = @transform_8, window_bounds = array<i64: 32, 32>}, {pipeline_mode = #tpu.pipeline_mode<synchronous>, transform_indices = @transform_9, window_bounds = array<i64: 1, 32>}, {transform_indices = @transform_10, window_bounds = array<i64: 1, 16, 32>}]} {
    %c0 = arith.constant 0 : index
    %c0_0 = arith.constant 0 : index
    %c0_1 = arith.constant 0 : index
    %0 = vector.load %arg1[%c0, %c0_0, %c0_1] : memref<1x16x32xf32, #tpu.memory_space<vmem>>, vector<1x16x32xf32>
    %1 = vector.shape_cast %0 : vector<1x16x32xf32> to vector<16x32xf32>
    %c0_2 = arith.constant 0 : index
    %c0_3 = arith.constant 0 : index
    %2 = vector.load %arg2[%c0_2, %c0_3] : memref<1x32xf32, #tpu.memory_space<vmem>>, vector<1x32xf32>
    %c0_4 = arith.constant 0 : index
    %c0_5 = arith.constant 0 : index
    %3 = vector.load %arg3[%c0_4, %c0_5] : memref<1x32xf32, #tpu.memory_space<vmem>>, vector<1x32xf32>
    %cst = arith.constant dense<0.000000e+00> : vector<16xf32>
    %4 = vector.multi_reduction <add>, %1, %cst [1] : vector<16x32xf32> to vector<16xf32>
    %5 = vector.shape_cast %4 : vector<16xf32> to vector<16x1xf32>
    %cst_6 = arith.constant 3.200000e+01 : f32
    %6 = vector.broadcast %cst_6 : f32 to vector<16x1xf32>
    %7 = arith.divf %5, %6 : vector<16x1xf32>
    %8 = vector.broadcast %7 : vector<16x1xf32> to vector<16x32xf32>
    %9 = arith.subf %1, %8 : vector<16x32xf32>
    %10 = arith.mulf %9, %9 : vector<16x32xf32>
    %cst_7 = arith.constant dense<0.000000e+00> : vector<16xf32>
    %11 = vector.multi_reduction <add>, %10, %cst_7 [1] : vector<16x32xf32> to vector<16xf32>
    %12 = vector.shape_cast %11 : vector<16xf32> to vector<16x1xf32>
    %cst_8 = arith.constant 3.200000e+01 : f32
    %13 = vector.broadcast %cst_8 : f32 to vector<16x1xf32>
    %14 = arith.divf %12, %13 : vector<16x1xf32>
    %15 = vector.broadcast %7 : vector<16x1xf32> to vector<16x32xf32>
    %16 = arith.subf %1, %15 : vector<16x32xf32>
    %cst_9 = arith.constant 9.99999974E-6 : f32
    %17 = vector.broadcast %cst_9 : f32 to vector<16x1xf32>
    %18 = arith.addf %14, %17 : vector<16x1xf32>
    %19 = math.rsqrt %18 : vector<16x1xf32>
    %20 = vector.broadcast %19 : vector<16x1xf32> to vector<16x32xf32>
    %21 = arith.mulf %16, %20 : vector<16x32xf32>
    %22 = vector.broadcast %2 : vector<1x32xf32> to vector<16x32xf32>
    %23 = arith.mulf %21, %22 : vector<16x32xf32>
    %24 = vector.broadcast %3 : vector<1x32xf32> to vector<16x32xf32>
    %25 = arith.addf %23, %24 : vector<16x32xf32>
    %c0_10 = arith.constant 0 : index
    %c0_11 = arith.constant 0 : index
    %26 = vector.load %arg4[%c0_10, %c0_11] : memref<32x64xbf16, #tpu.memory_space<vmem>>, vector<32x64xbf16>
    %27 = arith.truncf %25 : vector<16x32xf32> to vector<16x32xbf16>
    %cst_12 = arith.constant dense<0.000000e+00> : vector<16x64xf32>
    %28 = tpu.matmul %27, %26, %cst_12 {dimension_numbers = #tpu.dot_dimension_numbers<[1], [0], [0], [1], [0, 0, 1, 1], [], []>} : vector<16x32xbf16>, vector<32x64xbf16>, vector<16x64xf32> -> vector<16x64xf32>
    %c0_13 = arith.constant 0 : index
    %c0_14 = arith.constant 0 : index
    %29 = vector.load %arg5[%c0_13, %c0_14] : memref<1x64xf32, #tpu.memory_space<vmem>>, vector<1x64xf32>
    %30 = vector.broadcast %29 : vector<1x64xf32> to vector<16x64xf32>
    %31 = arith.addf %28, %30 : vector<16x64xf32>
    %32 = vector.extract_strided_slice %31 {offsets = [0, 0], sizes = [16, 32], strides = [1, 1]} : vector<16x64xf32> to vector<16x32xf32>
    %33 = vector.extract_strided_slice %31 {offsets = [0, 32], sizes = [16, 32], strides = [1, 1]} : vector<16x64xf32> to vector<16x32xf32>
    %34 = arith.negf %33 : vector<16x32xf32>
    %35 = math.exp %34 : vector<16x32xf32>
    %cst_15 = arith.constant 1.000000e+00 : f32
    %36 = vector.broadcast %cst_15 : f32 to vector<16x32xf32>
    %37 = arith.addf %36, %35 : vector<16x32xf32>
    %38 = arith.divf %36, %37 : vector<16x32xf32>
    %39 = arith.mulf %32, %38 : vector<16x32xf32>
    %c0_16 = arith.constant 0 : index
    %c0_17 = arith.constant 0 : index
    %40 = vector.load %arg6[%c0_16, %c0_17] : memref<31x32xf32, #tpu.memory_space<vmem>>, vector<31x32xf32>
    %41 = tpu.iota {dimensions = array<i32: 0>} : vector<16x1xi32>
    %42 = vector.extract_strided_slice %40 {offsets = [30, 0], sizes = [1, 32], strides = [1, 1]} : vector<31x32xf32> to vector<1x32xf32>
    %43 = vector.shape_cast %42 : vector<1x32xf32> to vector<32xf32>
    %44 = vector.shape_cast %43 : vector<32xf32> to vector<1x32xf32>
    %45 = vector.broadcast %44 : vector<1x32xf32> to vector<16x32xf32>
    %46 = arith.mulf %39, %45 : vector<16x32xf32>
    %c15_i32 = arith.constant 15 : i32
    %47 = tpu.dynamic_rotate %39 by %c15_i32 dim 0 : vector<16x32xf32>, i32 -> vector<16x32xf32>
    %c15_i32_18 = arith.constant 15 : i32
    %48 = vector.broadcast %c15_i32_18 : i32 to vector<16x1xi32>
    %49 = arith.cmpi sge, %41, %48 : vector<16x1xi32>
    %cst_19 = arith.constant 0.000000e+00 : f32
    %50 = vector.shape_cast %49 : vector<16x1xi1> to vector<16x1xi1>
    %51 = vector.broadcast %50 : vector<16x1xi1> to vector<16x32xi1>
    %52 = vector.broadcast %cst_19 : f32 to vector<16x32xf32>
    %53 = arith.select %51, %47, %52 : vector<16x32xi1>, vector<16x32xf32>
    %54 = vector.extract_strided_slice %40 {offsets = [15, 0], sizes = [1, 32], strides = [1, 1]} : vector<31x32xf32> to vector<1x32xf32>
    %55 = vector.shape_cast %54 : vector<1x32xf32> to vector<32xf32>
    %56 = vector.shape_cast %55 : vector<32xf32> to vector<1x32xf32>
    %57 = vector.broadcast %56 : vector<1x32xf32> to vector<16x32xf32>
    %58 = arith.mulf %53, %57 : vector<16x32xf32>
    %59 = arith.addf %46, %58 : vector<16x32xf32>
    %c14_i32 = arith.constant 14 : i32
    %60 = tpu.dynamic_rotate %39 by %c14_i32 dim 0 : vector<16x32xf32>, i32 -> vector<16x32xf32>
    %c14_i32_20 = arith.constant 14 : i32
    %61 = vector.broadcast %c14_i32_20 : i32 to vector<16x1xi32>
    %62 = arith.cmpi sge, %41, %61 : vector<16x1xi32>
    %cst_21 = arith.constant 0.000000e+00 : f32
    %63 = vector.shape_cast %62 : vector<16x1xi1> to vector<16x1xi1>
    %64 = vector.broadcast %63 : vector<16x1xi1> to vector<16x32xi1>
    %65 = vector.broadcast %cst_21 : f32 to vector<16x32xf32>
    %66 = arith.select %64, %60, %65 : vector<16x32xi1>, vector<16x32xf32>
    %67 = vector.extract_strided_slice %40 {offsets = [16, 0], sizes = [1, 32], strides = [1, 1]} : vector<31x32xf32> to vector<1x32xf32>
    %68 = vector.shape_cast %67 : vector<1x32xf32> to vector<32xf32>
    %69 = vector.shape_cast %68 : vector<32xf32> to vector<1x32xf32>
    %70 = vector.broadcast %69 : vector<1x32xf32> to vector<16x32xf32>
    %71 = arith.mulf %66, %70 : vector<16x32xf32>
    %72 = arith.addf %59, %71 : vector<16x32xf32>
    %c13_i32 = arith.constant 13 : i32
    %73 = tpu.dynamic_rotate %39 by %c13_i32 dim 0 : vector<16x32xf32>, i32 -> vector<16x32xf32>
    %c13_i32_22 = arith.constant 13 : i32
    %74 = vector.broadcast %c13_i32_22 : i32 to vector<16x1xi32>
    %75 = arith.cmpi sge, %41, %74 : vector<16x1xi32>
    %cst_23 = arith.constant 0.000000e+00 : f32
    %76 = vector.shape_cast %75 : vector<16x1xi1> to vector<16x1xi1>
    %77 = vector.broadcast %76 : vector<16x1xi1> to vector<16x32xi1>
    %78 = vector.broadcast %cst_23 : f32 to vector<16x32xf32>
    %79 = arith.select %77, %73, %78 : vector<16x32xi1>, vector<16x32xf32>
    %80 = vector.extract_strided_slice %40 {offsets = [17, 0], sizes = [1, 32], strides = [1, 1]} : vector<31x32xf32> to vector<1x32xf32>
    %81 = vector.shape_cast %80 : vector<1x32xf32> to vector<32xf32>
    %82 = vector.shape_cast %81 : vector<32xf32> to vector<1x32xf32>
    %83 = vector.broadcast %82 : vector<1x32xf32> to vector<16x32xf32>
    %84 = arith.mulf %79, %83 : vector<16x32xf32>
    %85 = arith.addf %72, %84 : vector<16x32xf32>
    %c12_i32 = arith.constant 12 : i32
    %86 = tpu.dynamic_rotate %39 by %c12_i32 dim 0 : vector<16x32xf32>, i32 -> vector<16x32xf32>
    %c12_i32_24 = arith.constant 12 : i32
    %87 = vector.broadcast %c12_i32_24 : i32 to vector<16x1xi32>
    %88 = arith.cmpi sge, %41, %87 : vector<16x1xi32>
    %cst_25 = arith.constant 0.000000e+00 : f32
    %89 = vector.shape_cast %88 : vector<16x1xi1> to vector<16x1xi1>
    %90 = vector.broadcast %89 : vector<16x1xi1> to vector<16x32xi1>
    %91 = vector.broadcast %cst_25 : f32 to vector<16x32xf32>
    %92 = arith.select %90, %86, %91 : vector<16x32xi1>, vector<16x32xf32>
    %93 = vector.extract_strided_slice %40 {offsets = [18, 0], sizes = [1, 32], strides = [1, 1]} : vector<31x32xf32> to vector<1x32xf32>
    %94 = vector.shape_cast %93 : vector<1x32xf32> to vector<32xf32>
    %95 = vector.shape_cast %94 : vector<32xf32> to vector<1x32xf32>
    %96 = vector.broadcast %95 : vector<1x32xf32> to vector<16x32xf32>
    %97 = arith.mulf %92, %96 : vector<16x32xf32>
    %98 = arith.addf %85, %97 : vector<16x32xf32>
    %c11_i32 = arith.constant 11 : i32
    %99 = tpu.dynamic_rotate %39 by %c11_i32 dim 0 : vector<16x32xf32>, i32 -> vector<16x32xf32>
    %c11_i32_26 = arith.constant 11 : i32
    %100 = vector.broadcast %c11_i32_26 : i32 to vector<16x1xi32>
    %101 = arith.cmpi sge, %41, %100 : vector<16x1xi32>
    %cst_27 = arith.constant 0.000000e+00 : f32
    %102 = vector.shape_cast %101 : vector<16x1xi1> to vector<16x1xi1>
    %103 = vector.broadcast %102 : vector<16x1xi1> to vector<16x32xi1>
    %104 = vector.broadcast %cst_27 : f32 to vector<16x32xf32>
    %105 = arith.select %103, %99, %104 : vector<16x32xi1>, vector<16x32xf32>
    %106 = vector.extract_strided_slice %40 {offsets = [19, 0], sizes = [1, 32], strides = [1, 1]} : vector<31x32xf32> to vector<1x32xf32>
    %107 = vector.shape_cast %106 : vector<1x32xf32> to vector<32xf32>
    %108 = vector.shape_cast %107 : vector<32xf32> to vector<1x32xf32>
    %109 = vector.broadcast %108 : vector<1x32xf32> to vector<16x32xf32>
    %110 = arith.mulf %105, %109 : vector<16x32xf32>
    %111 = arith.addf %98, %110 : vector<16x32xf32>
    %c10_i32 = arith.constant 10 : i32
    %112 = tpu.dynamic_rotate %39 by %c10_i32 dim 0 : vector<16x32xf32>, i32 -> vector<16x32xf32>
    %c10_i32_28 = arith.constant 10 : i32
    %113 = vector.broadcast %c10_i32_28 : i32 to vector<16x1xi32>
    %114 = arith.cmpi sge, %41, %113 : vector<16x1xi32>
    %cst_29 = arith.constant 0.000000e+00 : f32
    %115 = vector.shape_cast %114 : vector<16x1xi1> to vector<16x1xi1>
    %116 = vector.broadcast %115 : vector<16x1xi1> to vector<16x32xi1>
    %117 = vector.broadcast %cst_29 : f32 to vector<16x32xf32>
    %118 = arith.select %116, %112, %117 : vector<16x32xi1>, vector<16x32xf32>
    %119 = vector.extract_strided_slice %40 {offsets = [20, 0], sizes = [1, 32], strides = [1, 1]} : vector<31x32xf32> to vector<1x32xf32>
    %120 = vector.shape_cast %119 : vector<1x32xf32> to vector<32xf32>
    %121 = vector.shape_cast %120 : vector<32xf32> to vector<1x32xf32>
    %122 = vector.broadcast %121 : vector<1x32xf32> to vector<16x32xf32>
    %123 = arith.mulf %118, %122 : vector<16x32xf32>
    %124 = arith.addf %111, %123 : vector<16x32xf32>
    %c9_i32 = arith.constant 9 : i32
    %125 = tpu.dynamic_rotate %39 by %c9_i32 dim 0 : vector<16x32xf32>, i32 -> vector<16x32xf32>
    %c9_i32_30 = arith.constant 9 : i32
    %126 = vector.broadcast %c9_i32_30 : i32 to vector<16x1xi32>
    %127 = arith.cmpi sge, %41, %126 : vector<16x1xi32>
    %cst_31 = arith.constant 0.000000e+00 : f32
    %128 = vector.shape_cast %127 : vector<16x1xi1> to vector<16x1xi1>
    %129 = vector.broadcast %128 : vector<16x1xi1> to vector<16x32xi1>
    %130 = vector.broadcast %cst_31 : f32 to vector<16x32xf32>
    %131 = arith.select %129, %125, %130 : vector<16x32xi1>, vector<16x32xf32>
    %132 = vector.extract_strided_slice %40 {offsets = [21, 0], sizes = [1, 32], strides = [1, 1]} : vector<31x32xf32> to vector<1x32xf32>
    %133 = vector.shape_cast %132 : vector<1x32xf32> to vector<32xf32>
    %134 = vector.shape_cast %133 : vector<32xf32> to vector<1x32xf32>
    %135 = vector.broadcast %134 : vector<1x32xf32> to vector<16x32xf32>
    %136 = arith.mulf %131, %135 : vector<16x32xf32>
    %137 = arith.addf %124, %136 : vector<16x32xf32>
    %c8_i32 = arith.constant 8 : i32
    %138 = tpu.dynamic_rotate %39 by %c8_i32 dim 0 : vector<16x32xf32>, i32 -> vector<16x32xf32>
    %c8_i32_32 = arith.constant 8 : i32
    %139 = vector.broadcast %c8_i32_32 : i32 to vector<16x1xi32>
    %140 = arith.cmpi sge, %41, %139 : vector<16x1xi32>
    %cst_33 = arith.constant 0.000000e+00 : f32
    %141 = vector.shape_cast %140 : vector<16x1xi1> to vector<16x1xi1>
    %142 = vector.broadcast %141 : vector<16x1xi1> to vector<16x32xi1>
    %143 = vector.broadcast %cst_33 : f32 to vector<16x32xf32>
    %144 = arith.select %142, %138, %143 : vector<16x32xi1>, vector<16x32xf32>
    %145 = vector.extract_strided_slice %40 {offsets = [22, 0], sizes = [1, 32], strides = [1, 1]} : vector<31x32xf32> to vector<1x32xf32>
    %146 = vector.shape_cast %145 : vector<1x32xf32> to vector<32xf32>
    %147 = vector.shape_cast %146 : vector<32xf32> to vector<1x32xf32>
    %148 = vector.broadcast %147 : vector<1x32xf32> to vector<16x32xf32>
    %149 = arith.mulf %144, %148 : vector<16x32xf32>
    %150 = arith.addf %137, %149 : vector<16x32xf32>
    %c7_i32 = arith.constant 7 : i32
    %151 = tpu.dynamic_rotate %39 by %c7_i32 dim 0 : vector<16x32xf32>, i32 -> vector<16x32xf32>
    %c7_i32_34 = arith.constant 7 : i32
    %152 = vector.broadcast %c7_i32_34 : i32 to vector<16x1xi32>
    %153 = arith.cmpi sge, %41, %152 : vector<16x1xi32>
    %cst_35 = arith.constant 0.000000e+00 : f32
    %154 = vector.shape_cast %153 : vector<16x1xi1> to vector<16x1xi1>
    %155 = vector.broadcast %154 : vector<16x1xi1> to vector<16x32xi1>
    %156 = vector.broadcast %cst_35 : f32 to vector<16x32xf32>
    %157 = arith.select %155, %151, %156 : vector<16x32xi1>, vector<16x32xf32>
    %158 = vector.extract_strided_slice %40 {offsets = [23, 0], sizes = [1, 32], strides = [1, 1]} : vector<31x32xf32> to vector<1x32xf32>
    %159 = vector.shape_cast %158 : vector<1x32xf32> to vector<32xf32>
    %160 = vector.shape_cast %159 : vector<32xf32> to vector<1x32xf32>
    %161 = vector.broadcast %160 : vector<1x32xf32> to vector<16x32xf32>
    %162 = arith.mulf %157, %161 : vector<16x32xf32>
    %163 = arith.addf %150, %162 : vector<16x32xf32>
    %c6_i32 = arith.constant 6 : i32
    %164 = tpu.dynamic_rotate %39 by %c6_i32 dim 0 : vector<16x32xf32>, i32 -> vector<16x32xf32>
    %c6_i32_36 = arith.constant 6 : i32
    %165 = vector.broadcast %c6_i32_36 : i32 to vector<16x1xi32>
    %166 = arith.cmpi sge, %41, %165 : vector<16x1xi32>
    %cst_37 = arith.constant 0.000000e+00 : f32
    %167 = vector.shape_cast %166 : vector<16x1xi1> to vector<16x1xi1>
    %168 = vector.broadcast %167 : vector<16x1xi1> to vector<16x32xi1>
    %169 = vector.broadcast %cst_37 : f32 to vector<16x32xf32>
    %170 = arith.select %168, %164, %169 : vector<16x32xi1>, vector<16x32xf32>
    %171 = vector.extract_strided_slice %40 {offsets = [24, 0], sizes = [1, 32], strides = [1, 1]} : vector<31x32xf32> to vector<1x32xf32>
    %172 = vector.shape_cast %171 : vector<1x32xf32> to vector<32xf32>
    %173 = vector.shape_cast %172 : vector<32xf32> to vector<1x32xf32>
    %174 = vector.broadcast %173 : vector<1x32xf32> to vector<16x32xf32>
    %175 = arith.mulf %170, %174 : vector<16x32xf32>
    %176 = arith.addf %163, %175 : vector<16x32xf32>
    %c5_i32 = arith.constant 5 : i32
    %177 = tpu.dynamic_rotate %39 by %c5_i32 dim 0 : vector<16x32xf32>, i32 -> vector<16x32xf32>
    %c5_i32_38 = arith.constant 5 : i32
    %178 = vector.broadcast %c5_i32_38 : i32 to vector<16x1xi32>
    %179 = arith.cmpi sge, %41, %178 : vector<16x1xi32>
    %cst_39 = arith.constant 0.000000e+00 : f32
    %180 = vector.shape_cast %179 : vector<16x1xi1> to vector<16x1xi1>
    %181 = vector.broadcast %180 : vector<16x1xi1> to vector<16x32xi1>
    %182 = vector.broadcast %cst_39 : f32 to vector<16x32xf32>
    %183 = arith.select %181, %177, %182 : vector<16x32xi1>, vector<16x32xf32>
    %184 = vector.extract_strided_slice %40 {offsets = [25, 0], sizes = [1, 32], strides = [1, 1]} : vector<31x32xf32> to vector<1x32xf32>
    %185 = vector.shape_cast %184 : vector<1x32xf32> to vector<32xf32>
    %186 = vector.shape_cast %185 : vector<32xf32> to vector<1x32xf32>
    %187 = vector.broadcast %186 : vector<1x32xf32> to vector<16x32xf32>
    %188 = arith.mulf %183, %187 : vector<16x32xf32>
    %189 = arith.addf %176, %188 : vector<16x32xf32>
    %c4_i32 = arith.constant 4 : i32
    %190 = tpu.dynamic_rotate %39 by %c4_i32 dim 0 : vector<16x32xf32>, i32 -> vector<16x32xf32>
    %c4_i32_40 = arith.constant 4 : i32
    %191 = vector.broadcast %c4_i32_40 : i32 to vector<16x1xi32>
    %192 = arith.cmpi sge, %41, %191 : vector<16x1xi32>
    %cst_41 = arith.constant 0.000000e+00 : f32
    %193 = vector.shape_cast %192 : vector<16x1xi1> to vector<16x1xi1>
    %194 = vector.broadcast %193 : vector<16x1xi1> to vector<16x32xi1>
    %195 = vector.broadcast %cst_41 : f32 to vector<16x32xf32>
    %196 = arith.select %194, %190, %195 : vector<16x32xi1>, vector<16x32xf32>
    %197 = vector.extract_strided_slice %40 {offsets = [26, 0], sizes = [1, 32], strides = [1, 1]} : vector<31x32xf32> to vector<1x32xf32>
    %198 = vector.shape_cast %197 : vector<1x32xf32> to vector<32xf32>
    %199 = vector.shape_cast %198 : vector<32xf32> to vector<1x32xf32>
    %200 = vector.broadcast %199 : vector<1x32xf32> to vector<16x32xf32>
    %201 = arith.mulf %196, %200 : vector<16x32xf32>
    %202 = arith.addf %189, %201 : vector<16x32xf32>
    %c3_i32 = arith.constant 3 : i32
    %203 = tpu.dynamic_rotate %39 by %c3_i32 dim 0 : vector<16x32xf32>, i32 -> vector<16x32xf32>
    %c3_i32_42 = arith.constant 3 : i32
    %204 = vector.broadcast %c3_i32_42 : i32 to vector<16x1xi32>
    %205 = arith.cmpi sge, %41, %204 : vector<16x1xi32>
    %cst_43 = arith.constant 0.000000e+00 : f32
    %206 = vector.shape_cast %205 : vector<16x1xi1> to vector<16x1xi1>
    %207 = vector.broadcast %206 : vector<16x1xi1> to vector<16x32xi1>
    %208 = vector.broadcast %cst_43 : f32 to vector<16x32xf32>
    %209 = arith.select %207, %203, %208 : vector<16x32xi1>, vector<16x32xf32>
    %210 = vector.extract_strided_slice %40 {offsets = [27, 0], sizes = [1, 32], strides = [1, 1]} : vector<31x32xf32> to vector<1x32xf32>
    %211 = vector.shape_cast %210 : vector<1x32xf32> to vector<32xf32>
    %212 = vector.shape_cast %211 : vector<32xf32> to vector<1x32xf32>
    %213 = vector.broadcast %212 : vector<1x32xf32> to vector<16x32xf32>
    %214 = arith.mulf %209, %213 : vector<16x32xf32>
    %215 = arith.addf %202, %214 : vector<16x32xf32>
    %c2_i32 = arith.constant 2 : i32
    %216 = tpu.dynamic_rotate %39 by %c2_i32 dim 0 : vector<16x32xf32>, i32 -> vector<16x32xf32>
    %c2_i32_44 = arith.constant 2 : i32
    %217 = vector.broadcast %c2_i32_44 : i32 to vector<16x1xi32>
    %218 = arith.cmpi sge, %41, %217 : vector<16x1xi32>
    %cst_45 = arith.constant 0.000000e+00 : f32
    %219 = vector.shape_cast %218 : vector<16x1xi1> to vector<16x1xi1>
    %220 = vector.broadcast %219 : vector<16x1xi1> to vector<16x32xi1>
    %221 = vector.broadcast %cst_45 : f32 to vector<16x32xf32>
    %222 = arith.select %220, %216, %221 : vector<16x32xi1>, vector<16x32xf32>
    %223 = vector.extract_strided_slice %40 {offsets = [28, 0], sizes = [1, 32], strides = [1, 1]} : vector<31x32xf32> to vector<1x32xf32>
    %224 = vector.shape_cast %223 : vector<1x32xf32> to vector<32xf32>
    %225 = vector.shape_cast %224 : vector<32xf32> to vector<1x32xf32>
    %226 = vector.broadcast %225 : vector<1x32xf32> to vector<16x32xf32>
    %227 = arith.mulf %222, %226 : vector<16x32xf32>
    %228 = arith.addf %215, %227 : vector<16x32xf32>
    %c1_i32 = arith.constant 1 : i32
    %229 = tpu.dynamic_rotate %39 by %c1_i32 dim 0 : vector<16x32xf32>, i32 -> vector<16x32xf32>
    %c1_i32_46 = arith.constant 1 : i32
    %230 = vector.broadcast %c1_i32_46 : i32 to vector<16x1xi32>
    %231 = arith.cmpi sge, %41, %230 : vector<16x1xi32>
    %cst_47 = arith.constant 0.000000e+00 : f32
    %232 = vector.shape_cast %231 : vector<16x1xi1> to vector<16x1xi1>
    %233 = vector.broadcast %232 : vector<16x1xi1> to vector<16x32xi1>
    %234 = vector.broadcast %cst_47 : f32 to vector<16x32xf32>
    %235 = arith.select %233, %229, %234 : vector<16x32xi1>, vector<16x32xf32>
    %236 = vector.extract_strided_slice %40 {offsets = [29, 0], sizes = [1, 32], strides = [1, 1]} : vector<31x32xf32> to vector<1x32xf32>
    %237 = vector.shape_cast %236 : vector<1x32xf32> to vector<32xf32>
    %238 = vector.shape_cast %237 : vector<32xf32> to vector<1x32xf32>
    %239 = vector.broadcast %238 : vector<1x32xf32> to vector<16x32xf32>
    %240 = arith.mulf %235, %239 : vector<16x32xf32>
    %241 = arith.addf %228, %240 : vector<16x32xf32>
    %c0_48 = arith.constant 0 : index
    %c0_49 = arith.constant 0 : index
    %242 = vector.load %arg7[%c0_48, %c0_49] : memref<1x32xf32, #tpu.memory_space<vmem>>, vector<1x32xf32>
    %243 = vector.broadcast %242 : vector<1x32xf32> to vector<16x32xf32>
    %244 = arith.mulf %241, %243 : vector<16x32xf32>
    %c0_50 = arith.constant 0 : index
    %c0_51 = arith.constant 0 : index
    %245 = vector.load %arg8[%c0_50, %c0_51] : memref<1x32xf32, #tpu.memory_space<vmem>>, vector<1x32xf32>
    %246 = vector.broadcast %245 : vector<1x32xf32> to vector<16x32xf32>
    %247 = arith.addf %244, %246 : vector<16x32xf32>
    %248 = arith.negf %247 : vector<16x32xf32>
    %249 = math.exp %248 : vector<16x32xf32>
    %cst_52 = arith.constant 1.000000e+00 : f32
    %250 = vector.broadcast %cst_52 : f32 to vector<16x32xf32>
    %251 = arith.addf %250, %249 : vector<16x32xf32>
    %252 = arith.divf %250, %251 : vector<16x32xf32>
    %253 = arith.mulf %247, %252 : vector<16x32xf32>
    %c0_53 = arith.constant 0 : index
    %c0_54 = arith.constant 0 : index
    %254 = vector.load %arg9[%c0_53, %c0_54] : memref<32x32xbf16, #tpu.memory_space<vmem>>, vector<32x32xbf16>
    %255 = arith.truncf %253 : vector<16x32xf32> to vector<16x32xbf16>
    %cst_55 = arith.constant dense<0.000000e+00> : vector<16x32xf32>
    %256 = tpu.matmul %255, %254, %cst_55 {dimension_numbers = #tpu.dot_dimension_numbers<[1], [0], [0], [1], [0, 0, 1, 1], [], []>} : vector<16x32xbf16>, vector<32x32xbf16>, vector<16x32xf32> -> vector<16x32xf32>
    %c0_56 = arith.constant 0 : index
    %c0_57 = arith.constant 0 : index
    %257 = vector.load %arg10[%c0_56, %c0_57] : memref<1x32xf32, #tpu.memory_space<vmem>>, vector<1x32xf32>
    %258 = vector.broadcast %257 : vector<1x32xf32> to vector<16x32xf32>
    %259 = arith.addf %256, %258 : vector<16x32xf32>
    %260 = arith.addf %1, %259 : vector<16x32xf32>
    %c0_58 = arith.constant 0 : index
    %c0_59 = arith.constant 0 : index
    %c0_60 = arith.constant 0 : index
    %261 = vector.load %arg11[%c0_58, %c0_59, %c0_60] : memref<1x16x32xf32, #tpu.memory_space<vmem>>, vector<1x16x32xf32>
    %262 = vector.shape_cast %261 : vector<1x16x32xf32> to vector<16x32xf32>
    %263 = vector.shape_cast %260 : vector<16x32xf32> to vector<1x16x32xf32>
    tpu.vector_store %arg11[%c0_58, %c0_59, %c0_60], %263 {strides = array<i32>} : memref<1x16x32xf32, #tpu.memory_space<vmem>>, vector<1x16x32xf32>,
    return
  }
  func.func @transform_0(%arg0: i32) -> (i32, i32, i32) {
    %c0_i32 = arith.constant 0 : i32
    %c0_i32_0 = arith.constant 0 : i32
    %c0_i32_1 = arith.constant 0 : i32
    return %arg0, %c0_i32, %c0_i32_0 : i32, i32, i32
  }
  func.func @transform_1(%arg0: i32) -> (i32, i32) {
    %c0_i32 = arith.constant 0 : i32
    %c0_i32_0 = arith.constant 0 : i32
    %c0_i32_1 = arith.constant 0 : i32
    return %c0_i32, %c0_i32_0 : i32, i32
  }
  func.func @transform_2(%arg0: i32) -> (i32, i32) {
    %c0_i32 = arith.constant 0 : i32
    %c0_i32_0 = arith.constant 0 : i32
    %c0_i32_1 = arith.constant 0 : i32
    return %c0_i32, %c0_i32_0 : i32, i32
  }
  func.func @transform_3(%arg0: i32) -> (i32, i32) {
    %c0_i32 = arith.constant 0 : i32
    %c0_i32_0 = arith.constant 0 : i32
    %c0_i32_1 = arith.constant 0 : i32
    return %c0_i32, %c0_i32_0 : i32, i32
  }
  func.func @transform_4(%arg0: i32) -> (i32, i32) {
    %c0_i32 = arith.constant 0 : i32
    %c0_i32_0 = arith.constant 0 : i32
    %c0_i32_1 = arith.constant 0 : i32
    return %c0_i32, %c0_i32_0 : i32, i32
  }
  func.func @transform_5(%arg0: i32) -> (i32, i32) {
    %c0_i32 = arith.constant 0 : i32
    %c0_i32_0 = arith.constant 0 : i32
    %c0_i32_1 = arith.constant 0 : i32
    return %c0_i32, %c0_i32_0 : i32, i32
  }
  func.func @transform_6(%arg0: i32) -> (i32, i32) {
    %c0_i32 = arith.constant 0 : i32
    %c0_i32_0 = arith.constant 0 : i32
    %c0_i32_1 = arith.constant 0 : i32
    return %c0_i32, %c0_i32_0 : i32, i32
  }
  func.func @transform_7(%arg0: i32) -> (i32, i32) {
    %c0_i32 = arith.constant 0 : i32
    %c0_i32_0 = arith.constant 0 : i32
    %c0_i32_1 = arith.constant 0 : i32
    return %c0_i32, %c0_i32_0 : i32, i32
  }
  func.func @transform_8(%arg0: i32) -> (i32, i32) {
    %c0_i32 = arith.constant 0 : i32
    %c0_i32_0 = arith.constant 0 : i32
    %c0_i32_1 = arith.constant 0 : i32
    return %c0_i32, %c0_i32_0 : i32, i32
  }
  func.func @transform_9(%arg0: i32) -> (i32, i32) {
    %c0_i32 = arith.constant 0 : i32
    %c0_i32_0 = arith.constant 0 : i32
    %c0_i32_1 = arith.constant 0 : i32
    return %c0_i32, %c0_i32_0 : i32, i32
  }
  func.func @transform_10(%arg0: i32) -> (i32, i32, i32) {
    %c0_i32 = arith.constant 0 : i32
    %c0_i32_0 = arith.constant 0 : i32
    %c0_i32_1 = arith.constant 0 : i32
    return %arg0, %c0_i32, %c0_i32_0 : i32, i32, i32
  }
}

module attributes {stable_mosaic.version = 11 : i64} {
  func.func @_ff_residual_final_ln_kernel(%arg0: i32, %arg1: i32, %arg2: memref<1x16x32xf32, #tpu.memory_space<vmem>>, %arg3: memref<1x32xf32, #tpu.memory_space<vmem>>, %arg4: memref<1x32xf32, #tpu.memory_space<vmem>>, %arg5: memref<32x128xbf16, #tpu.memory_space<vmem>>, %arg6: memref<1x128xf32, #tpu.memory_space<vmem>>, %arg7: memref<128x32xbf16, #tpu.memory_space<vmem>>, %arg8: memref<1x32xf32, #tpu.memory_space<vmem>>, %arg9: memref<1x32xf32, #tpu.memory_space<vmem>>, %arg10: memref<1x32xf32, #tpu.memory_space<vmem>>, %arg11: memref<1x16x32xf32, #tpu.memory_space<vmem>>) attributes {dimension_semantics = [#tpu.dimension_semantics<parallel>, #tpu.dimension_semantics<parallel>], iteration_bounds = array<i64: 2, 1>, scalar_prefetch = 0 : i64, scratch_operands = 0 : i64, tpu.core_type = #tpu.core_type<tc>, window_params = [{transform_indices = @transform_0, window_bounds = array<i64: 1, 16, 32>}, {pipeline_mode = #tpu.pipeline_mode<synchronous>, transform_indices = @transform_1, window_bounds = array<i64: 1, 32>}, {pipeline_mode = #tpu.pipeline_mode<synchronous>, transform_indices = @transform_2, window_bounds = array<i64: 1, 32>}, {pipeline_mode = #tpu.pipeline_mode<synchronous>, transform_indices = @transform_3, window_bounds = array<i64: 32, 128>}, {pipeline_mode = #tpu.pipeline_mode<synchronous>, transform_indices = @transform_4, window_bounds = array<i64: 1, 128>}, {pipeline_mode = #tpu.pipeline_mode<synchronous>, transform_indices = @transform_5, window_bounds = array<i64: 128, 32>}, {pipeline_mode = #tpu.pipeline_mode<synchronous>, transform_indices = @transform_6, window_bounds = array<i64: 1, 32>}, {pipeline_mode = #tpu.pipeline_mode<synchronous>, transform_indices = @transform_7, window_bounds = array<i64: 1, 32>}, {pipeline_mode = #tpu.pipeline_mode<synchronous>, transform_indices = @transform_8, window_bounds = array<i64: 1, 32>}, {transform_indices = @transform_9, window_bounds = array<i64: 1, 16, 32>}]} {
    %c0 = arith.constant 0 : index
    %c0_0 = arith.constant 0 : index
    %c0_1 = arith.constant 0 : index
    %0 = vector.load %arg2[%c0, %c0_0, %c0_1] : memref<1x16x32xf32, #tpu.memory_space<vmem>>, vector<1x16x32xf32>
    %1 = vector.shape_cast %0 : vector<1x16x32xf32> to vector<16x32xf32>
    %c0_2 = arith.constant 0 : index
    %c0_3 = arith.constant 0 : index
    %2 = vector.load %arg3[%c0_2, %c0_3] : memref<1x32xf32, #tpu.memory_space<vmem>>, vector<1x32xf32>
    %c0_4 = arith.constant 0 : index
    %c0_5 = arith.constant 0 : index
    %3 = vector.load %arg4[%c0_4, %c0_5] : memref<1x32xf32, #tpu.memory_space<vmem>>, vector<1x32xf32>
    %c0_6 = arith.constant 0 : index
    %c0_7 = arith.constant 0 : index
    %4 = vector.load %arg5[%c0_6, %c0_7] : memref<32x128xbf16, #tpu.memory_space<vmem>>, vector<32x128xbf16>
    %c0_8 = arith.constant 0 : index
    %c0_9 = arith.constant 0 : index
    %5 = vector.load %arg6[%c0_8, %c0_9] : memref<1x128xf32, #tpu.memory_space<vmem>>, vector<1x128xf32>
    %c0_10 = arith.constant 0 : index
    %c0_11 = arith.constant 0 : index
    %6 = vector.load %arg7[%c0_10, %c0_11] : memref<128x32xbf16, #tpu.memory_space<vmem>>, vector<128x32xbf16>
    %c0_12 = arith.constant 0 : index
    %c0_13 = arith.constant 0 : index
    %7 = vector.load %arg8[%c0_12, %c0_13] : memref<1x32xf32, #tpu.memory_space<vmem>>, vector<1x32xf32>
    %cst = arith.constant dense<0.000000e+00> : vector<16xf32>
    %8 = vector.multi_reduction <add>, %1, %cst [1] : vector<16x32xf32> to vector<16xf32>
    %9 = vector.shape_cast %8 : vector<16xf32> to vector<16x1xf32>
    %cst_14 = arith.constant 3.200000e+01 : f32
    %10 = vector.broadcast %cst_14 : f32 to vector<16x1xf32>
    %11 = arith.divf %9, %10 : vector<16x1xf32>
    %12 = vector.broadcast %11 : vector<16x1xf32> to vector<16x32xf32>
    %13 = arith.subf %1, %12 : vector<16x32xf32>
    %14 = arith.mulf %13, %13 : vector<16x32xf32>
    %cst_15 = arith.constant dense<0.000000e+00> : vector<16xf32>
    %15 = vector.multi_reduction <add>, %14, %cst_15 [1] : vector<16x32xf32> to vector<16xf32>
    %16 = vector.shape_cast %15 : vector<16xf32> to vector<16x1xf32>
    %cst_16 = arith.constant 3.200000e+01 : f32
    %17 = vector.broadcast %cst_16 : f32 to vector<16x1xf32>
    %18 = arith.divf %16, %17 : vector<16x1xf32>
    %19 = vector.broadcast %11 : vector<16x1xf32> to vector<16x32xf32>
    %20 = arith.subf %1, %19 : vector<16x32xf32>
    %cst_17 = arith.constant 9.99999974E-6 : f32
    %21 = vector.broadcast %cst_17 : f32 to vector<16x1xf32>
    %22 = arith.addf %18, %21 : vector<16x1xf32>
    %23 = math.rsqrt %22 : vector<16x1xf32>
    %24 = vector.broadcast %23 : vector<16x1xf32> to vector<16x32xf32>
    %25 = arith.mulf %20, %24 : vector<16x32xf32>
    %26 = vector.broadcast %2 : vector<1x32xf32> to vector<16x32xf32>
    %27 = arith.mulf %25, %26 : vector<16x32xf32>
    %28 = vector.broadcast %3 : vector<1x32xf32> to vector<16x32xf32>
    %29 = arith.addf %27, %28 : vector<16x32xf32>
    %30 = arith.truncf %29 : vector<16x32xf32> to vector<16x32xbf16>
    %cst_18 = arith.constant dense<0.000000e+00> : vector<16x128xf32>
    %31 = tpu.matmul %30, %4, %cst_18 {dimension_numbers = #tpu.dot_dimension_numbers<[1], [0], [0], [1], [0, 0, 1, 1], [], []>} : vector<16x32xbf16>, vector<32x128xbf16>, vector<16x128xf32> -> vector<16x128xf32>
    %32 = vector.broadcast %5 : vector<1x128xf32> to vector<16x128xf32>
    %33 = arith.addf %31, %32 : vector<16x128xf32>
    %34 = arith.negf %33 : vector<16x128xf32>
    %35 = math.exp %34 : vector<16x128xf32>
    %cst_19 = arith.constant 1.000000e+00 : f32
    %36 = vector.broadcast %cst_19 : f32 to vector<16x128xf32>
    %37 = arith.addf %36, %35 : vector<16x128xf32>
    %38 = arith.divf %36, %37 : vector<16x128xf32>
    %39 = arith.mulf %33, %38 : vector<16x128xf32>
    %40 = arith.truncf %39 : vector<16x128xf32> to vector<16x128xbf16>
    %cst_20 = arith.constant dense<0.000000e+00> : vector<16x32xf32>
    %41 = tpu.matmul %40, %6, %cst_20 {dimension_numbers = #tpu.dot_dimension_numbers<[1], [0], [0], [1], [0, 0, 1, 1], [], []>} : vector<16x128xbf16>, vector<128x32xbf16>, vector<16x32xf32> -> vector<16x32xf32>
    %42 = vector.broadcast %7 : vector<1x32xf32> to vector<16x32xf32>
    %43 = arith.addf %41, %42 : vector<16x32xf32>
    %cst_21 = arith.constant 5.000000e-01 : f32
    %44 = vector.broadcast %cst_21 : f32 to vector<16x32xf32>
    %45 = arith.mulf %44, %43 : vector<16x32xf32>
    %46 = arith.addf %1, %45 : vector<16x32xf32>
    %c0_22 = arith.constant 0 : index
    %c0_23 = arith.constant 0 : index
    %47 = vector.load %arg9[%c0_22, %c0_23] : memref<1x32xf32, #tpu.memory_space<vmem>>, vector<1x32xf32>
    %c0_24 = arith.constant 0 : index
    %c0_25 = arith.constant 0 : index
    %48 = vector.load %arg10[%c0_24, %c0_25] : memref<1x32xf32, #tpu.memory_space<vmem>>, vector<1x32xf32>
    %cst_26 = arith.constant dense<0.000000e+00> : vector<16xf32>
    %49 = vector.multi_reduction <add>, %46, %cst_26 [1] : vector<16x32xf32> to vector<16xf32>
    %50 = vector.shape_cast %49 : vector<16xf32> to vector<16x1xf32>
    %cst_27 = arith.constant 3.200000e+01 : f32
    %51 = vector.broadcast %cst_27 : f32 to vector<16x1xf32>
    %52 = arith.divf %50, %51 : vector<16x1xf32>
    %53 = vector.broadcast %52 : vector<16x1xf32> to vector<16x32xf32>
    %54 = arith.subf %46, %53 : vector<16x32xf32>
    %55 = arith.mulf %54, %54 : vector<16x32xf32>
    %cst_28 = arith.constant dense<0.000000e+00> : vector<16xf32>
    %56 = vector.multi_reduction <add>, %55, %cst_28 [1] : vector<16x32xf32> to vector<16xf32>
    %57 = vector.shape_cast %56 : vector<16xf32> to vector<16x1xf32>
    %cst_29 = arith.constant 3.200000e+01 : f32
    %58 = vector.broadcast %cst_29 : f32 to vector<16x1xf32>
    %59 = arith.divf %57, %58 : vector<16x1xf32>
    %60 = vector.broadcast %52 : vector<16x1xf32> to vector<16x32xf32>
    %61 = arith.subf %46, %60 : vector<16x32xf32>
    %cst_30 = arith.constant 9.99999974E-6 : f32
    %62 = vector.broadcast %cst_30 : f32 to vector<16x1xf32>
    %63 = arith.addf %59, %62 : vector<16x1xf32>
    %64 = math.rsqrt %63 : vector<16x1xf32>
    %65 = vector.broadcast %64 : vector<16x1xf32> to vector<16x32xf32>
    %66 = arith.mulf %61, %65 : vector<16x32xf32>
    %67 = vector.broadcast %47 : vector<1x32xf32> to vector<16x32xf32>
    %68 = arith.mulf %66, %67 : vector<16x32xf32>
    %69 = vector.broadcast %48 : vector<1x32xf32> to vector<16x32xf32>
    %70 = arith.addf %68, %69 : vector<16x32xf32>
    %c0_31 = arith.constant 0 : index
    %c0_32 = arith.constant 0 : index
    %c0_33 = arith.constant 0 : index
    %71 = vector.load %arg11[%c0_31, %c0_32, %c0_33] : memref<1x16x32xf32, #tpu.memory_space<vmem>>, vector<1x16x32xf32>
    %72 = vector.shape_cast %71 : vector<1x16x32xf32> to vector<16x32xf32>
    %73 = vector.shape_cast %70 : vector<16x32xf32> to vector<1x16x32xf32>
    tpu.vector_store %arg11[%c0_31, %c0_32, %c0_33], %73 {strides = array<i32>} : memref<1x16x32xf32, #tpu.memory_space<vmem>>, vector<1x16x32xf32>,
    return
  }
  func.func @transform_0(%arg0: i32, %arg1: i32) -> (i32, i32, i32) {
    %c0_i32 = arith.constant 0 : i32
    %c0_i32_0 = arith.constant 0 : i32
    return %arg0, %arg1, %c0_i32 : i32, i32, i32
  }
  func.func @transform_1(%arg0: i32, %arg1: i32) -> (i32, i32) {
    %c0_i32 = arith.constant 0 : i32
    %c0_i32_0 = arith.constant 0 : i32
    %c0_i32_1 = arith.constant 0 : i32
    return %c0_i32, %c0_i32_0 : i32, i32
  }
  func.func @transform_2(%arg0: i32, %arg1: i32) -> (i32, i32) {
    %c0_i32 = arith.constant 0 : i32
    %c0_i32_0 = arith.constant 0 : i32
    %c0_i32_1 = arith.constant 0 : i32
    return %c0_i32, %c0_i32_0 : i32, i32
  }
  func.func @transform_3(%arg0: i32, %arg1: i32) -> (i32, i32) {
    %c0_i32 = arith.constant 0 : i32
    %c0_i32_0 = arith.constant 0 : i32
    %c0_i32_1 = arith.constant 0 : i32
    return %c0_i32, %c0_i32_0 : i32, i32
  }
  func.func @transform_4(%arg0: i32, %arg1: i32) -> (i32, i32) {
    %c0_i32 = arith.constant 0 : i32
    %c0_i32_0 = arith.constant 0 : i32
    %c0_i32_1 = arith.constant 0 : i32
    return %c0_i32, %c0_i32_0 : i32, i32
  }
  func.func @transform_5(%arg0: i32, %arg1: i32) -> (i32, i32) {
    %c0_i32 = arith.constant 0 : i32
    %c0_i32_0 = arith.constant 0 : i32
    %c0_i32_1 = arith.constant 0 : i32
    return %c0_i32, %c0_i32_0 : i32, i32
  }
  func.func @transform_6(%arg0: i32, %arg1: i32) -> (i32, i32) {
    %c0_i32 = arith.constant 0 : i32
    %c0_i32_0 = arith.constant 0 : i32
    %c0_i32_1 = arith.constant 0 : i32
    return %c0_i32, %c0_i32_0 : i32, i32
  }
  func.func @transform_7(%arg0: i32, %arg1: i32) -> (i32, i32) {
    %c0_i32 = arith.constant 0 : i32
    %c0_i32_0 = arith.constant 0 : i32
    %c0_i32_1 = arith.constant 0 : i32
    return %c0_i32, %c0_i32_0 : i32, i32
  }
  func.func @transform_8(%arg0: i32, %arg1: i32) -> (i32, i32) {
    %c0_i32 = arith.constant 0 : i32
    %c0_i32_0 = arith.constant 0 : i32
    %c0_i32_1 = arith.constant 0 : i32
    return %c0_i32, %c0_i32_0 : i32, i32
  }
  func.func @transform_9(%arg0: i32, %arg1: i32) -> (i32, i32, i32) {
    %c0_i32 = arith.constant 0 : i32
    %c0_i32_0 = arith.constant 0 : i32
    return %arg0, %arg1, %c0_i32 : i32, i32, i32
  }
}

</mosaic_0001>

<bundles_post_ra>
// kernel: transformer_layer.6
= control target key start
LH: loop header
LB: loop body
LE: loop exit
PB: predicated region body
PF: predicated region fallthrough
CT: control target
= control target key end

     0   :  { %s1844_s0 = inlined_call_operand.hbm [shape: f32[2,16,32], index: 0, kind: input, shape index: {}]   ;;  %s1845_s1 = inlined_call_operand.hbm [shape: f32[1,32], index: 1, kind: input, shape index: {}]   ;;  %s1846_s2 = inlined_call_operand.hbm [shape: f32[1,32], index: 2, kind: input, shape index: {}]   ;;  %s1847_s3 = inlined_call_operand.hbm [shape: bf16[32,32], index: 3, kind: input, shape index: {}]   ;;  %s1848_s4 = inlined_call_operand.hbm [shape: f32[1,32], index: 4, kind: input, shape index: {}]   ;;  %s1849_s5 = inlined_call_operand.hbm [shape: bf16[32,32], index: 5, kind: input, shape index: {}]   ;;  %s1850_s6 = inlined_call_operand.hbm [shape: f32[1,32], index: 6, kind: input, shape index: {}]   ;;  %s1851_s7 = inlined_call_operand.hbm [shape: bf16[2,16,32], index: 7, kind: output, shape index: {0}]   ;;  %s1852_s8 = inlined_call_operand.hbm [shape: bf16[2,16,32], index: 8, kind: output, shape index: {1}]  }
   0x1   :  { %1859 = sst [smem:[#allocation23_spill]] %s1845_s1 }
   0x2   :  { %1860 = sst [smem:[#allocation24_spill]] %s1847_s3 }
   0x3   :  { %1861 = sst [smem:[#allocation25_spill]] %s1852_s8 }
   0x4   :  { %14 = vsyncpa [#allocation3], 0 }
   0x5   :  { %16 = vsyncpa [#allocation3 + $0x1], 0 }
   0x6   :  { %17 = vsyncpa [#allocation6], 0 }
   0x7   :  { %18 = vsyncpa [#allocation9], 0 }
   0x8   :  { %19 = vsyncpa [#allocation12], 0 }
   0x9   :  { %20 = vsyncpa [#allocation4], 0 }
   0xa   :  { %22 = vsyncpa [#allocation4 + $0x1], 0 }
   0xb   :  { %23 = vsyncpa [#allocation16], 0 }
   0xc   :  { %25 = vsyncpa [#allocation16 + $0x1], 0  ;;  %s1463_s27 = smov 0   ;;  %s1465_s28 = smov 0  }
   0xd   :  { %s1467_s29 = smov 0   ;;  %s1469_s30 = smov 0  }
   0xe   :  { %s1471_s9 = smov 0   ;;  %s1473_s10 = smov 0  }
   0xf LB: > { %s1856_s11 = sadd.s32 4294967295, %s1399_s10   ;;  %p859_p0 = scmp.ge.s32.totalorder %s1399_s10, 1  ;;  %s1399_s10 = sphi %s1473_s10, %s31_s10   ;;  %s1395_s9 = sphi %s1471_s9, %s1885_s9   ;;  %s1391_s30 = sphi %s1469_s30, %s1884_s30   ;;  %s1387_s29 = sphi %s1467_s29, %s1883_s29   ;;  %s1383_s28 = sphi %s1465_s28, %s1882_s28   ;;  %s1379_s27 = sphi %s1463_s27, %s1881_s27  }
  0x10   : > { %p1497_p1 = scmp.eq.s32.totalorder %s1856_s11, 0  ;;  %p258_p2 = scmp.lt.s32.totalorder %s1399_s10, 3 }
  0x11   : > { %s1401_s14 = smov [#allocation5]   ;;  %s1402_s16 = smov [#allocation8]  }
  0x12   : > { %s1862_s12 = scalar_select %p1497_p1, 1, 0 }
  0x13   : > { %p1502_p3 = pnand %p859_p0, %p258_p2  ;;  %s271_s15 = sshll.u32 %s1401_s14, 4  ;;  %s272_s15 = int_to_ptr.vmem [resolvable:$true] %s271_s15 }
  0x14   : > { %s292_s17 = sshll.u32 %s1402_s16, 4  ;;  %s1403_s19 = smov [#allocation11]   ;;  %s1515_s17 = int_to_ptr.vmem [resolvable:$true] %s292_s17 }
  0x15   : > { %s1863_s13 = scalar_select %p1502_p3, 1, 0 }
  0x16   : > { %p961_p5 = pneg %p1502_p3  ;;  %s1517_s20 = sshll.u32 %s1403_s19, 4  ;;  %s317_s20 = int_to_ptr.vmem [resolvable:$true] %s1517_s20 }
  0x17   : > { %s1865_s1 = sld [smem:[#allocation23_spill]] }
  0x18   : > { %p1511_p6 = pnand %p961_p5, %p1497_p1 }
  0x1a   : > { %p1527_p8 = pneg %p1511_p6 }
  0x1d   : > { %s1075_s23 = scalar_lea.hbm %s1865_s1, 16 }
  0x1e   : > { %p1076_p7 = scmp.ne.s32.totalorder %s1865_s1, %s1075_s23  ;;  %p1082_p11 = scmp.lt.u32.totalorder %s1075_s23, %s1865_s1 }
  0x20   : > { %p1078_p9 = pnand %p1527_p8, %p1076_p7 }
  0x22   : > { %p1079_p10 = pneg %p1078_p9 }
  0x24   : > { %p1084_p12 = pnand %p1082_p11, %p1079_p10 }
  0x26   : > { %1087 = shalt.err (!%p1084_p12)
}
  0x27   : > { %s1088_s19 = scalar_lea.vmem %s272_s15, 16  ;;  %s1095_s21 = scalar_lea.vmem %s272_s15, 32 }
  0x28   : > { %p1089_p13 = scmp.ne.s32.totalorder %s272_s15, %s1088_s19  ;;  %p1096_p5 = scmp.lt.s32.totalorder %s272_s15, %s272_s15 }
  0x29   : > { %p1097_p4 = scmp.lt.s32.totalorder %s1095_s21, %s1088_s19 }
  0x2a   : > { %p1091_p0 = pnand %p1089_p13, %p1527_p8 }
  0x2b   : > { %p1098_p3 = por %p1097_p4, %p1096_p5 }
  0x2c   : > { %p1092_p2 = pneg %p1091_p0 }
  0x2e   : > { %p1099_p1 = pnand %p1098_p3, %p1092_p2 }
  0x30   : > { %1102 = shalt.err (!%p1099_p1)
}
  0x31   : > { %964 = dma.hbm_to_vmem [thread:$0]  (!%p1511_p6), %s1865_s1, 16, %s272_s15, [#allocation6]  }
  0x32   : > { %s1867_s3 = sld [smem:[#allocation24_spill]] }
  0x38   : > { %s1103_s14 = scalar_lea.hbm %s1867_s3, 256 }
  0x39   : > { %p1104_p7 = scmp.ne.s32.totalorder %s1867_s3, %s1103_s14  ;;  %p1110_p1 = scmp.lt.u32.totalorder %s1103_s14, %s1867_s3 }
  0x3b   : > { %p1106_p9 = pnand %p1104_p7, %p1527_p8 }
  0x3d   : > { %p1107_p4 = pneg %p1106_p9 }
  0x3f   : > { %p1112_p3 = pnand %p1110_p1, %p1107_p4 }
  0x41   : > { %1115 = shalt.err (!%p1112_p3)
}
  0x42   : > { %s1116_s15 = scalar_lea.vmem %s1515_s17, 256  ;;  %p1124_p13 = scmp.lt.s32.totalorder %s1515_s17, %s1515_s17 }
  0x43   : > { %p1117_p10 = scmp.ne.s32.totalorder %s1515_s17, %s1116_s15  ;;  %p1125_p0 = scmp.lt.s32.totalorder %s1116_s15, %s1116_s15 }
  0x45   : > { %p1119_p11 = pnand %p1117_p10, %p1527_p8  ;;  %p1126_p2 = por %p1125_p0, %p1124_p13 }
  0x47   : > { %p1120_p12 = pneg %p1119_p11 }
  0x49   : > { %p1127_p5 = pnand %p1126_p2, %p1120_p12 }
  0x4b   : > { %1130 = shalt.err (!%p1127_p5)
}
  0x4c   : > { %s1404_s11 = smov 64   ;;  %s1405_s22 = smov 4  }
  0x4d   : > { %970 = dma.hbm_to_vmem [thread:$0]  (!%p1511_p6), %s1867_s3, 256, %s1515_s17, [#allocation9], %s1404_s11, %s1404_s11, %s1405_s22  }
  0x4e   : > { %s1131_s16 = scalar_lea.hbm %s1849_s5, 256 }
  0x4f   : > { %p1132_p7 = scmp.ne.s32.totalorder %s1849_s5, %s1131_s16  ;;  %p1138_p1 = scmp.lt.u32.totalorder %s1131_s16, %s1849_s5 }
  0x51   : > { %p1134_p9 = pnand %p1132_p7, %p1527_p8 }
  0x53   : > { %p1135_p4 = pneg %p1134_p9 }
  0x55   : > { %p1140_p3 = pnand %p1138_p1, %p1135_p4 }
  0x57   : > { %1143 = shalt.err (!%p1140_p3)
}
  0x58   : > { %s1144_s24 = scalar_lea.vmem %s317_s20, 256  ;;  %p1152_p13 = scmp.lt.s32.totalorder %s317_s20, %s317_s20 }
  0x59   : > { %p1145_p10 = scmp.ne.s32.totalorder %s317_s20, %s1144_s24  ;;  %p1153_p0 = scmp.lt.s32.totalorder %s1144_s24, %s1144_s24 }
  0x5b   : > { %p1147_p11 = pnand %p1145_p10, %p1527_p8  ;;  %p1154_p2 = por %p1153_p0, %p1152_p13 }
  0x5d   : > { %p1148_p12 = pneg %p1147_p11 }
  0x5f   : > { %p1155_p5 = pnand %p1154_p2, %p1148_p12 }
  0x61   : > { %1158 = shalt.err (!%p1155_p5)
}
  0x62   : > { %976 = dma.hbm_to_vmem [thread:$0]  (!%p1511_p6), %s1849_s5, 256, %s317_s20, [#allocation12], %s1404_s11, %s1404_s11, %s1405_s22  }
  0x63   : > { %s1406_s1 = smov [#allocation7]   ;;  %s1407_s14 = smov [#allocation10]  }
  0x64   : > { %s282_s25 = sshll.u32 %s1406_s1, 4  ;;  %s306_s16 = sshll.u32 %s1407_s14, 4  ;;  %s283_s25 = int_to_ptr.vmem [resolvable:$true] %s282_s25  ;;  %s307_s16 = int_to_ptr.vmem [resolvable:$true] %s306_s16 }
  0x65   : > { %s1159_s15 = scalar_lea.hbm %s1846_s2, 16 }
  0x66   : > { %p1160_p7 = scmp.ne.s32.totalorder %s1846_s2, %s1159_s15  ;;  %p1166_p1 = scmp.lt.u32.totalorder %s1159_s15, %s1846_s2 }
  0x68   : > { %p1162_p9 = pnand %p1160_p7, %p1527_p8 }
  0x6a   : > { %p1163_p4 = pneg %p1162_p9 }
  0x6c   : > { %p1168_p3 = pnand %p1166_p1, %p1163_p4 }
  0x6e   : > { %1171 = shalt.err (!%p1168_p3)
}
  0x6f   : > { %s1172_s20 = scalar_lea.vmem %s283_s25, 16  ;;  %s1179_s11 = scalar_lea.vmem %s283_s25, 32 }
  0x70   : > { %p1173_p10 = scmp.ne.s32.totalorder %s283_s25, %s1172_s20  ;;  %p1180_p13 = scmp.lt.s32.totalorder %s283_s25, %s283_s25 }
  0x71   : > { %p1181_p0 = scmp.lt.s32.totalorder %s1179_s11, %s1172_s20 }
  0x72   : > { %p1175_p11 = pnand %p1173_p10, %p1527_p8 }
  0x73   : > { %p1182_p2 = por %p1181_p0, %p1180_p13 }
  0x74   : > { %p1176_p12 = pneg %p1175_p11 }
  0x76   : > { %p1183_p5 = pnand %p1182_p2, %p1176_p12 }
  0x78   : > { %1186 = shalt.err (!%p1183_p5)
}
  0x79   : > { %967 = dma.hbm_to_vmem [thread:$0]  (!%p1511_p6), %s1846_s2, 16, %s283_s25, [#allocation6]  }
  0x7a   : > { %s1187_s1 = scalar_lea.hbm %s1848_s4, 16 }
  0x7b   : > { %p1188_p7 = scmp.ne.s32.totalorder %s1848_s4, %s1187_s1  ;;  %p1194_p1 = scmp.lt.u32.totalorder %s1187_s1, %s1848_s4 }
  0x7d   : > { %p1190_p9 = pnand %p1188_p7, %p1527_p8 }
  0x7f   : > { %p1191_p4 = pneg %p1190_p9 }
  0x81   : > { %p1196_p3 = pnand %p1194_p1, %p1191_p4 }
  0x83   : > { %1199 = shalt.err (!%p1196_p3)
}
  0x84   : > { %s1200_s24 = scalar_lea.vmem %s307_s16, 16  ;;  %s1207_s25 = scalar_lea.vmem %s307_s16, 32 }
  0x85   : > { %p1201_p10 = scmp.ne.s32.totalorder %s307_s16, %s1200_s24  ;;  %p1208_p13 = scmp.lt.s32.totalorder %s307_s16, %s307_s16 }
  0x86   : > { %p1209_p0 = scmp.lt.s32.totalorder %s1207_s25, %s1200_s24 }
  0x87   : > { %p1203_p11 = pnand %p1201_p10, %p1527_p8 }
  0x88   : > { %p1210_p2 = por %p1209_p0, %p1208_p13 }
  0x89   : > { %p1204_p12 = pneg %p1203_p11 }
  0x8b   : > { %p1211_p5 = pnand %p1210_p2, %p1204_p12 }
  0x8d   : > { %1214 = shalt.err (!%p1211_p5)
}
  0x8e   : > { %973 = dma.hbm_to_vmem [thread:$0]  (!%p1511_p6), %s1848_s4, 16, %s307_s16, [#allocation9]  }
  0x8f   : > { %s1408_s11 = smov [#allocation13]   ;;  %s1215_s23 = scalar_lea.hbm %s1850_s6, 16 }
  0x90   : > { %s330_s3 = sshll.u32 %s1408_s11, 4  ;;  %p1216_p7 = scmp.ne.s32.totalorder %s1850_s6, %s1215_s23  ;;  %s331_s3 = int_to_ptr.vmem [resolvable:$true] %s330_s3 }
  0x91   : > { %p1222_p1 = scmp.lt.u32.totalorder %s1215_s23, %s1850_s6 }
  0x92   : > { %p1218_p9 = pnand %p1216_p7, %p1527_p8 }
  0x94   : > { %p1219_p4 = pneg %p1218_p9 }
  0x96   : > { %p1224_p3 = pnand %p1222_p1, %p1219_p4 }
  0x98   : > { %1227 = shalt.err (!%p1224_p3)
}
  0x99   : > { %s1228_s16 = scalar_lea.vmem %s331_s3, 16  ;;  %s1235_s15 = scalar_lea.vmem %s331_s3, 32 }
  0x9a   : > { %p1229_p10 = scmp.ne.s32.totalorder %s331_s3, %s1228_s16  ;;  %p1236_p13 = scmp.lt.s32.totalorder %s331_s3, %s331_s3 }
  0x9b   : > { %p1237_p0 = scmp.lt.s32.totalorder %s1235_s15, %s1228_s16 }
  0x9c   : > { %p1231_p11 = pnand %p1229_p10, %p1527_p8 }
  0x9d   : > { %p1238_p2 = por %p1237_p0, %p1236_p13 }
  0x9e   : > { %p1232_p12 = pneg %p1231_p11 }
  0xa0   : > { %p1239_p5 = pnand %p1238_p2, %p1232_p12 }
  0xa2   : > { %1242 = shalt.err (!%p1239_p5)
}
  0xa3   : > { %979 = dma.hbm_to_vmem [thread:$0]  (!%p1511_p6), %s1850_s6, 16, %s331_s3, [#allocation12]  }
  0xa4   : > { %s858_s26 = sadd.s32 4294967294, %s1399_s10   ;;  %s43_s17 = sadd.s32 1, %s1395_s9 }
  0xa5   : > { %p45_p8 = scmp.ge.s32.totalorder %s43_s17, 2  ;;  %s52_s18 = sadd.s32 1, %s1387_s29 }
  0xa6   : > { %p59_p7 = scmp.ne.s32.totalorder %s1387_s29, %s1383_s28  ;;  %p60_p9 = scmp.eq.s32.totalorder %s1399_s10, 0 }
  0xa7   : > { %s1887_s17 = smov (%p45_p8, %s43_s17), 0  ;;  %p65_p1 = scmp.ne.s32.totalorder %s1383_s28, %s1379_s27 }
  0xa8   : > { %p1647_p4 = por %p60_p9, %p59_p7  ;;  %s47_s11 = ssub.s32 %s1395_s9, %s1887_s17 }
  0xa9   : > { %s1869_s3 = sadd.s32 4294967295, %s1399_s10   ;;  %p50_p3 = scmp.eq.s32.totalorder %s47_s11, 0 }
  0xaa   : > { %p217_p6 = scmp.eq.s32.totalorder %s1869_s3, 1  ;;  %p1870_p10 = scmp.ne.s32.totalorder %s1862_s12, 0 }
  0xab   : > { %p223_p13 = scmp.eq.s32.totalorder %s858_s26, 1  ;;  %p997_p2 = scmp.lt.s32.totalorder %s1399_s10, 2 }
  0xac   : > { %p1659_p11 = por %p1870_p10, %p65_p1  ;;  %p1663_p12 = por %p217_p6, %p59_p7 }
  0xad   : > { %s1668_s23 = scalar_select %p50_p3, %s1387_s29, %s52_s18  }
  0xae   : > { %s1872_s8 = scalar_select %p1663_p12, 1, 0 }
  0xaf   : > { %p1670_p0 = por %p223_p13, %p65_p1  ;;  %s341_s14 = sand.u32 1, %s1387_s29  }
  0xb0   : > { %s902_s19 = sshll.u32 %s1395_s9, 8  ;;  %s867_s21 = sshll.u32 %s341_s14, 4 }
  0xb1   : > { %s1873_s1 = scalar_select %p1670_p0, 1, 0 }
  0xb2   : > { %s1680_s24 = scalar_lea.hbm %s1844_s0, %s902_s19  ;;  %s345_s25 = scalar_lea.vmem [#allocation2], %s867_s21 }
  0xb3   : > { %s354_s26 = sshll.u32 %s345_s25, 4  ;;  %p1684_p5 = pnand %p997_p2, %p1647_p4  ;;  %s1688_s26 = int_to_ptr.vmem [resolvable:$true] %s354_s26 }
  0xb4   : > { %s1690_s11 = scalar_lea.sflag [#allocation3], %s341_s14  ;;  %s1243_s3 = scalar_lea.hbm %s1680_s24, 256 }
  0xb5   : > { %p1244_p8 = scmp.ne.s32.totalorder %s1680_s24, %s1243_s3  ;;  %p1245_p7 = pneg %p1684_p5 }
  0xb6   : > { %s1248_s21 = scalar_lea.hbm %s1844_s0, 512  ;;  %p1249_p4 = scmp.lt.u32.totalorder %s1680_s24, %s1844_s0 }
  0xb7   : > { %p1246_p9 = pnand %p1245_p7, %p1244_p8  ;;  %p1250_p6 = scmp.lt.u32.totalorder %s1248_s21, %s1243_s3 }
  0xb8   : > { %p1252_p10 = scmp.lt.u32.totalorder %s1243_s3, %s1680_s24 }
  0xb9   : > { %p1247_p1 = pneg %p1246_p9  ;;  %p1251_p3 = por %p1250_p6, %p1249_p4 }
  0xbb   : > { %p1253_p13 = por %p1252_p10, %p1251_p3 }
  0xbd   : > { %p1254_p2 = pnand %p1253_p13, %p1247_p1 }
  0xbf   : > { %1257 = shalt.err (!%p1254_p2)
}
  0xc0   : > { %s1258_s14 = scalar_lea.vmem %s1688_s26, 256  ;;  %s1409_s25 = smov [#allocation2]  }
  0xc1   : > { %p1259_p8 = scmp.ne.s32.totalorder %s1688_s26, %s1258_s14  ;;  %s1263_s19 = sshll.u32 %s1409_s25, 4  ;;  %s1264_s19 = int_to_ptr.vmem [resolvable:$false] %s1263_s19 }
  0xc2   : > { %s1265_s20 = scalar_lea.vmem %s1264_s19, 512  ;;  %p1266_p12 = scmp.lt.s32.totalorder %s1688_s26, %s1264_s19 }
  0xc3   : > { %p1261_p9 = pnand %p1259_p8, %p1245_p7  ;;  %p1267_p4 = scmp.lt.s32.totalorder %s1265_s20, %s1258_s14 }
  0xc5   : > { %p1262_p0 = pneg %p1261_p9  ;;  %p1268_p6 = por %p1267_p4, %p1266_p12 }
  0xc7   : > { %p1269_p3 = pnand %p1268_p6, %p1262_p0 }
  0xc9   : > { %1272 = shalt.err (!%p1269_p3)
}
  0xca   : > { %s1410_s3 = smov 128   ;;  %s1411_s21 = smov 8  }
  0xcb   : > { %983 = dma.hbm_to_vmem [thread:$0]  (!%p1684_p5), %s1680_s24, 256, %s1688_s26, %s1690_s11, %s1410_s3, %s1410_s3, %s1411_s21  }
  0xcc   : > { %p1875_p7 = scmp.ne.s32.totalorder %s1863_s13, 0 }
  0xcd   : > { %s1721_s16 = sand.u32 (!%p1875_p7), 1, %s1383_s28  }
  0xce   : > { %366 = sbr.rel (%p1875_p7) target bundleno = 797 (0x31d), region = 48  ;;  %s871_s15 = sshll.u32 (!%p1875_p7), %s1721_s16, 4 }
  0xcf   : > { %s369_s14 = scalar_lea.sflag (!%p1875_p7), [#allocation3], %s1721_s16  ;;  %s372_s25 = scalar_lea.vmem (!%p1875_p7), [#allocation2], %s871_s15 }
  0xd5   : > { %1354 = dma.done.wait (%p1659_p11), %s369_s14, 256  }
  0xd6   : > { %1356 = vsyncadd (%p1659_p11), %s369_s14, 4294967040  ;;  %p1876_p12 = scmp.ne.s32.totalorder %s1862_s12, 0 }
  0xd8   : > { %1358 = dma.done.wait (%p1876_p12), [#allocation6], 32  }
  0xd9   : > { %1360 = vsyncadd (%p1876_p12), [#allocation6], 4294967264 }
  0xda   : > { %1362 = dma.done.wait (%p1876_p12), [#allocation9], 272  }
  0xdb   : > { %1364 = vsyncadd (%p1876_p12), [#allocation9], 4294967024 }
  0xdc   : > { %1366 = dma.done.wait (%p1876_p12), [#allocation12], 272  }
  0xdd   : > { %1368 = vsyncadd (%p1876_p12), [#allocation12], 4294967024  ;;  %vm442_vm0 = vcmask 261120   ;;  %v438_v0 = vld [vmem:[%s372_s25] sm:$0xff]  ;;  %v439_v1 = vld [vmem:[%s372_s25 + $0x8] sm:$0xff]  ;;  %v1412_v16 = vmov 0.0  }
  0xde   : > { %v443_v2 = vsel %vm442_vm0, %v438_v0, 0.0  ;;  %v446_v3 = vsel %vm442_vm0, %v439_v1, 0.0  ;;  %v1067_v14 = vld [vmem:[#allocation8] sm:$0xff]   ;;  %v1068_v15 = vld [vmem:[#allocation11] sm:$0xff]   ;;  %915 = vmatprep.subr.bf16.mxu0 %v1412_v16  ;;  %923 = vmatprep.subr.bf16.mxu1 %v1412_v16  ;;  %v1069_v17 = vld [vmem:[#allocation8 + $0x8] sm:$0xff]   ;;  %vm1413_vm1 = vmmov 0  }
  0xdf   : > { %444 = vadd.xlane.f32.xlu0 %v443_v2  ;;  %916 = vmatpush3.bf16.msra.mxu0 %v1067_v14  ;;  %v1070_v18 = vld [vmem:[#allocation11 + $0x8] sm:$0xff]   ;;  %s878_s12 = sshll.u32 %s1721_s16, 3  ;;  %v882_v36 = vld [vmem:[#allocation10] ss:$0 sm:$0xff]  ;;  %v888_v37 = vld [vmem:[#allocation13] ss:$0 sm:$0xff] }
  0xe0   : > { %924 = vmatpush3.bf16.msra.mxu1 %v1068_v15  ;;  %917 = vmatprep.subr.bf16.mxu0 %v1412_v16  ;;  %v880_v27 = vld [vmem:[#allocation5] ss:$0 sm:$0xff]  ;;  %v881_v31 = vld [vmem:[#allocation7] ss:$0 sm:$0xff]  ;;  %s907_s13 = sshll.u32 %s1391_s30, 7  ;;  %s426_s22 = scalar_lea.vmem [#allocation14], %s878_s12 }
  0xe1   : > { %925 = vmatprep.subr.bf16.mxu1 %v1412_v16  ;;  %919 = vmatprep.mubr.msk.bf16.mxu0 %vm1413_vm1, %v1412_v16  ;;  %s660_s24 = sshll.u32 %s426_s22, 4  ;;  %vm562_vm2 = vcmask 257024   ;;  %s433_s26 = scalar_lea.vmem [#allocation15], %s878_s12  ;;  %s1754_s24 = int_to_ptr.vmem [resolvable:$true] %s660_s24 }
  0xe2   : > { %927 = vmatprep.mubr.msk.bf16.mxu1 %vm1413_vm1, %v1412_v16  ;;  %s678_s18 = sshll.u32 %s433_s26, 4  ;;  %s1752_s19 = scalar_lea.hbm %s1851_s7, %s907_s13  ;;  %s1763_s18 = int_to_ptr.vmem [resolvable:$true] %s678_s18 }
  0xe3   : > { %447 = vadd.xlane.f32.xlu0 %v446_v3  ;;  %918 = vmatpush3.bf16.msra.mxu0 %v1069_v17  ;;  %s1877_s21 = sld [smem:[#allocation25_spill]]  ;;  %s640_s14 = scalar_lea.sflag [#allocation4], %s1721_s16 }
  0xe4   : > { %926 = vmatpush3.bf16.msra.mxu1 %v1070_v18  ;;  %s1273_s25 = scalar_lea.vmem %s1754_s24, 128  ;;  %p1878_p0 = scmp.ne.s32.totalorder %s1872_s8, 0 }
  0xe5   : > { %p1274_p11 = scmp.ne.s32.totalorder %s1754_s24, %s1273_s25  ;;  %s1414_s12 = smov [#allocation14]  }
  0xe6   : > { %s1277_s30 = sshll.u32 %s1414_s12, 4  ;;  %s1278_s30 = int_to_ptr.vmem [resolvable:$false] %s1277_s30 }
  0xe7   : > { %p1275_p5 = pnand %p1274_p11, %p1878_p0  ;;  %s1279_s11 = scalar_lea.vmem %s1278_s30, 256 }
  0xe8   : > { %p1280_p10 = scmp.lt.s32.totalorder %s1754_s24, %s1278_s30  ;;  %p1281_p13 = scmp.lt.s32.totalorder %s1279_s11, %s1273_s25 }
  0xe9   : > { %s1761_s15 = scalar_lea.hbm %s1877_s21, %s907_s13  ;;  %p1276_p1 = pneg %p1275_p5 }
  0xea   : > { %p1282_p2 = por %p1281_p13, %p1280_p10 }
  0xec   : > { %p1283_p8 = pnand %p1282_p2, %p1276_p1 }
 0x16c   : > { %v445_v4 = vpop.xlane.xlu0 %444 }
 0x16d   : > { %v450_v5 = vmul.f32 0.03125, %v445_v4 }
 0x16f   : > { %v452_v6 = vsub.f32 %v438_v0, %v450_v5 }
 0x170   : > { %v448_v7 = vpop.xlane.xlu0 %447 }
 0x171   : > { %v451_v8 = vmul.f32 0.03125, %v448_v7  ;;  %v454_v9 = vmul.f32 %v452_v6, %v452_v6 }
 0x173   : > { %v453_v10 = vsub.f32 %v439_v1, %v451_v8  ;;  %v456_v11 = vsel %vm442_vm0, %v454_v9, 0.0 }
 0x174   : > { %457 = vadd.xlane.f32.xlu1 %v456_v11 }
 0x175   : > { %v455_v12 = vmul.f32 %v453_v10, %v453_v10 }
 0x177   : > { %v459_v13 = vsel %vm442_vm0, %v455_v12, 0.0 }
 0x178   : > { %460 = vadd.xlane.f32.xlu1 %v459_v13 }
 0x201   : > { %v458_v19 = vpop.xlane.xlu1 %457 }
 0x202   : > { %v462_v20 = vmul.f32 0.03125, %v458_v19 }
 0x204   : > { %v464_v21 = vadd.f32 1e-05, %v462_v20 }
 0x205   : > { %v461_v22 = vpop.xlane.xlu1 %460 }
 0x206   : > { %1071 = vrsqrt.f32 %v464_v21  ;;  %v463_v23 = vmul.f32 0.03125, %v461_v22 }
 0x208   : > { %v465_v24 = vadd.f32 1e-05, %v463_v23 }
 0x20a   : > { %1073 = vrsqrt.f32 %v465_v24 }
 0x210   : > { %v1072_v25 = vpop.eup %1071 }
 0x211   : > { %v468_v26 = vmul.f32 %v1072_v25, %v452_v6 }
 0x213   : > { %v476_v30 = vmul.f32 %v880_v27, %v468_v26 }
 0x214   : > { %v1074_v28 = vpop.eup %1073 }
 0x215   : > { %v469_v29 = vmul.f32 %v1074_v28, %v453_v10  ;;  %v484_v33 = vadd.f32 %v881_v31, %v476_v30 }
 0x217   : > { %v477_v32 = vmul.f32 %v880_v27, %v469_v29 }
 0x219   : > { %v485_v34 = vadd.f32 %v881_v31, %v477_v32 }
 0x21b   : > { %v490_v35 = vpack.c.bf16 %v485_v34, %v484_v33 }
 0x21d   : > { %920 = vmatmul.mubr.msk.bf16.vlgmr.msra.gmra.mrb[0].mxu0 %vm442_vm0, %v490_v35  ;;  %928 = vmatmul.mubr.msk.bf16.vlgmr.msra.gmra.mrb[0].mxu1 %vm442_vm0, %v490_v35 }
 0x2f0   : > { %v547_v38 = vpop.f32.mrb[0].mxu0  ;;  %v622_v39 = vpop.f32.mrb[0].mxu1 }
 0x2f1   : > { %v548_v40 = vadd.f32 %v882_v36, %v547_v38  ;;  %v623_v41 = vadd.f32 %v888_v37, %v622_v39  ;;  %v921_v42 = vpop.f32.mrb[1].mxu0  ;;  %v929_v43 = vpop.f32.mrb[1].mxu1 }
 0x2f2   : > { %v550_v44 = vpop.f32.mrb[2].mxu0  ;;  %v625_v45 = vpop.f32.mrb[2].mxu1 }
 0x2f3   : > { %v903_v46 = vpack.c.bf16 %v548_v40, %v548_v40  ;;  %v905_v47 = vpack.c.bf16 %v623_v41, %v623_v41  ;;  %v551_v48 = vadd.f32 %v882_v36, %v550_v44  ;;  %v626_v49 = vadd.f32 %v888_v37, %v625_v45  ;;  %v922_v50 = vpop.f32.mrb[3].mxu0  ;;  %v930_v51 = vpop.f32.mrb[3].mxu1 }
 0x2f5   : > { %563 = vst.msk [vmem:[%s426_s22] sm:$0xf] %vm562_vm2, %v903_v46  ;;  %637 = vst.msk [vmem:[%s433_s26] sm:$0xf] %vm562_vm2, %v905_v47  ;;  %v904_v52 = vpack.c.bf16 %v551_v48, %v551_v48  ;;  %v906_v53 = vpack.c.bf16 %v626_v49, %v626_v49 }
 0x2f7   : > { %564 = vst.msk [vmem:[%s426_s22 + $0x4] sm:$0xf] %vm562_vm2, %v904_v52  ;;  %638 = vst.msk [vmem:[%s433_s26 + $0x4] sm:$0xf] %vm562_vm2, %v906_v53 }
 0x2f8   : > { %1286 = shalt.err (!%p1283_p8)
}
 0x2f9   : > { %s1287_s13 = scalar_lea.hbm %s1752_s19, 128  ;;  %s1291_s20 = scalar_lea.hbm %s1851_s7, 256 }
 0x2fa   : > { %p1288_p9 = scmp.ne.s32.totalorder %s1752_s19, %s1287_s13  ;;  %p1292_p3 = scmp.lt.u32.totalorder %s1752_s19, %s1851_s7 }
 0x2fb   : > { %p1293_p7 = scmp.lt.u32.totalorder %s1291_s20, %s1287_s13  ;;  %p1295_p11 = scmp.lt.u32.totalorder %s1287_s13, %s1752_s19 }
 0x2fc   : > { %p1289_p4 = pnand %p1288_p9, %p1878_p0 }
 0x2fd   : > { %p1294_p12 = por %p1293_p7, %p1292_p3 }
 0x2fe   : > { %p1290_p6 = pneg %p1289_p4 }
 0x2ff   : > { %p1296_p5 = por %p1295_p11, %p1294_p12 }
 0x301   : > { %p1297_p1 = pnand %p1296_p5, %p1290_p6 }
 0x303   : > { %1300 = shalt.err (!%p1297_p1)
}
 0x304   : > { %s1415_s25 = smov 64   ;;  %s1416_s30 = smov 4  }
 0x305   : > { %957 = dma.vmem_to_hbm [thread:$0]  (%p1878_p0), %s1754_s24, 128, %s1752_s19, %s640_s14, %s1415_s25, %s1415_s25, %s1416_s30  }
 0x306   : > { %s645_s11 = scalar_lea.sflag [#allocation16], %s1721_s16  ;;  %s1301_s13 = scalar_lea.vmem %s1763_s18, 128 }
 0x307   : > { %p1302_p10 = scmp.ne.s32.totalorder %s1763_s18, %s1301_s13  ;;  %s1417_s22 = smov [#allocation15]  }
 0x308   : > { %s1305_s26 = sshll.u32 %s1417_s22, 4  ;;  %s1306_s26 = int_to_ptr.vmem [resolvable:$false] %s1305_s26 }
 0x309   : > { %p1303_p13 = pnand %p1302_p10, %p1878_p0  ;;  %s1307_s20 = scalar_lea.vmem %s1306_s26, 256 }
 0x30a   : > { %p1308_p8 = scmp.lt.s32.totalorder %s1763_s18, %s1306_s26  ;;  %p1309_p9 = scmp.lt.s32.totalorder %s1307_s20, %s1301_s13 }
 0x30b   : > { %p1304_p2 = pneg %p1303_p13 }
 0x30c   : > { %p1310_p4 = por %p1309_p9, %p1308_p8 }
 0x30e   : > { %p1311_p6 = pnand %p1310_p4, %p1304_p2 }
 0x310   : > { %1314 = shalt.err (!%p1311_p6)
}
 0x311   : > { %s1315_s24 = scalar_lea.hbm %s1761_s15, 128  ;;  %s1319_s3 = scalar_lea.hbm %s1877_s21, 256 }
 0x312   : > { %p1316_p3 = scmp.ne.s32.totalorder %s1761_s15, %s1315_s24  ;;  %p1320_p11 = scmp.lt.u32.totalorder %s1761_s15, %s1877_s21 }
 0x313   : > { %p1321_p5 = scmp.lt.u32.totalorder %s1319_s3, %s1315_s24  ;;  %p1323_p10 = scmp.lt.u32.totalorder %s1315_s24, %s1761_s15 }
 0x314   : > { %p1317_p7 = pnand %p1316_p3, %p1878_p0 }
 0x315   : > { %p1322_p1 = por %p1321_p5, %p1320_p11 }
 0x316   : > { %p1318_p12 = pneg %p1317_p7 }
 0x317   : > { %p1324_p13 = por %p1323_p10, %p1322_p1 }
 0x319   : > { %p1325_p2 = pnand %p1324_p13, %p1318_p12 }
 0x31b   : > { %1328 = shalt.err (!%p1325_p2)
}
 0x31c   : > { %958 = dma.vmem_to_hbm [thread:$0]  (%p1878_p0), %s1763_s18, 128, %s1761_s15, %s645_s11, %s1415_s25, %s1415_s25, %s1416_s30  }
 0x31d PF: > { %s693_s13 = sand.u32 1, %s1379_s27   ;;  %p1879_p8 = scmp.ne.s32.totalorder %s1873_s1, 0 }
 0x31e   : > { %p1880_p9 = scmp.ge.s32.totalorder %s1399_s10, 2  ;;  %s694_s26 = scalar_lea.sflag [#allocation4], %s693_s13 }
 0x320   : > { %p985_p4 = pnand %p1880_p9, %p1879_p8 }
 0x322   : > { %1370 = dma.done.wait (!%p985_p4), %s694_s26, 128  }
 0x323   : > { %1372 = vsyncadd (!%p985_p4), %s694_s26, 4294967168  ;;  %s703_s8 = scalar_lea.sflag [#allocation16], %s693_s13 }
 0x324   : > { %1374 = dma.done.wait (!%p985_p4), %s703_s8, 128  }
 0x325   : > { %1376 = vsyncadd (!%p985_p4), %s703_s8, 4294967168  ;;  %s31_s10 = sadd.s32 1, %s1399_s10   ;;  %s1881_s27 = smov %s1383_s28 }
 0x326   : > { %p28_p6 = scmp.ge.s32.totalorder %s31_s10, 4   ;;  %s1882_s28 = smov %s1387_s29 }
 0x327   : > { %s1883_s29 = smov %s1668_s23  ;;  %s1884_s30 = smov %s1395_s9 }
 0x328   : > { %s1885_s9 = smov %s1887_s17  ;;  %30 = sbr.rel (!%p28_p6) target bundleno = 15 (0xf), region = 134 }
 0x32f   :  { %708 = vsyncpa [#allocation3], 1 }
 0x330   :  { %710 = vsyncpa [#allocation3 + $0x1], 1 }
 0x331   :  { %711 = vsyncpa [#allocation6], 1 }
 0x332   :  { %712 = vsyncpa [#allocation9], 1 }
 0x333   :  { %713 = vsyncpa [#allocation12], 1 }
 0x334   :  { %714 = vsyncpa [#allocation4], 1 }
 0x335   :  { %716 = vsyncpa [#allocation4 + $0x1], 1 }
 0x336   :  { %717 = vsyncpa [#allocation16], 1 }
 0x337   :  { %719 = vsyncpa [#allocation16 + $0x1], 1 }

// kernel: transformer_layer.5
= control target key start
LH: loop header
LB: loop body
LE: loop exit
PB: predicated region body
PF: predicated region fallthrough
CT: control target
= control target key end

     0   :  { %s1749_s0 = inlined_call_operand.hbm [shape: f32[2,16,32], index: 0, kind: input, shape index: {}]   ;;  %s1750_s1 = inlined_call_operand.hbm [shape: f32[1,32], index: 1, kind: input, shape index: {}]   ;;  %s1751_s2 = inlined_call_operand.hbm [shape: f32[1,32], index: 2, kind: input, shape index: {}]   ;;  %s1752_s3 = inlined_call_operand.hbm [shape: bf16[32,128], index: 3, kind: input, shape index: {}]   ;;  %s1753_s4 = inlined_call_operand.hbm [shape: f32[1,128], index: 4, kind: input, shape index: {}]   ;;  %s1754_s5 = inlined_call_operand.hbm [shape: bf16[128,32], index: 5, kind: input, shape index: {}]   ;;  %s1755_s6 = inlined_call_operand.hbm [shape: f32[1,32], index: 6, kind: input, shape index: {}]   ;;  %s1756_s7 = inlined_call_operand.hbm [shape: f32[2,16,32], index: 7, kind: output, shape index: {}]  }
   0x1   :  { %1762 = sst [smem:[#allocation20_spill]] %s1750_s1 }
   0x2   :  { %1763 = sst [smem:[#allocation21_spill]] %s1752_s3 }
   0x3   :  { %12 = vsyncpa [#allocation3], 0 }
   0x4   :  { %14 = vsyncpa [#allocation3 + $0x1], 0 }
   0x5   :  { %15 = vsyncpa [#allocation6], 0 }
   0x6   :  { %16 = vsyncpa [#allocation9], 0 }
   0x7   :  { %17 = vsyncpa [#allocation12], 0 }
   0x8   :  { %18 = vsyncpa [#allocation4], 0 }
   0x9   :  { %20 = vsyncpa [#allocation4 + $0x1], 0  ;;  %s1395_s24 = smov 0   ;;  %s1397_s25 = smov 0  }
   0xa   :  { %s1399_s26 = smov 0   ;;  %s1401_s27 = smov 0  }
   0xb   :  { %s1403_s28 = smov 0   ;;  %s1405_s29 = smov 0  }
   0xc LB: > { %s1760_s30 = sadd.s32 4294967295, %s1337_s29   ;;  %p808_p0 = scmp.ge.s32.totalorder %s1337_s29, 1  ;;  %s1337_s29 = sphi %s1405_s29, %s26_s29   ;;  %s1333_s28 = sphi %s1403_s28, %s1786_s28   ;;  %s1329_s27 = sphi %s1401_s27, %s1785_s27   ;;  %s1325_s26 = sphi %s1399_s26, %s1784_s26   ;;  %s1321_s25 = sphi %s1397_s25, %s1783_s25   ;;  %s1317_s24 = sphi %s1395_s24, %s1782_s24  }
   0xd   : > { %p1429_p1 = scmp.eq.s32.totalorder %s1760_s30, 0  ;;  %p225_p2 = scmp.lt.s32.totalorder %s1337_s29, 3 }
   0xe   : > { %s1339_s10 = smov [#allocation5]   ;;  %s1340_s12 = smov [#allocation8]  }
   0xf   : > { %s1764_s8 = scalar_select %p1429_p1, 1, 0 }
  0x10   : > { %p1434_p3 = pnand %p808_p0, %p225_p2  ;;  %s238_s11 = sshll.u32 %s1339_s10, 4  ;;  %s239_s11 = int_to_ptr.vmem [resolvable:$true] %s238_s11 }
  0x11   : > { %s259_s13 = sshll.u32 %s1340_s12, 4  ;;  %s1341_s15 = smov [#allocation11]   ;;  %s1447_s13 = int_to_ptr.vmem [resolvable:$true] %s259_s13 }
  0x12   : > { %s1765_s9 = scalar_select %p1434_p3, 1, 0 }
  0x13   : > { %p920_p5 = pneg %p1434_p3  ;;  %s1449_s16 = sshll.u32 %s1341_s15, 4  ;;  %s284_s16 = int_to_ptr.vmem [resolvable:$true] %s1449_s16 }
  0x14   : > { %s1767_s1 = sld [smem:[#allocation20_spill]] }
  0x15   : > { %p1443_p6 = pnand %p920_p5, %p1429_p1 }
  0x17   : > { %p1459_p8 = pneg %p1443_p6 }
  0x1a   : > { %s1045_s19 = scalar_lea.hbm %s1767_s1, 16 }
  0x1b   : > { %p1046_p7 = scmp.ne.s32.totalorder %s1767_s1, %s1045_s19  ;;  %p1052_p11 = scmp.lt.u32.totalorder %s1045_s19, %s1767_s1 }
  0x1d   : > { %p1048_p9 = pnand %p1459_p8, %p1046_p7 }
  0x1f   : > { %p1049_p10 = pneg %p1048_p9 }
  0x21   : > { %p1054_p12 = pnand %p1052_p11, %p1049_p10 }
  0x23   : > { %1057 = shalt.err (!%p1054_p12)
}
  0x24   : > { %s1058_s12 = scalar_lea.vmem %s239_s11, 16  ;;  %s1065_s15 = scalar_lea.vmem %s239_s11, 32 }
  0x25   : > { %p1059_p13 = scmp.ne.s32.totalorder %s239_s11, %s1058_s12  ;;  %p1066_p5 = scmp.lt.s32.totalorder %s239_s11, %s239_s11 }
  0x26   : > { %p1067_p4 = scmp.lt.s32.totalorder %s1065_s15, %s1058_s12 }
  0x27   : > { %p1061_p0 = pnand %p1059_p13, %p1459_p8 }
  0x28   : > { %p1068_p3 = por %p1067_p4, %p1066_p5 }
  0x29   : > { %p1062_p2 = pneg %p1061_p0 }
  0x2b   : > { %p1069_p1 = pnand %p1068_p3, %p1062_p2 }
  0x2d   : > { %1072 = shalt.err (!%p1069_p1)
}
  0x2e   : > { %923 = dma.hbm_to_vmem [thread:$0]  (!%p1443_p6), %s1767_s1, 16, %s239_s11, [#allocation6]  }
  0x2f   : > { %s1769_s3 = sld [smem:[#allocation21_spill]] }
  0x35   : > { %s1073_s21 = scalar_lea.hbm %s1769_s3, 256 }
  0x36   : > { %p1074_p7 = scmp.ne.s32.totalorder %s1769_s3, %s1073_s21  ;;  %p1080_p1 = scmp.lt.u32.totalorder %s1073_s21, %s1769_s3 }
  0x38   : > { %p1076_p9 = pnand %p1074_p7, %p1459_p8 }
  0x3a   : > { %p1077_p4 = pneg %p1076_p9 }
  0x3c   : > { %p1082_p3 = pnand %p1080_p1, %p1077_p4 }
  0x3e   : > { %1085 = shalt.err (!%p1082_p3)
}
  0x3f   : > { %s1086_s11 = scalar_lea.vmem %s1447_s13, 256  ;;  %p1094_p13 = scmp.lt.s32.totalorder %s1447_s13, %s1447_s13 }
  0x40   : > { %p1087_p10 = scmp.ne.s32.totalorder %s1447_s13, %s1086_s11  ;;  %p1095_p0 = scmp.lt.s32.totalorder %s1086_s11, %s1086_s11 }
  0x42   : > { %p1089_p11 = pnand %p1087_p10, %p1459_p8  ;;  %p1096_p2 = por %p1095_p0, %p1094_p13 }
  0x44   : > { %p1090_p12 = pneg %p1089_p11 }
  0x46   : > { %p1097_p5 = pnand %p1096_p2, %p1090_p12 }
  0x48   : > { %1100 = shalt.err (!%p1097_p5)
}
  0x49   : > { %s1342_s17 = smov 64   ;;  %s1343_s18 = smov 4  }
  0x4a   : > { %929 = dma.hbm_to_vmem [thread:$0]  (!%p1443_p6), %s1769_s3, 256, %s1447_s13, [#allocation9], %s1342_s17, %s1342_s17, %s1343_s18  }
  0x4b   : > { %s1101_s10 = scalar_lea.hbm %s1754_s5, 1024 }
  0x4c   : > { %p1102_p7 = scmp.ne.s32.totalorder %s1754_s5, %s1101_s10  ;;  %p1108_p1 = scmp.lt.u32.totalorder %s1101_s10, %s1754_s5 }
  0x4e   : > { %p1104_p9 = pnand %p1102_p7, %p1459_p8 }
  0x50   : > { %p1105_p4 = pneg %p1104_p9 }
  0x52   : > { %p1110_p3 = pnand %p1108_p1, %p1105_p4 }
  0x54   : > { %1113 = shalt.err (!%p1110_p3)
}
  0x55   : > { %s1114_s19 = scalar_lea.vmem %s284_s16, 1024  ;;  %p1122_p13 = scmp.lt.s32.totalorder %s284_s16, %s284_s16 }
  0x56   : > { %p1115_p10 = scmp.ne.s32.totalorder %s284_s16, %s1114_s19  ;;  %p1123_p0 = scmp.lt.s32.totalorder %s1114_s19, %s1114_s19 }
  0x58   : > { %p1117_p11 = pnand %p1115_p10, %p1459_p8  ;;  %p1124_p2 = por %p1123_p0, %p1122_p13 }
  0x5a   : > { %p1118_p12 = pneg %p1117_p11 }
  0x5c   : > { %p1125_p5 = pnand %p1124_p2, %p1118_p12 }
  0x5e   : > { %1128 = shalt.err (!%p1125_p5)
}
  0x5f   : > { %935 = dma.hbm_to_vmem [thread:$0]  (!%p1443_p6), %s1754_s5, 1024, %s284_s16, [#allocation12], %s1342_s17, %s1342_s17, %s1343_s18  }
  0x60   : > { %s1344_s30 = smov [#allocation7]   ;;  %s1345_s23 = smov [#allocation10]  }
  0x61   : > { %s249_s21 = sshll.u32 %s1344_s30, 4  ;;  %s273_s10 = sshll.u32 %s1345_s23, 4  ;;  %s250_s21 = int_to_ptr.vmem [resolvable:$true] %s249_s21  ;;  %s274_s10 = int_to_ptr.vmem [resolvable:$true] %s273_s10 }
  0x62   : > { %s1129_s11 = scalar_lea.hbm %s1751_s2, 16 }
  0x63   : > { %p1130_p7 = scmp.ne.s32.totalorder %s1751_s2, %s1129_s11  ;;  %p1136_p1 = scmp.lt.u32.totalorder %s1129_s11, %s1751_s2 }
  0x65   : > { %p1132_p9 = pnand %p1130_p7, %p1459_p8 }
  0x67   : > { %p1133_p4 = pneg %p1132_p9 }
  0x69   : > { %p1138_p3 = pnand %p1136_p1, %p1133_p4 }
  0x6b   : > { %1141 = shalt.err (!%p1138_p3)
}
  0x6c   : > { %s1142_s16 = scalar_lea.vmem %s250_s21, 16  ;;  %s1149_s17 = scalar_lea.vmem %s250_s21, 32 }
  0x6d   : > { %p1143_p10 = scmp.ne.s32.totalorder %s250_s21, %s1142_s16  ;;  %p1150_p13 = scmp.lt.s32.totalorder %s250_s21, %s250_s21 }
  0x6e   : > { %p1151_p0 = scmp.lt.s32.totalorder %s1149_s17, %s1142_s16 }
  0x6f   : > { %p1145_p11 = pnand %p1143_p10, %p1459_p8 }
  0x70   : > { %p1152_p2 = por %p1151_p0, %p1150_p13 }
  0x71   : > { %p1146_p12 = pneg %p1145_p11 }
  0x73   : > { %p1153_p5 = pnand %p1152_p2, %p1146_p12 }
  0x75   : > { %1156 = shalt.err (!%p1153_p5)
}
  0x76   : > { %926 = dma.hbm_to_vmem [thread:$0]  (!%p1443_p6), %s1751_s2, 16, %s250_s21, [#allocation6]  }
  0x77   : > { %s1157_s30 = scalar_lea.hbm %s1753_s4, 16 }
  0x78   : > { %p1158_p7 = scmp.ne.s32.totalorder %s1753_s4, %s1157_s30  ;;  %p1164_p1 = scmp.lt.u32.totalorder %s1157_s30, %s1753_s4 }
  0x7a   : > { %p1160_p9 = pnand %p1158_p7, %p1459_p8 }
  0x7c   : > { %p1161_p4 = pneg %p1160_p9 }
  0x7e   : > { %p1166_p3 = pnand %p1164_p1, %p1161_p4 }
  0x80   : > { %1169 = shalt.err (!%p1166_p3)
}
  0x81   : > { %s1170_s19 = scalar_lea.vmem %s274_s10, 16  ;;  %s1177_s21 = scalar_lea.vmem %s274_s10, 32 }
  0x82   : > { %p1171_p10 = scmp.ne.s32.totalorder %s274_s10, %s1170_s19  ;;  %p1178_p13 = scmp.lt.s32.totalorder %s274_s10, %s274_s10 }
  0x83   : > { %p1179_p0 = scmp.lt.s32.totalorder %s1177_s21, %s1170_s19 }
  0x84   : > { %p1173_p11 = pnand %p1171_p10, %p1459_p8 }
  0x85   : > { %p1180_p2 = por %p1179_p0, %p1178_p13 }
  0x86   : > { %p1174_p12 = pneg %p1173_p11 }
  0x88   : > { %p1181_p5 = pnand %p1180_p2, %p1174_p12 }
  0x8a   : > { %1184 = shalt.err (!%p1181_p5)
}
  0x8b   : > { %932 = dma.hbm_to_vmem [thread:$0]  (!%p1443_p6), %s1753_s4, 16, %s274_s10, [#allocation9]  }
  0x8c   : > { %s1346_s17 = smov [#allocation13]   ;;  %s1185_s20 = scalar_lea.hbm %s1755_s6, 16 }
  0x8d   : > { %s297_s1 = sshll.u32 %s1346_s17, 4  ;;  %p1186_p7 = scmp.ne.s32.totalorder %s1755_s6, %s1185_s20  ;;  %s298_s1 = int_to_ptr.vmem [resolvable:$true] %s297_s1 }
  0x8e   : > { %p1192_p1 = scmp.lt.u32.totalorder %s1185_s20, %s1755_s6 }
  0x8f   : > { %p1188_p9 = pnand %p1186_p7, %p1459_p8 }
  0x91   : > { %p1189_p4 = pneg %p1188_p9 }
  0x93   : > { %p1194_p3 = pnand %p1192_p1, %p1189_p4 }
  0x95   : > { %1197 = shalt.err (!%p1194_p3)
}
  0x96   : > { %s1198_s10 = scalar_lea.vmem %s298_s1, 16  ;;  %s1205_s11 = scalar_lea.vmem %s298_s1, 32 }
  0x97   : > { %p1199_p10 = scmp.ne.s32.totalorder %s298_s1, %s1198_s10  ;;  %p1206_p13 = scmp.lt.s32.totalorder %s298_s1, %s298_s1 }
  0x98   : > { %p1207_p0 = scmp.lt.s32.totalorder %s1205_s11, %s1198_s10 }
  0x99   : > { %p1201_p11 = pnand %p1199_p10, %p1459_p8 }
  0x9a   : > { %p1208_p2 = por %p1207_p0, %p1206_p13 }
  0x9b   : > { %p1202_p12 = pneg %p1201_p11 }
  0x9d   : > { %p1209_p5 = pnand %p1208_p2, %p1202_p12 }
  0x9f   : > { %1212 = shalt.err (!%p1209_p5)
}
  0xa0   : > { %938 = dma.hbm_to_vmem [thread:$0]  (!%p1443_p6), %s1755_s6, 16, %s298_s1, [#allocation12]  }
  0xa1   : > { %s807_s22 = sadd.s32 4294967294, %s1337_s29   ;;  %s38_s13 = sadd.s32 1, %s1333_s28 }
  0xa2   : > { %p40_p8 = scmp.ge.s32.totalorder %s38_s13, 2  ;;  %s47_s14 = sadd.s32 1, %s1325_s26 }
  0xa3   : > { %p54_p7 = scmp.ne.s32.totalorder %s1325_s26, %s1321_s25  ;;  %p55_p9 = scmp.eq.s32.totalorder %s1337_s29, 0 }
  0xa4   : > { %s1788_s13 = smov (%p40_p8, %s38_s13), 0  ;;  %p60_p1 = scmp.ne.s32.totalorder %s1321_s25, %s1317_s24 }
  0xa5   : > { %p1579_p4 = por %p55_p9, %p54_p7  ;;  %s42_s17 = ssub.s32 %s1333_s28, %s1788_s13 }
  0xa6   : > { %s1771_s1 = sadd.s32 4294967295, %s1337_s29   ;;  %p45_p3 = scmp.eq.s32.totalorder %s42_s17, 0 }
  0xa7   : > { %p212_p6 = scmp.eq.s32.totalorder %s1771_s1, 1  ;;  %p1772_p10 = scmp.ne.s32.totalorder %s1764_s8, 0 }
  0xa8   : > { %p218_p13 = scmp.eq.s32.totalorder %s807_s22, 1  ;;  %p953_p2 = scmp.lt.s32.totalorder %s1337_s29, 2 }
  0xa9   : > { %p1591_p11 = por %p1772_p10, %p60_p1  ;;  %p1595_p12 = por %p212_p6, %p54_p7 }
  0xaa   : > { %s1600_s20 = scalar_select %p45_p3, %s1325_s26, %s47_s14  }
  0xab   : > { %s1774_s3 = scalar_select %p1595_p12, 1, 0 }
  0xac   : > { %p1602_p0 = por %p218_p13, %p60_p1  ;;  %s308_s23 = sand.u32 1, %s1325_s26  }
  0xad   : > { %s850_s12 = sshll.u32 %s1333_s28, 8  ;;  %s816_s15 = sshll.u32 %s308_s23, 4 }
  0xae   : > { %s1775_s30 = scalar_select %p1602_p0, 1, 0 }
  0xaf   : > { %s1612_s19 = scalar_lea.hbm %s1749_s0, %s850_s12  ;;  %s312_s21 = scalar_lea.vmem [#allocation2], %s816_s15 }
  0xb0   : > { %s321_s22 = sshll.u32 %s312_s21, 4  ;;  %p1616_p5 = pnand %p953_p2, %p1579_p4  ;;  %s1620_s22 = int_to_ptr.vmem [resolvable:$true] %s321_s22 }
  0xb1   : > { %s1622_s17 = scalar_lea.sflag [#allocation3], %s308_s23  ;;  %s1213_s1 = scalar_lea.hbm %s1612_s19, 256 }
  0xb2   : > { %p1214_p8 = scmp.ne.s32.totalorder %s1612_s19, %s1213_s1  ;;  %p1215_p7 = pneg %p1616_p5 }
  0xb3   : > { %s1218_s15 = scalar_lea.hbm %s1749_s0, 512  ;;  %p1219_p4 = scmp.lt.u32.totalorder %s1612_s19, %s1749_s0 }
  0xb4   : > { %p1216_p9 = pnand %p1215_p7, %p1214_p8  ;;  %p1220_p6 = scmp.lt.u32.totalorder %s1218_s15, %s1213_s1 }
  0xb5   : > { %p1222_p10 = scmp.lt.u32.totalorder %s1213_s1, %s1612_s19 }
  0xb6   : > { %p1217_p1 = pneg %p1216_p9  ;;  %p1221_p3 = por %p1220_p6, %p1219_p4 }
  0xb8   : > { %p1223_p13 = por %p1222_p10, %p1221_p3 }
  0xba   : > { %p1224_p2 = pnand %p1223_p13, %p1217_p1 }
  0xbc   : > { %1227 = shalt.err (!%p1224_p2)
}
  0xbd   : > { %s1228_s23 = scalar_lea.vmem %s1620_s22, 256  ;;  %s1347_s21 = smov [#allocation2]  }
  0xbe   : > { %p1229_p8 = scmp.ne.s32.totalorder %s1620_s22, %s1228_s23  ;;  %s1233_s12 = sshll.u32 %s1347_s21, 4  ;;  %s1234_s12 = int_to_ptr.vmem [resolvable:$false] %s1233_s12 }
  0xbf   : > { %s1235_s16 = scalar_lea.vmem %s1234_s12, 512  ;;  %p1236_p12 = scmp.lt.s32.totalorder %s1620_s22, %s1234_s12 }
  0xc0   : > { %p1231_p9 = pnand %p1229_p8, %p1215_p7  ;;  %p1237_p4 = scmp.lt.s32.totalorder %s1235_s16, %s1228_s23 }
  0xc2   : > { %p1232_p0 = pneg %p1231_p9  ;;  %p1238_p6 = por %p1237_p4, %p1236_p12 }
  0xc4   : > { %p1239_p3 = pnand %p1238_p6, %p1232_p0 }
  0xc6   : > { %1242 = shalt.err (!%p1239_p3)
}
  0xc7   : > { %s1348_s1 = smov 128   ;;  %s1349_s15 = smov 8  }
  0xc8   : > { %942 = dma.hbm_to_vmem [thread:$0]  (!%p1616_p5), %s1612_s19, 256, %s1620_s22, %s1622_s17, %s1348_s1, %s1348_s1, %s1349_s15  }
  0xc9   : > { %p1777_p7 = scmp.ne.s32.totalorder %s1765_s9, 0 }
  0xca   : > { %s1653_s10 = sand.u32 (!%p1777_p7), 1, %s1321_s25  }
  0xcb   : > { %333 = sbr.rel (%p1777_p7) target bundleno = 1019 (0x3fb), region = 48  ;;  %s820_s11 = sshll.u32 (!%p1777_p7), %s1653_s10, 4 }
  0xcc   : > { %s336_s23 = scalar_lea.sflag (!%p1777_p7), [#allocation3], %s1653_s10  ;;  %s339_s21 = scalar_lea.vmem (!%p1777_p7), [#allocation2], %s820_s11 }
  0xd2   : > { %1296 = dma.done.wait (%p1591_p11), %s336_s23, 256  }
  0xd3   : > { %1298 = vsyncadd (%p1591_p11), %s336_s23, 4294967040  ;;  %p1778_p12 = scmp.ne.s32.totalorder %s1764_s8, 0 }
  0xd5   : > { %1300 = dma.done.wait (%p1778_p12), [#allocation6], 32  }
  0xd6   : > { %1302 = vsyncadd (%p1778_p12), [#allocation6], 4294967264 }
  0xd7   : > { %1304 = dma.done.wait (%p1778_p12), [#allocation9], 272  }
  0xd8   : > { %1306 = vsyncadd (%p1778_p12), [#allocation9], 4294967024 }
  0xd9   : > { %1308 = dma.done.wait (%p1778_p12), [#allocation12], 1040  }
  0xda   : > { %1310 = vsyncadd (%p1778_p12), [#allocation12], 4294966256  ;;  %vm423_vm0 = vcmask 261120   ;;  %v1675_v0 = vld [vmem:[%s339_s21] sm:$0xff]  ;;  %v1677_v1 = vld [vmem:[%s339_s21 + $0x8] sm:$0xff]  ;;  %v1350_v15 = vmov 0.0  }
  0xdb   : > { %v424_v2 = vsel %vm423_vm0, %v1675_v0, 0.0  ;;  %v427_v3 = vsel %vm423_vm0, %v1677_v1, 0.0  ;;  %v1023_v14 = vld [vmem:[#allocation8] sm:$0xff]   ;;  %864 = vmatprep.subr.bf16.mxu0 %v1350_v15  ;;  %872 = vmatprep.subr.bf16.mxu1 %v1350_v15  ;;  %v1024_v16 = vld [vmem:[#allocation8 + $0x8] sm:$0xff]   ;;  %vm1351_vm1 = vmmov 0   ;;  %v1025_v34 = vld [vmem:[#allocation11] sm:$0xff]  }
  0xdc   : > { %425 = vadd.xlane.f32.xlu0 %v424_v2  ;;  %865 = vmatpush3.bf16.msra.mxu0 %v1023_v14  ;;  %v828_v25 = vld [vmem:[#allocation5] ss:$0 sm:$0xff]  ;;  %v829_v29 = vld [vmem:[#allocation7] ss:$0 sm:$0xff]  ;;  %v1027_v36 = vld [vmem:[#allocation11 + $0x10] sm:$0xff]   ;;  %s851_s8 = sshll.u32 %s1329_s27, 8 }
  0xdd   : > { %868 = vmatprep.mubr.msk.bf16.mxu0 %vm1351_vm1, %v1350_v15  ;;  %866 = vmatprep.subr.bf16.mxu0 %v1350_v15  ;;  %v1026_v35 = vld [vmem:[#allocation11 + $0x8] sm:$0xff]   ;;  %v1028_v37 = vld [vmem:[#allocation11 + $0x18] sm:$0xff]   ;;  %v1029_v38 = vld [vmem:[#allocation11 + $0x20] sm:$0xff]   ;;  %s393_s9 = scalar_lea.vmem [#allocation14], %s820_s11  ;;  %s1695_s14 = scalar_lea.hbm %s1756_s7, %s851_s8 }
  0xde   : > { %888 = vmatprep.mubr.msk.bf16.mxu1 %vm1351_vm1, %v1350_v15  ;;  %873 = vmatpush3.bf16.msra.mxu1 %v1025_v34  ;;  %v1030_v39 = vld [vmem:[#allocation11 + $0x28] sm:$0xff]   ;;  %v1031_v40 = vld [vmem:[#allocation11 + $0x30] sm:$0xff]   ;;  %v1032_v41 = vld [vmem:[#allocation11 + $0x38] sm:$0xff]   ;;  %s662_s18 = sshll.u32 %s393_s9, 4  ;;  %s647_s27 = scalar_lea.sflag [#allocation4], %s1653_s10  ;;  %s1697_s18 = int_to_ptr.vmem [resolvable:$true] %s662_s18 }
  0xdf   : > { %874 = vmatprep.subr.bf16.mxu1 %v1350_v15  ;;  %v830_v42 = vld [vmem:[#allocation10] ss:$0 sm:$0xff]  ;;  %v836_v60 = vld [vmem:[#allocation13] ss:$0 sm:$0xff]  ;;  %s1243_s17 = scalar_lea.vmem %s1697_s18, 256  ;;  %p1779_p0 = scmp.ne.s32.totalorder %s1774_s3, 0 }
  0xe0   : > { %428 = vadd.xlane.f32.xlu0 %v427_v3  ;;  %867 = vmatpush3.bf16.msra.mxu0 %v1024_v16  ;;  %p1244_p11 = scmp.ne.s32.totalorder %s1697_s18, %s1243_s17  ;;  %s1352_s12 = smov [#allocation14]  }
  0xe1   : > { %s1247_s16 = sshll.u32 %s1352_s12, 4  ;;  %s1248_s16 = int_to_ptr.vmem [resolvable:$false] %s1247_s16 }
  0xe2   : > { %875 = vmatpush3.bf16.msra.mxu1 %v1026_v35  ;;  %p1245_p5 = pnand %p1244_p11, %p1779_p0  ;;  %s1249_s1 = scalar_lea.vmem %s1248_s16, 512 }
  0xe3   : > { %876 = vmatprep.subr.bf16.mxu1 %v1350_v15  ;;  %p1250_p10 = scmp.lt.s32.totalorder %s1697_s18, %s1248_s16  ;;  %p1251_p13 = scmp.lt.s32.totalorder %s1249_s1, %s1243_s17 }
  0xe4   : > { %p1246_p1 = pneg %p1245_p5 }
  0xe5   : > { %p1252_p2 = por %p1251_p13, %p1250_p10 }
  0xe6   : > { %877 = vmatpush3.bf16.msra.mxu1 %v1027_v36 }
  0xe7   : > { %878 = vmatprep.subr.bf16.mxu1 %v1350_v15  ;;  %p1253_p8 = pnand %p1252_p2, %p1246_p1 }
  0xea   : > { %879 = vmatpush3.bf16.msra.mxu1 %v1028_v37 }
  0xeb   : > { %880 = vmatprep.subr.bf16.mxu1 %v1350_v15 }
  0xee   : > { %881 = vmatpush3.bf16.msra.mxu1 %v1029_v38 }
  0xef   : > { %882 = vmatprep.subr.bf16.mxu1 %v1350_v15 }
  0xf2   : > { %883 = vmatpush3.bf16.msra.mxu1 %v1030_v39 }
  0xf3   : > { %884 = vmatprep.subr.bf16.mxu1 %v1350_v15 }
  0xf6   : > { %885 = vmatpush3.bf16.msra.mxu1 %v1031_v40 }
  0xf7   : > { %886 = vmatprep.subr.bf16.mxu1 %v1350_v15 }
  0xfa   : > { %887 = vmatpush3.bf16.msra.mxu1 %v1032_v41 }
 0x169   : > { %v426_v4 = vpop.xlane.xlu0 %425 }
 0x16a   : > { %v431_v5 = vmul.f32 0.03125, %v426_v4 }
 0x16c   : > { %v433_v6 = vsub.f32 %v1675_v0, %v431_v5 }
 0x16d   : > { %v429_v7 = vpop.xlane.xlu0 %428 }
 0x16e   : > { %v432_v8 = vmul.f32 0.03125, %v429_v7  ;;  %v435_v9 = vmul.f32 %v433_v6, %v433_v6 }
 0x170   : > { %v434_v10 = vsub.f32 %v1677_v1, %v432_v8  ;;  %v437_v11 = vsel %vm423_vm0, %v435_v9, 0.0 }
 0x171   : > { %438 = vadd.xlane.f32.xlu1 %v437_v11 }
 0x172   : > { %v436_v12 = vmul.f32 %v434_v10, %v434_v10 }
 0x174   : > { %v440_v13 = vsel %vm423_vm0, %v436_v12, 0.0 }
 0x175   : > { %441 = vadd.xlane.f32.xlu1 %v440_v13 }
 0x1fe   : > { %v439_v17 = vpop.xlane.xlu1 %438 }
 0x1ff   : > { %v443_v18 = vmul.f32 0.03125, %v439_v17 }
 0x201   : > { %v445_v19 = vadd.f32 1e-05, %v443_v18 }
 0x202   : > { %v442_v20 = vpop.xlane.xlu1 %441 }
 0x203   : > { %1033 = vrsqrt.f32 %v445_v19  ;;  %v444_v21 = vmul.f32 0.03125, %v442_v20 }
 0x205   : > { %v446_v22 = vadd.f32 1e-05, %v444_v21 }
 0x207   : > { %1035 = vrsqrt.f32 %v446_v22 }
 0x20d   : > { %v1034_v23 = vpop.eup %1033 }
 0x20e   : > { %v449_v24 = vmul.f32 %v1034_v23, %v433_v6 }
 0x210   : > { %v457_v28 = vmul.f32 %v828_v25, %v449_v24 }
 0x211   : > { %v1036_v26 = vpop.eup %1035 }
 0x212   : > { %v450_v27 = vmul.f32 %v1036_v26, %v434_v10  ;;  %v465_v31 = vadd.f32 %v829_v29, %v457_v28 }
 0x214   : > { %v458_v30 = vmul.f32 %v828_v25, %v450_v27 }
 0x216   : > { %v466_v32 = vadd.f32 %v829_v29, %v458_v30 }
 0x218   : > { %v467_v33 = vpack.c.bf16 %v466_v32, %v465_v31 }
 0x21a   : > { %869 = vmatmul.mubr.msk.bf16.vlgmr.msra.gmra.mrb[0].mxu0 %vm423_vm0, %v467_v33 }
 0x2ed   : > { %v523_v43 = vpop.f32.mrb[0].mxu0 }
 0x2ee   : > { %v524_v44 = vadd.f32 %v830_v42, %v523_v43  ;;  %v870_v45 = vpop.f32.mrb[1].mxu0 }
 0x2ef   : > { %v526_v46 = vpop.f32.mrb[2].mxu0 }
 0x2f0   : > { %v834_v47 = vmul.f32 -1.442695, %v524_v44  ;;  %v527_v48 = vadd.f32 %v830_v42, %v526_v46  ;;  %v871_v49 = vpop.f32.mrb[3].mxu0 }
 0x2f2   : > { %1037 = vpow2.f32 %v834_v47  ;;  %v835_v50 = vmul.f32 -1.442695, %v527_v48 }
 0x2f4   : > { %1039 = vpow2.f32 %v835_v50 }
 0x2fc   : > { %v1038_v51 = vpop.eup %1037 }
 0x2fd   : > { %v536_v52 = vadd.f32 1.0, %v1038_v51 }
 0x2fe   : > { %v1040_v53 = vpop.eup %1039 }
 0x2ff   : > { %1041 = vrcp.f32 %v536_v52  ;;  %v537_v54 = vadd.f32 1.0, %v1040_v53 }
 0x301   : > { %1043 = vrcp.f32 %v537_v54 }
 0x309   : > { %v1042_v55 = vpop.eup %1041 }
 0x30a   : > { %v542_v57 = vmul.f32 %v1042_v55, %v524_v44 }
 0x30b   : > { %v1044_v56 = vpop.eup %1043 }
 0x30c   : > { %v543_v58 = vmul.f32 %v1044_v56, %v527_v48 }
 0x30e   : > { %v544_v59 = vpack.c.bf16 %v543_v58, %v542_v57 }
 0x310   : > { %889 = vmatmul.mubr.bf16.vlgmr.msra.gmra.mrb[0].mxu1 %v544_v59 }
 0x3e3   : > { %v633_v61 = vpop.f32.mrb[0].mxu1 }
 0x3e4   : > { %v634_v62 = vadd.f32 %v836_v60, %v633_v61  ;;  %v890_v63 = vpop.f32.mrb[1].mxu1 }
 0x3e5   : > { %v636_v2 = vpop.f32.mrb[2].mxu1 }
 0x3e6   : > { %v640_v3 = vmul.f32 0.5, %v634_v62  ;;  %v637_v4 = vadd.f32 %v836_v60, %v636_v2  ;;  %v891_v5 = vpop.f32.mrb[3].mxu1 }
 0x3e8   : > { %v642_v6 = vadd.f32 %v640_v3, %v1675_v0  ;;  %v641_v7 = vmul.f32 0.5, %v637_v4 }
 0x3ea   : > { %644 = vst.msk [vmem:[%s393_s9] sm:$0xff] %vm423_vm0, %v642_v6  ;;  %v643_v8 = vadd.f32 %v641_v7, %v1677_v1 }
 0x3ec   : > { %645 = vst.msk [vmem:[%s393_s9 + $0x8] sm:$0xff] %vm423_vm0, %v643_v8 }
 0x3ed   : > { %1256 = shalt.err (!%p1253_p8)
}
 0x3ee   : > { %s1257_s15 = scalar_lea.hbm %s1695_s14, 256  ;;  %s1261_s21 = scalar_lea.hbm %s1756_s7, 512 }
 0x3ef   : > { %p1258_p9 = scmp.ne.s32.totalorder %s1695_s14, %s1257_s15  ;;  %p1262_p3 = scmp.lt.u32.totalorder %s1695_s14, %s1756_s7 }
 0x3f0   : > { %p1263_p7 = scmp.lt.u32.totalorder %s1261_s21, %s1257_s15  ;;  %p1265_p11 = scmp.lt.u32.totalorder %s1257_s15, %s1695_s14 }
 0x3f1   : > { %p1259_p4 = pnand %p1258_p9, %p1779_p0 }
 0x3f2   : > { %p1264_p12 = por %p1263_p7, %p1262_p3 }
 0x3f3   : > { %p1260_p6 = pneg %p1259_p4 }
 0x3f4   : > { %p1266_p5 = por %p1265_p11, %p1264_p12 }
 0x3f6   : > { %p1267_p1 = pnand %p1266_p5, %p1260_p6 }
 0x3f8   : > { %1270 = shalt.err (!%p1267_p1)
}
 0x3f9   : > { %s1353_s19 = smov 128   ;;  %s1354_s22 = smov 8  }
 0x3fa   : > { %918 = dma.vmem_to_hbm [thread:$0]  (%p1779_p0), %s1697_s18, 256, %s1695_s14, %s647_s27, %s1353_s19, %s1353_s19, %s1354_s22  }
 0x3fb PF: > { %s677_s17 = sand.u32 1, %s1317_s24   ;;  %p1780_p10 = scmp.ne.s32.totalorder %s1775_s30, 0 }
 0x3fc   : > { %p1781_p13 = scmp.ge.s32.totalorder %s1337_s29, 2  ;;  %s678_s12 = scalar_lea.sflag [#allocation4], %s677_s17 }
 0x3fe   : > { %p944_p2 = pnand %p1781_p13, %p1780_p10 }
 0x400   : > { %1312 = dma.done.wait (!%p944_p2), %s678_s12, 256  }
 0x401   : > { %1314 = vsyncadd (!%p944_p2), %s678_s12, 4294967040  ;;  %s26_s29 = sadd.s32 1, %s1337_s29   ;;  %s1782_s24 = smov %s1321_s25 }
 0x402   : > { %p23_p8 = scmp.ge.s32.totalorder %s26_s29, 4   ;;  %s1783_s25 = smov %s1325_s26 }
 0x403   : > { %s1784_s26 = smov %s1600_s20  ;;  %s1785_s27 = smov %s1333_s28 }
 0x404   : > { %s1786_s28 = smov %s1788_s13  ;;  %25 = sbr.rel (!%p23_p8) target bundleno = 12 (0xc), region = 117 }
 0x40b   :  { %683 = vsyncpa [#allocation3], 1 }
 0x40c   :  { %685 = vsyncpa [#allocation3 + $0x1], 1 }
 0x40d   :  { %686 = vsyncpa [#allocation6], 1 }
 0x40e   :  { %687 = vsyncpa [#allocation9], 1 }
 0x40f   :  { %688 = vsyncpa [#allocation12], 1 }
 0x410   :  { %689 = vsyncpa [#allocation4], 1 }
 0x411   :  { %691 = vsyncpa [#allocation4 + $0x1], 1 }

// kernel: transformer_layer.8
= control target key start
LH: loop header
LB: loop body
LE: loop exit
PB: predicated region body
PF: predicated region fallthrough
CT: control target
= control target key end

     0   :  { %s2517_s0 = inlined_call_operand.hbm [shape: f32[2,16,32], index: 0, kind: input, shape index: {}]   ;;  %s2518_s1 = inlined_call_operand.hbm [shape: f32[1,32], index: 1, kind: input, shape index: {}]   ;;  %s2519_s2 = inlined_call_operand.hbm [shape: f32[1,32], index: 2, kind: input, shape index: {}]   ;;  %s2520_s3 = inlined_call_operand.hbm [shape: bf16[32,64], index: 3, kind: input, shape index: {}]   ;;  %s2521_s4 = inlined_call_operand.hbm [shape: f32[1,64], index: 4, kind: input, shape index: {}]   ;;  %s2522_s5 = inlined_call_operand.hbm [shape: f32[31,32], index: 5, kind: input, shape index: {}]   ;;  %s2523_s6 = inlined_call_operand.hbm [shape: f32[1,32], index: 6, kind: input, shape index: {}]   ;;  %s2524_s7 = inlined_call_operand.hbm [shape: f32[1,32], index: 7, kind: input, shape index: {}]   ;;  %s2525_s8 = inlined_call_operand.hbm [shape: bf16[32,32], index: 8, kind: input, shape index: {}]   ;;  %s2526_s9 = inlined_call_operand.hbm [shape: f32[1,32], index: 9, kind: input, shape index: {}]   ;;  %s2527_s10 = inlined_call_operand.hbm [shape: f32[2,16,32], index: 10, kind: output, shape index: {}]  }
   0x1   :  { %2535 = sst [smem:[#allocation28_spill]] %s2518_s1 }
   0x2   :  { %2536 = sst [smem:[#allocation29_spill]] %s2520_s3 }
   0x3   :  { %2537 = sst [smem:[#allocation30_spill]] %s2527_s10 }
   0x4   :  { %15 = vsyncpa [#allocation3], 0 }
   0x5   :  { %17 = vsyncpa [#allocation3 + $0x1], 0 }
   0x6   :  { %18 = vsyncpa [#allocation6], 0 }
   0x7   :  { %19 = vsyncpa [#allocation9], 0 }
   0x8   :  { %20 = vsyncpa [#allocation12], 0 }
   0x9   :  { %21 = vsyncpa [#allocation15], 0 }
   0xa   :  { %22 = vsyncpa [#allocation18], 0 }
   0xb   :  { %23 = vsyncpa [#allocation4], 0 }
   0xc   :  { %25 = vsyncpa [#allocation4 + $0x1], 0  ;;  %s1887_s13 = smov 0   ;;  %s1889_s14 = smov 0  }
   0xd   :  { %s1891_s15 = smov 0   ;;  %s1893_s16 = smov 0  }
   0xe LB: > { %s1812_s17 = smov [#allocation5]   ;;  %s1908_s19 = sadd.s32 4294967295, %s1810_s16   ;;  %s1810_s16 = sphi %s1893_s16, %s2570_s16   ;;  %s1806_s15 = sphi %s1891_s15, %s2569_s15   ;;  %s1802_s14 = sphi %s1889_s14, %s2568_s14   ;;  %s1798_s13 = sphi %s1887_s13, %s2567_s13  }
   0xf   : > { %s290_s18 = sshll.u32 %s1812_s17, 4  ;;  %p1201_p0 = scmp.ge.s32.totalorder %s1810_s16, 1  ;;  %s1913_s18 = int_to_ptr.vmem [resolvable:$true] %s290_s18 }
  0x10   : > { %p2532_p1 = scmp.eq.s32.totalorder %s1908_s19, 0  ;;  %p277_p2 = scmp.lt.s32.totalorder %s1810_s16, 3 }
  0x11   : > { %s1813_s21 = smov [#allocation8]   ;;  %s1814_s24 = smov [#allocation11]  }
  0x12   : > { %p1915_p3 = pnand %p1201_p0, %p277_p2  ;;  %s311_s22 = sshll.u32 %s1813_s21, 4  ;;  %s1922_s22 = int_to_ptr.vmem [resolvable:$true] %s311_s22 }
  0x13   : > { %s335_s25 = sshll.u32 %s1814_s24, 4  ;;  %s2541_s1 = sld [smem:[#allocation28_spill]]  ;;  %s1930_s25 = int_to_ptr.vmem [resolvable:$true] %s335_s25 }
  0x14   : > { %s2538_s20 = scalar_select %p1915_p3, 1, 0 }
  0x15   : > { %p1312_p5 = pneg %p1915_p3 }
  0x16   : > { %2539 = sst [smem:[#allocation27_spill]] %s2538_s20 }
  0x17   : > { %p1926_p6 = pnand %p1312_p5, %p2532_p1 }
  0x19   : > { %s1442_s28 = scalar_lea.hbm %s2541_s1, 16  ;;  %p1940_p8 = pneg %p1926_p6 }
  0x1a   : > { %p1443_p7 = scmp.ne.s32.totalorder %s2541_s1, %s1442_s28  ;;  %p1449_p11 = scmp.lt.u32.totalorder %s1442_s28, %s2541_s1 }
  0x1c   : > { %p1445_p9 = pnand %p1940_p8, %p1443_p7 }
  0x1e   : > { %p1446_p10 = pneg %p1445_p9 }
  0x20   : > { %p1451_p12 = pnand %p1449_p11, %p1446_p10 }
  0x22   : > { %1454 = shalt.err (!%p1451_p12)
}
  0x23   : > { %s1455_s21 = scalar_lea.vmem %s1913_s18, 16  ;;  %s1462_s24 = scalar_lea.vmem %s1913_s18, 32 }
  0x24   : > { %p1456_p13 = scmp.ne.s32.totalorder %s1913_s18, %s1455_s21  ;;  %p1463_p5 = scmp.lt.s32.totalorder %s1913_s18, %s1913_s18 }
  0x25   : > { %p1464_p7 = scmp.lt.s32.totalorder %s1462_s24, %s1455_s21 }
  0x26   : > { %p1458_p0 = pnand %p1456_p13, %p1940_p8 }
  0x27   : > { %p1465_p9 = por %p1464_p7, %p1463_p5 }
  0x28   : > { %p1459_p2 = pneg %p1458_p0 }
  0x2a   : > { %p1466_p4 = pnand %p1465_p9, %p1459_p2 }
  0x2c   : > { %1469 = shalt.err (!%p1466_p4)
}
  0x2d   : > { %1315 = dma.hbm_to_vmem [thread:$0]  (!%p1926_p6), %s2541_s1, 16, %s1913_s18, [#allocation6]  }
  0x2e   : > { %s2543_s3 = sld [smem:[#allocation29_spill]] }
  0x34   : > { %s1470_s30 = scalar_lea.hbm %s2543_s3, 256 }
  0x35   : > { %p1471_p10 = scmp.ne.s32.totalorder %s2543_s3, %s1470_s30  ;;  %p1477_p4 = scmp.lt.u32.totalorder %s1470_s30, %s2543_s3 }
  0x37   : > { %p1473_p11 = pnand %p1471_p10, %p1940_p8 }
  0x39   : > { %p1474_p12 = pneg %p1473_p11 }
  0x3b   : > { %p1479_p13 = pnand %p1477_p4, %p1474_p12 }
  0x3d   : > { %1482 = shalt.err (!%p1479_p13)
}
  0x3e   : > { %s1483_s18 = scalar_lea.vmem %s1922_s22, 256  ;;  %p1491_p7 = scmp.lt.s32.totalorder %s1922_s22, %s1922_s22 }
  0x3f   : > { %p1484_p0 = scmp.ne.s32.totalorder %s1922_s22, %s1483_s18  ;;  %p1492_p9 = scmp.lt.s32.totalorder %s1483_s18, %s1483_s18 }
  0x41   : > { %p1486_p2 = pnand %p1484_p0, %p1940_p8  ;;  %p1493_p10 = por %p1492_p9, %p1491_p7 }
  0x43   : > { %p1487_p5 = pneg %p1486_p2 }
  0x45   : > { %p1494_p11 = pnand %p1493_p10, %p1487_p5 }
  0x47   : > { %1497 = shalt.err (!%p1494_p11)
}
  0x48   : > { %s2528_s26 = smov 64   ;;  %s2529_s27 = smov 4  }
  0x49   : > { %1321 = dma.hbm_to_vmem [thread:$0]  (!%p1926_p6), %s2543_s3, 256, %s1922_s22, [#allocation9], %s2528_s26, %s2528_s26, %s2529_s27  }
  0x4a   : > { %s1498_s17 = scalar_lea.hbm %s2522_s5, 512 }
  0x4b   : > { %p1499_p12 = scmp.ne.s32.totalorder %s2522_s5, %s1498_s17  ;;  %p1505_p0 = scmp.lt.u32.totalorder %s1498_s17, %s2522_s5 }
  0x4d   : > { %p1501_p4 = pnand %p1499_p12, %p1940_p8 }
  0x4f   : > { %p1502_p13 = pneg %p1501_p4 }
  0x51   : > { %p1507_p2 = pnand %p1505_p0, %p1502_p13 }
  0x53   : > { %1510 = shalt.err (!%p1507_p2)
}
  0x54   : > { %s1511_s22 = scalar_lea.vmem %s1930_s25, 512  ;;  %p1519_p10 = scmp.lt.s32.totalorder %s1930_s25, %s1930_s25 }
  0x55   : > { %p1512_p5 = scmp.ne.s32.totalorder %s1930_s25, %s1511_s22  ;;  %p1520_p11 = scmp.lt.s32.totalorder %s1511_s22, %s1511_s22 }
  0x57   : > { %p1514_p7 = pnand %p1512_p5, %p1940_p8  ;;  %p1521_p12 = por %p1520_p11, %p1519_p10 }
  0x59   : > { %p1515_p9 = pneg %p1514_p7 }
  0x5b   : > { %p1522_p4 = pnand %p1521_p12, %p1515_p9 }
  0x5d   : > { %1525 = shalt.err (!%p1522_p4)
}
  0x5e   : > { %s1817_s28 = smov 128   ;;  %s1818_s1 = smov 8  }
  0x5f   : > { %1327 = dma.hbm_to_vmem [thread:$0]  (!%p1926_p6), %s2522_s5, 512, %s1930_s25, [#allocation12], %s1817_s28, %s1817_s28, %s1818_s1  }
  0x60   : > { %s1819_s12 = smov [#allocation14]   ;;  %s1820_s21 = smov [#allocation7]  }
  0x61   : > { %s360_s17 = sshll.u32 %s1819_s12, 4  ;;  %s301_s24 = sshll.u32 %s1820_s21, 4  ;;  %s361_s17 = int_to_ptr.vmem [resolvable:$true] %s360_s17  ;;  %s302_s24 = int_to_ptr.vmem [resolvable:$true] %s301_s24 }
  0x62   : > { %s1526_s26 = scalar_lea.hbm %s2524_s7, 16 }
  0x63   : > { %p1527_p13 = scmp.ne.s32.totalorder %s2524_s7, %s1526_s26  ;;  %p1533_p5 = scmp.lt.u32.totalorder %s1526_s26, %s2524_s7 }
  0x65   : > { %p1529_p0 = pnand %p1527_p13, %p1940_p8 }
  0x67   : > { %p1530_p2 = pneg %p1529_p0 }
  0x69   : > { %p1535_p7 = pnand %p1533_p5, %p1530_p2 }
  0x6b   : > { %1538 = shalt.err (!%p1535_p7)
}
  0x6c   : > { %s1539_s25 = scalar_lea.vmem %s361_s17, 16  ;;  %s1546_s29 = scalar_lea.vmem %s361_s17, 32 }
  0x6d   : > { %p1540_p9 = scmp.ne.s32.totalorder %s361_s17, %s1539_s25  ;;  %p1547_p12 = scmp.lt.s32.totalorder %s361_s17, %s361_s17 }
  0x6e   : > { %p1548_p4 = scmp.lt.s32.totalorder %s1546_s29, %s1539_s25 }
  0x6f   : > { %p1542_p10 = pnand %p1540_p9, %p1940_p8 }
  0x70   : > { %p1549_p1 = por %p1548_p4, %p1547_p12 }
  0x71   : > { %p1543_p11 = pneg %p1542_p10 }
  0x73   : > { %p1550_p3 = pnand %p1549_p1, %p1543_p11 }
  0x75   : > { %1553 = shalt.err (!%p1550_p3)
}
  0x76   : > { %1333 = dma.hbm_to_vmem [thread:$0]  (!%p1926_p6), %s2524_s7, 16, %s361_s17, [#allocation15]  }
  0x77   : > { %s1554_s26 = scalar_lea.hbm %s2519_s2, 16 }
  0x78   : > { %p1555_p13 = scmp.ne.s32.totalorder %s2519_s2, %s1554_s26  ;;  %p1561_p3 = scmp.lt.u32.totalorder %s1554_s26, %s2519_s2 }
  0x7a   : > { %p1557_p0 = pnand %p1555_p13, %p1940_p8 }
  0x7c   : > { %p1558_p1 = pneg %p1557_p0 }
  0x7e   : > { %p1563_p2 = pnand %p1561_p3, %p1558_p1 }
  0x80   : > { %1566 = shalt.err (!%p1563_p2)
}
  0x81   : > { %s1567_s22 = scalar_lea.vmem %s302_s24, 16  ;;  %s1574_s17 = scalar_lea.vmem %s302_s24, 32 }
  0x82   : > { %p1568_p5 = scmp.ne.s32.totalorder %s302_s24, %s1567_s22  ;;  %p1575_p10 = scmp.lt.s32.totalorder %s302_s24, %s302_s24 }
  0x83   : > { %p1576_p11 = scmp.lt.s32.totalorder %s1574_s17, %s1567_s22 }
  0x84   : > { %p1570_p7 = pnand %p1568_p5, %p1940_p8 }
  0x85   : > { %p1577_p12 = por %p1576_p11, %p1575_p10 }
  0x86   : > { %p1571_p9 = pneg %p1570_p7 }
  0x88   : > { %p1578_p4 = pnand %p1577_p12, %p1571_p9 }
  0x8a   : > { %1581 = shalt.err (!%p1578_p4)
}
  0x8b   : > { %1318 = dma.hbm_to_vmem [thread:$0]  (!%p1926_p6), %s2519_s2, 16, %s302_s24, [#allocation6]  }
  0x8c   : > { %s1821_s3 = smov [#allocation10]   ;;  %s1822_s10 = smov [#allocation13]  }
  0x8d   : > { %s325_s27 = sshll.u32 %s1821_s3, 4  ;;  %s349_s20 = sshll.u32 %s1822_s10, 4  ;;  %s326_s27 = int_to_ptr.vmem [resolvable:$true] %s325_s27  ;;  %s350_s20 = int_to_ptr.vmem [resolvable:$true] %s349_s20 }
  0x8e   : > { %s1582_s12 = scalar_lea.hbm %s2521_s4, 16 }
  0x8f   : > { %p1583_p13 = scmp.ne.s32.totalorder %s2521_s4, %s1582_s12  ;;  %p1589_p3 = scmp.lt.u32.totalorder %s1582_s12, %s2521_s4 }
  0x91   : > { %p1585_p0 = pnand %p1583_p13, %p1940_p8 }
  0x93   : > { %p1586_p1 = pneg %p1585_p0 }
  0x95   : > { %p1591_p2 = pnand %p1589_p3, %p1586_p1 }
  0x97   : > { %1594 = shalt.err (!%p1591_p2)
}
  0x98   : > { %s1595_s24 = scalar_lea.vmem %s326_s27, 16  ;;  %s1602_s25 = scalar_lea.vmem %s326_s27, 32 }
  0x99   : > { %p1596_p5 = scmp.ne.s32.totalorder %s326_s27, %s1595_s24  ;;  %p1603_p10 = scmp.lt.s32.totalorder %s326_s27, %s326_s27 }
  0x9a   : > { %p1604_p11 = scmp.lt.s32.totalorder %s1602_s25, %s1595_s24 }
  0x9b   : > { %p1598_p7 = pnand %p1596_p5, %p1940_p8 }
  0x9c   : > { %p1605_p12 = por %p1604_p11, %p1603_p10 }
  0x9d   : > { %p1599_p9 = pneg %p1598_p7 }
  0x9f   : > { %p1606_p4 = pnand %p1605_p12, %p1599_p9 }
  0xa1   : > { %1609 = shalt.err (!%p1606_p4)
}
  0xa2   : > { %1324 = dma.hbm_to_vmem [thread:$0]  (!%p1926_p6), %s2521_s4, 16, %s326_s27, [#allocation9]  }
  0xa3   : > { %s1610_s30 = scalar_lea.hbm %s2523_s6, 16 }
  0xa4   : > { %p1611_p13 = scmp.ne.s32.totalorder %s2523_s6, %s1610_s30  ;;  %p1617_p3 = scmp.lt.u32.totalorder %s1610_s30, %s2523_s6 }
  0xa6   : > { %p1613_p0 = pnand %p1611_p13, %p1940_p8 }
  0xa8   : > { %p1614_p1 = pneg %p1613_p0 }
  0xaa   : > { %p1619_p2 = pnand %p1617_p3, %p1614_p1 }
  0xac   : > { %1622 = shalt.err (!%p1619_p2)
}
  0xad   : > { %s1623_s17 = scalar_lea.vmem %s350_s20, 16  ;;  %s1630_s27 = scalar_lea.vmem %s350_s20, 32 }
  0xae   : > { %p1624_p5 = scmp.ne.s32.totalorder %s350_s20, %s1623_s17  ;;  %p1631_p10 = scmp.lt.s32.totalorder %s350_s20, %s350_s20 }
  0xaf   : > { %p1632_p11 = scmp.lt.s32.totalorder %s1630_s27, %s1623_s17 }
  0xb0   : > { %p1626_p7 = pnand %p1624_p5, %p1940_p8 }
  0xb1   : > { %p1633_p12 = por %p1632_p11, %p1631_p10 }
  0xb2   : > { %p1627_p9 = pneg %p1626_p7 }
  0xb4   : > { %p1634_p4 = pnand %p1633_p12, %p1627_p9 }
  0xb6   : > { %1637 = shalt.err (!%p1634_p4)
}
  0xb7   : > { %1330 = dma.hbm_to_vmem [thread:$0]  (!%p1926_p6), %s2523_s6, 16, %s350_s20, [#allocation12]  }
  0xb8   : > { %s1823_s29 = smov [#allocation16]   ;;  %s1824_s10 = smov [#allocation17]  }
  0xb9   : > { %s370_s3 = sshll.u32 %s1823_s29, 4  ;;  %s384_s26 = sshll.u32 %s1824_s10, 4  ;;  %s371_s3 = int_to_ptr.vmem [resolvable:$true] %s370_s3  ;;  %s385_s26 = int_to_ptr.vmem [resolvable:$true] %s384_s26 }
  0xba   : > { %s1638_s21 = scalar_lea.hbm %s2525_s8, 256 }
  0xbb   : > { %p1639_p13 = scmp.ne.s32.totalorder %s2525_s8, %s1638_s21  ;;  %p1645_p3 = scmp.lt.u32.totalorder %s1638_s21, %s2525_s8 }
  0xbd   : > { %p1641_p0 = pnand %p1639_p13, %p1940_p8 }
  0xbf   : > { %p1642_p1 = pneg %p1641_p0 }
  0xc1   : > { %p1647_p2 = pnand %p1645_p3, %p1642_p1 }
  0xc3   : > { %1650 = shalt.err (!%p1647_p2)
}
  0xc4   : > { %s1651_s20 = scalar_lea.vmem %s371_s3, 256  ;;  %p1659_p10 = scmp.lt.s32.totalorder %s371_s3, %s371_s3 }
  0xc5   : > { %p1652_p5 = scmp.ne.s32.totalorder %s371_s3, %s1651_s20  ;;  %p1660_p11 = scmp.lt.s32.totalorder %s1651_s20, %s1651_s20 }
  0xc7   : > { %p1654_p7 = pnand %p1652_p5, %p1940_p8  ;;  %p1661_p12 = por %p1660_p11, %p1659_p10 }
  0xc9   : > { %p1655_p9 = pneg %p1654_p7 }
  0xcb   : > { %p1662_p4 = pnand %p1661_p12, %p1655_p9 }
  0xcd   : > { %1665 = shalt.err (!%p1662_p4)
}
  0xce   : > { %s2544_s24 = smov 4   ;;  %s2545_s25 = smov 64  }
  0xcf   : > { %1336 = dma.hbm_to_vmem [thread:$0]  (!%p1926_p6), %s2525_s8, 256, %s371_s3, [#allocation15], %s2545_s25, %s2545_s25, %s2544_s24  }
  0xd0   : > { %s1666_s21 = scalar_lea.hbm %s2526_s9, 16 }
  0xd1   : > { %p1667_p13 = scmp.ne.s32.totalorder %s2526_s9, %s1666_s21  ;;  %p1673_p3 = scmp.lt.u32.totalorder %s1666_s21, %s2526_s9 }
  0xd3   : > { %p1669_p0 = pnand %p1667_p13, %p1940_p8 }
  0xd5   : > { %p1670_p1 = pneg %p1669_p0 }
  0xd7   : > { %p1675_p2 = pnand %p1673_p3, %p1670_p1 }
  0xd9   : > { %1678 = shalt.err (!%p1675_p2)
}
  0xda   : > { %s1679_s20 = scalar_lea.vmem %s385_s26, 16  ;;  %s1686_s3 = scalar_lea.vmem %s385_s26, 32 }
  0xdb   : > { %p1680_p5 = scmp.ne.s32.totalorder %s385_s26, %s1679_s20  ;;  %p1687_p10 = scmp.lt.s32.totalorder %s385_s26, %s385_s26 }
  0xdc   : > { %p1688_p11 = scmp.lt.s32.totalorder %s1686_s3, %s1679_s20 }
  0xdd   : > { %p1682_p7 = pnand %p1680_p5, %p1940_p8 }
  0xde   : > { %p1689_p12 = por %p1688_p11, %p1687_p10 }
  0xdf   : > { %p1683_p9 = pneg %p1682_p7 }
  0xe1   : > { %p1690_p4 = pnand %p1689_p12, %p1683_p9 }
  0xe3   : > { %1693 = shalt.err (!%p1690_p4)
}
  0xe4   : > { %1339 = dma.hbm_to_vmem [thread:$0]  (!%p1926_p6), %s2526_s9, 16, %s385_s26, [#allocation18]  }
  0xe5   : > { %s1200_s11 = sadd.s32 4294967294, %s1810_s16   ;;  %s2127_s23 = sadd.s32 1, %s1810_s16  }
  0xe6   : > { %s38_s29 = sadd.s32 1, %s1806_s15  ;;  %s35_s10 = ssub.s32 %s1810_s16, %s2127_s23 }
  0xe7   : > { %p45_p8 = scmp.ne.s32.totalorder %s1806_s15, %s1802_s14  ;;  %p36_p13 = scmp.eq.s32.totalorder %s35_s10, 0 }
  0xe8   : > { %p46_p0 = scmp.eq.s32.totalorder %s1810_s16, 0  ;;  %p51_p1 = scmp.ne.s32.totalorder %s1802_s14, %s1798_s13 }
  0xe9   : > { %p264_p3 = scmp.eq.s32.totalorder %s1908_s19, 1  ;;  %p2546_p5 = scmp.eq.s32.totalorder %s1908_s19, 0 }
  0xea   : > { %s2139_s30 = scalar_select %p36_p13, %s1806_s15, %s38_s29  }
  0xeb   : > { %p47_p2 = por %p46_p0, %p45_p8  ;;  %p2143_p7 = por %p2546_p5, %p51_p1 }
  0xec   : > { %p2147_p6 = por %p264_p3, %p45_p8  ;;  %p270_p9 = scmp.eq.s32.totalorder %s1200_s11, 1 }
  0xed   : > { %p1357_p10 = scmp.lt.s32.totalorder %s1810_s16, 2  ;;  %s395_s21 = sand.u32 1, %s1806_s15  }
  0xee   : > { %s2548_s26 = scalar_select %p2147_p6, 1, 0 }
  0xef   : > { %p2153_p11 = por %p270_p9, %p51_p1  ;;  %s1212_s22 = sshll.u32 %s395_s21, 4 }
  0xf0   : > { %s1248_s17 = sshll.u32 %s1810_s16, 8  ;;  %s399_s24 = scalar_lea.vmem [#allocation2], %s1212_s22 }
  0xf1   : > { %s2549_s18 = scalar_select %p2153_p11, 1, 0 }
  0xf2   : > { %s2161_s3 = scalar_lea.hbm %s2517_s0, %s1248_s17  ;;  %s406_s25 = sshll.u32 %s399_s24, 4  ;;  %s2167_s25 = int_to_ptr.vmem [resolvable:$true] %s406_s25 }
  0xf3   : > { %p2163_p12 = pnand %p1357_p10, %p47_p2  ;;  %s2169_s29 = scalar_lea.sflag [#allocation3], %s395_s21 }
  0xf4   : > { %s1694_s10 = scalar_lea.hbm %s2161_s3, 256  ;;  %s1699_s27 = scalar_lea.hbm %s2517_s0, 512 }
  0xf5   : > { %p1695_p4 = scmp.ne.s32.totalorder %s2161_s3, %s1694_s10  ;;  %p1696_p8 = pneg %p2163_p12 }
  0xf6   : > { %p1700_p1 = scmp.lt.u32.totalorder %s2161_s3, %s2517_s0  ;;  %p1701_p3 = scmp.lt.u32.totalorder %s1699_s27, %s1694_s10 }
  0xf7   : > { %p1697_p13 = pnand %p1696_p8, %p1695_p4  ;;  %p1703_p5 = scmp.lt.u32.totalorder %s1694_s10, %s2161_s3 }
  0xf8   : > { %p1702_p2 = por %p1701_p3, %p1700_p1 }
  0xf9   : > { %p1698_p0 = pneg %p1697_p13 }
  0xfa   : > { %p1704_p9 = por %p1703_p5, %p1702_p2 }
  0xfc   : > { %p1705_p10 = pnand %p1704_p9, %p1698_p0 }
  0xfe   : > { %1708 = shalt.err (!%p1705_p10)
}
  0xff   : > { %s1709_s21 = scalar_lea.vmem %s2167_s25, 256  ;;  %s1825_s22 = smov [#allocation2]  }
 0x100   : > { %p1710_p4 = scmp.ne.s32.totalorder %s2167_s25, %s1709_s21  ;;  %s1714_s17 = sshll.u32 %s1825_s22, 4  ;;  %s1715_s17 = int_to_ptr.vmem [resolvable:$false] %s1714_s17 }
 0x101   : > { %s1716_s20 = scalar_lea.vmem %s1715_s17, 512  ;;  %p1717_p6 = scmp.lt.s32.totalorder %s2167_s25, %s1715_s17 }
 0x102   : > { %p1712_p13 = pnand %p1710_p4, %p1696_p8  ;;  %p1718_p1 = scmp.lt.s32.totalorder %s1716_s20, %s1709_s21 }
 0x104   : > { %p1713_p11 = pneg %p1712_p13  ;;  %p1719_p3 = por %p1718_p1, %p1717_p6 }
 0x106   : > { %p1720_p2 = pnand %p1719_p3, %p1713_p11 }
 0x108   : > { %1723 = shalt.err (!%p1720_p2)
}
 0x109   : > { %1343 = dma.hbm_to_vmem [thread:$0]  (!%p2163_p12), %s2161_s3, 256, %s2167_s25, %s2169_s29, %s1817_s28, %s1817_s28, %s1818_s1  }
 0x10a   : > { %s2551_s10 = sld [smem:[#allocation27_spill]] }
 0x110   : > { %p2552_p8 = scmp.ne.s32.totalorder %s2551_s10, 0 }
 0x111   : > { %s2203_s27 = sand.u32 (!%p2552_p8), 1, %s1802_s14  }
 0x112   : > { %418 = sbr.rel (%p2552_p8) target bundleno = 1280 (0x500), region = 60  ;;  %s1216_s24 = sshll.u32 (!%p2552_p8), %s2203_s27, 4 }
 0x113   : > { %s421_s21 = scalar_lea.sflag (!%p2552_p8), [#allocation3], %s2203_s27  ;;  %s424_s11 = scalar_lea.vmem (!%p2552_p8), [#allocation2], %s1216_s24 }
 0x119   : > { %1769 = dma.done.wait (%p2143_p7), %s421_s21, 256  }
 0x11a   : > { %1771 = vsyncadd (%p2143_p7), %s421_s21, 4294967040  ;;  %p2553_p6 = scmp.eq.s32.totalorder %s1908_s19, 0 }
 0x11c   : > { %1773 = dma.done.wait (%p2553_p6), [#allocation6], 32   ;;  %p2554_p11 = pmov %p2553_p6 }
 0x11d   : > { %p2555_p12 = pmov %p2553_p6 }
 0x11e   : > { %1775 = vsyncadd (%p2554_p11), [#allocation6], 4294967264 }
 0x11f   : > { %1777 = dma.done.wait (%p2555_p12), [#allocation9], 272   ;;  %p2556_p0 = pmov %p2553_p6 }
 0x121   : > { %1779 = vsyncadd (%p2556_p0), [#allocation9], 4294967024  ;;  %p2557_p5 = pmov %p2556_p0 }
 0x122   : > { %p2558_p9 = pmov %p2556_p0 }
 0x123   : > { %1781 = dma.done.wait (%p2557_p5), [#allocation12], 528  }
 0x124   : > { %1783 = vsyncadd (%p2558_p9), [#allocation12], 4294966768  ;;  %p2559_p7 = pmov %p2556_p0 }
 0x125   : > { %p2560_p10 = pmov %p2556_p0 }
 0x126   : > { %1785 = dma.done.wait (%p2559_p7), [#allocation15], 272  }
 0x127   : > { %1787 = vsyncadd (%p2560_p10), [#allocation15], 4294967024  ;;  %p2561_p4 = pmov %p2556_p0 }
 0x128   : > { %p2562_p13 = pmov %p2556_p0 }
 0x129   : > { %1789 = dma.done.wait (%p2561_p4), [#allocation18], 16  }
 0x12a   : > { %1791 = vsyncadd (%p2562_p13), [#allocation18], 4294967280  ;;  %vm502_vm0 = vcmask 261120   ;;  %v2233_v0 = vld [vmem:[%s424_s11] sm:$0xff]  ;;  %v2235_v1 = vld [vmem:[%s424_s11 + $0x8] sm:$0xff]  ;;  %v1826_v15 = vmov 0.0   ;;  %v639_v51 = vlaneseq }
 0x12b   : > { %v503_v2 = vsel %vm502_vm0, %v2233_v0, 0.0  ;;  %v506_v3 = vsel %vm502_vm0, %v2235_v1, 0.0  ;;  %v1418_v14 = vld [vmem:[#allocation8] sm:$0xff]   ;;  %1256 = vmatprep.subr.bf16.mxu0 %v1826_v15  ;;  %1264 = vmatprep.subr.bf16.mxu1 %v1826_v15  ;;  %v1419_v16 = vld [vmem:[#allocation8 + $0x8] sm:$0xff]   ;;  %vm1827_vm1 = vmmov 0   ;;  %v1420_v47 = vld [vmem:[#allocation16] sm:$0xff]  }
 0x12c   : > { %504 = vadd.xlane.f32.xlu0 %v503_v2  ;;  %1257 = vmatpush3.bf16.msra.mxu0 %v1418_v14  ;;  %v1227_v25 = vld [vmem:[#allocation5] ss:$0 sm:$0xff]  ;;  %v1228_v29 = vld [vmem:[#allocation7] ss:$0 sm:$0xff]  ;;  %v1229_v34 = vld [vmem:[#allocation10] ss:$0 sm:$0xff] }
 0x12d   : > { %1260 = vmatprep.mubr.msk.bf16.mxu0 %vm1827_vm1, %v1826_v15  ;;  %1258 = vmatprep.subr.bf16.mxu0 %v1826_v15  ;;  %v1421_v48 = vld [vmem:[#allocation16 + $0x8] sm:$0xff]   ;;  %s1828_s28 = smov 96   ;;  %v2246_v52 = vshrl.u32 %v639_v51, 7  ;;  %v2256_v60 = vld [vmem:[#allocation11 + $0x18] sm:$0x7f]  ;;  %s1249_s1 = sshll.u32 %s1908_s19, 8 }
 0x12e   : > { %1268 = vmatprep.mubr.msk.bf16.mxu1 %vm1827_vm1, %v1826_v15  ;;  %1265 = vmatpush3.bf16.msra.mxu1 %v1420_v47  ;;  %v636_v54 = vld [vmem:[#allocation11 + $0x8] sm:$0xff]  ;;  %v2250_v56 = vld [vmem:[#allocation11 + $0x10] sm:$0xff]  ;;  %s496_s12 = scalar_lea.vmem [#allocation19], %s1216_s24  ;;  %s2563_s22 = sld [smem:[#allocation30_spill]] }
 0x12f   : > { %1266 = vmatprep.subr.bf16.mxu1 %v1826_v15  ;;  %v663_v53 = vsub.s32 7, %v2246_v52  ;;  %v684_v55 = vsub.s32 0, %v2246_v52  ;;  %v644_v57 = vsub.s32 6, %v2246_v52  ;;  %v705_v59 = vsub.s32 1, %v2246_v52  ;;  %s1041_s3 = sshll.u32 %s496_s12, 4  ;;  %s1028_s19 = scalar_lea.sflag [#allocation4], %s2203_s27  ;;  %s2470_s3 = int_to_ptr.vmem [resolvable:$true] %s1041_s3 }
 0x130   : > { %507 = vadd.xlane.f32.xlu0 %v506_v3  ;;  %1259 = vmatpush3.bf16.msra.mxu0 %v1419_v16  ;;  %v726_v62 = vsub.s32 2, %v2246_v52  ;;  %v2263_v63 = vadd.s32 8, %v2246_v52  ;;  %vm650_vm2 = vcmp.lt.s32.totalorder %v2246_v52, 7  ;;  %vm671_vm3 = vcmp.lt.s32.totalorder %v2246_v52, 6  ;;  %s1724_s20 = scalar_lea.vmem %s2470_s3, 256  ;;  %p2564_p3 = scmp.ne.s32.totalorder %s2548_s26, 0 }
 0x131   : > { %v664_v58 = vrot.slane %v636_v54, %v663_v53  ;;  %v685_v61 = vrot.slane %v2250_v56, %v684_v55  ;;  %v645_v2 = vrot.slane %v2256_v60, %v644_v57  ;;  %vm692_vm6 = vcmp.lt.s32.totalorder %v2246_v52, 5  ;;  %p1725_p1 = scmp.ne.s32.totalorder %s2470_s3, %s1724_s20  ;;  %s1829_s10 = smov [#allocation19]  }
 0x132   : > { %1267 = vmatpush3.bf16.msra.mxu1 %v1421_v48  ;;  %vm654_vm4 = vcmp.ge.s32.totalorder %v2263_v63, 15  ;;  %vm675_vm5 = vcmp.ge.s32.totalorder %v2263_v63, 14  ;;  %vm696_vm7 = vcmp.ge.s32.totalorder %v2263_v63, 13  ;;  %vm713_vm8 = vcmp.lt.s32.totalorder %v2246_v52, 4  ;;  %s1728_s24 = sshll.u32 %s1829_s10, 4  ;;  %s1729_s24 = int_to_ptr.vmem [resolvable:$false] %s1728_s24 }
 0x133   : > { %v665_v3 = vmul.f32 0.0, %v664_v58  ;;  %vm734_vm9 = vcmp.lt.s32.totalorder %v2246_v52, 3  ;;  %vm717_vm10 = vcmp.ge.s32.totalorder %v2263_v63, 12  ;;  %vm755_vm11 = vcmp.lt.s32.totalorder %v2246_v52, 2  ;;  %p1726_p2 = pnand %p1725_p1, %p2564_p3  ;;  %s1730_s21 = scalar_lea.vmem %s1729_s24, 512 }
 0x134   : > { %vm738_vm12 = vcmp.ge.s32.totalorder %v2263_v63, 11  ;;  %vm759_vm13 = vcmp.ge.s32.totalorder %v2263_v63, 10  ;;  %vm776_vm14 = vcmp.lt.s32.totalorder %v2246_v52, 1  ;;  %vm780_vm15 = vcmp.ge.s32.totalorder %v2263_v63, 9  ;;  %s2468_s17 = scalar_lea.hbm %s2563_s22, %s1249_s1  ;;  %p1731_p6 = scmp.lt.s32.totalorder %s2470_s3, %s1729_s24 }
 0x135   : > { %vm811_vm1 = vcmp.ge.s32.totalorder %v2246_v52, 7  ;;  %p1727_p8 = pneg %p1726_p2  ;;  %p1732_p11 = scmp.lt.s32.totalorder %s1730_s21, %s1724_s20 }
 0x137   : > { %p1733_p12 = por %p1732_p11, %p1731_p6 }
 0x139   : > { %p1734_p0 = pnand %p1733_p12, %p1727_p8 }
 0x1b9   : > { %v505_v4 = vpop.xlane.xlu0 %504 }
 0x1ba   : > { %v510_v5 = vmul.f32 0.03125, %v505_v4  ;;  %v2269_v4 = vrot.slane %v2250_v56, %v705_v59 }
 0x1bc   : > { %v512_v6 = vsub.f32 %v2233_v0, %v510_v5  ;;  %v747_v5 = vsub.s32 3, %v2246_v52 }
 0x1bd   : > { %v508_v7 = vpop.xlane.xlu0 %507 }
 0x1be   : > { %v511_v8 = vmul.f32 0.03125, %v508_v7  ;;  %v514_v9 = vmul.f32 %v512_v6, %v512_v6  ;;  %v2277_v7 = vrot.slane %v2250_v56, %v726_v62 }
 0x1c0   : > { %v513_v10 = vsub.f32 %v2235_v1, %v511_v8  ;;  %v516_v11 = vsel %vm502_vm0, %v514_v9, 0.0  ;;  %v768_v9 = vsub.s32 4, %v2246_v52  ;;  %v728_v16 = vmul.f32 0.0, %v2277_v7 }
 0x1c1   : > { %517 = vadd.xlane.f32.xlu1 %v516_v11 }
 0x1c2   : > { %v515_v12 = vmul.f32 %v513_v10, %v513_v10 }
 0x1c4   : > { %v519_v13 = vsel %vm502_vm0, %v515_v12, 0.0  ;;  %v707_v12 = vmul.f32 0.0, %v2269_v4 }
 0x1c5   : > { %520 = vadd.xlane.f32.xlu1 %v519_v13  ;;  %v748_v13 = vrot.slane %v2250_v56, %v747_v5 }
 0x24e   : > { %v518_v17 = vpop.xlane.xlu1 %517 }
 0x24f   : > { %v522_v18 = vmul.f32 0.03125, %v518_v17  ;;  %v2300_v17 = vrot.slane %v2250_v56, %v644_v57 }
 0x251   : > { %v524_v19 = vadd.f32 1e-05, %v522_v18 }
 0x252   : > { %v521_v20 = vpop.xlane.xlu1 %520 }
 0x253   : > { %1422 = vrsqrt.f32 %v524_v19  ;;  %v523_v21 = vmul.f32 0.03125, %v521_v20  ;;  %v749_v19 = vmul.f32 0.0, %v748_v13  ;;  %v769_v20 = vrot.slane %v2250_v56, %v768_v9 }
 0x255   : > { %v525_v22 = vadd.f32 1e-05, %v523_v21  ;;  %v789_v21 = vsub.s32 5, %v2246_v52  ;;  %v770_v51 = vmul.f32 0.0, %v769_v20 }
 0x257   : > { %1424 = vrsqrt.f32 %v525_v22 }
 0x25d   : > { %v1423_v23 = vpop.eup %1422 }
 0x25e   : > { %v528_v24 = vmul.f32 %v1423_v23, %v512_v6  ;;  %v686_v6 = vmul.f32 0.0, %v685_v61 }
 0x260   : > { %v536_v28 = vmul.f32 %v1227_v25, %v528_v24 }
 0x261   : > { %v1425_v26 = vpop.eup %1424 }
 0x262   : > { %v529_v27 = vmul.f32 %v1425_v26, %v513_v10  ;;  %v544_v31 = vadd.f32 %v1228_v29, %v536_v28 }
 0x264   : > { %v537_v30 = vmul.f32 %v1227_v25, %v529_v27 }
 0x266   : > { %v545_v32 = vadd.f32 %v1228_v29, %v537_v30 }
 0x268   : > { %v550_v33 = vpack.c.bf16 %v545_v32, %v544_v31 }
 0x26a   : > { %1261 = vmatmul.mubr.msk.bf16.vlgmr.msra.gmra.mrb[0].mxu0 %vm502_vm0, %v550_v33 }
 0x33d   : > { %v607_v35 = vpop.f32.mrb[0].mxu0 }
 0x33e   : > { %v608_v36 = vadd.f32 %v1229_v34, %v607_v35  ;;  %v1262_v37 = vpop.f32.mrb[1].mxu0 }
 0x33f   : > { %v610_v38 = vpop.f32.mrb[2].mxu0 }
 0x340   : > { %v1233_v39 = vmul.f32 -1.442695, %v608_v36  ;;  %v611_v40 = vadd.f32 %v1229_v34, %v610_v38  ;;  %v1263_v41 = vpop.f32.mrb[3].mxu0 }
 0x342   : > { %1426 = vpow2.f32 %v1233_v39  ;;  %v1234_v42 = vmul.f32 -1.442695, %v611_v40 }
 0x344   : > { %1428 = vpow2.f32 %v1234_v42 }
 0x34c   : > { %v1427_v43 = vpop.eup %1426 }
 0x34d   : > { %v620_v44 = vadd.f32 1.0, %v1427_v43 }
 0x34e   : > { %v1429_v45 = vpop.eup %1428 }
 0x34f   : > { %1430 = vrcp.f32 %v620_v44  ;;  %v621_v46 = vadd.f32 1.0, %v1429_v45  ;;  %v790_v44 = vrot.slane %v2250_v56, %v789_v21 }
 0x351   : > { %1432 = vrcp.f32 %v621_v46 }
 0x359   : > { %v1431_v49 = vpop.eup %1430 }
 0x35a   : > { %628 = vrot.lane.b32.xlu0 %v1431_v49, %s1828_s28 }
 0x35b   : > { %v1433_v50 = vpop.eup %1432 }
 0x35c   : > { %630 = vrot.lane.b32.xlu1 %v1433_v50, %s1828_s28 }
 0x3cc   : > { %v629_v8 = vpop.permute.xlu0 %628 }
 0x3cd   : > { %v2283_v10 = vmul.f32 %v629_v8, %v608_v36 }
 0x3ce   : > { %v631_v11 = vpop.permute.xlu1 %630 }
 0x3cf   : > { %v2294_v14 = vmul.f32 %v631_v11, %v611_v40  ;;  %v646_v15 = vmul.f32 %v645_v2, %v2283_v10  ;;  %v648_v18 = vrot.slane %v2283_v10, 1  ;;  %v669_v25 = vrot.slane %v2283_v10, 2 }
 0x3d0   : > { %v690_v26 = vrot.slane %v2283_v10, 3  ;;  %v711_v31 = vrot.slane %v2283_v10, 4  ;;  %v732_v36 = vrot.slane %v2283_v10, 5  ;;  %v753_v48 = vrot.slane %v2283_v10, 6 }
 0x3d1   : > { %v649_v22 = vrot.slane %v2294_v14, 1  ;;  %v670_v23 = vrot.slane %v2294_v14, 2  ;;  %v667_v24 = vadd.f32 %v665_v3, %v646_v15  ;;  %v691_v27 = vrot.slane %v2294_v14, 3 }
 0x3d2   : > { %v712_v28 = vrot.slane %v2294_v14, 4  ;;  %v733_v32 = vrot.slane %v2294_v14, 5  ;;  %v647_v37 = vmul.f32 %v645_v2, %v2294_v14  ;;  %v754_v40 = vrot.slane %v2294_v14, 6 }
 0x3d3   : > { %v652_v29 = vsel %vm650_vm2, %v649_v22, %v648_v18  ;;  %v673_v30 = vsel %vm671_vm3, %v670_v23, %v669_v25  ;;  %v688_v35 = vadd.f32 %v686_v6, %v667_v24  ;;  %v694_v39 = vsel %vm692_vm6, %v691_v27, %v690_v26 }
 0x3d4   : > { %v660_v33 = vsel %vm654_vm4, %v652_v29, 0.0  ;;  %v681_v34 = vsel %vm675_vm5, %v673_v30, 0.0  ;;  %v702_v41 = vsel %vm696_vm7, %v694_v39, 0.0  ;;  %v715_v43 = vsel %vm713_vm8, %v712_v28, %v711_v31 }
 0x3d5   : > { %v666_v38 = vmul.f32 %v664_v58, %v660_v33  ;;  %v709_v42 = vadd.f32 %v707_v12, %v688_v35  ;;  %v687_v46 = vmul.f32 %v685_v61, %v681_v34  ;;  %v736_v47 = vsel %vm734_vm9, %v733_v32, %v732_v36 }
 0x3d6   : > { %v723_v49 = vsel %vm717_vm10, %v715_v43, 0.0  ;;  %v708_v57 = vmul.f32 %v2269_v4, %v702_v41  ;;  %v757_v58 = vsel %vm755_vm11, %v754_v40, %v753_v48  ;;  %v791_v61 = vmul.f32 0.0, %v790_v44 }
 0x3d7   : > { %v668_v45 = vadd.f32 %v666_v38, %v647_v37  ;;  %v730_v50 = vadd.f32 %v728_v16, %v709_v42  ;;  %v744_v2 = vsel %vm738_vm12, %v736_v47, 0.0  ;;  %v774_v6 = vrot.slane %v2283_v10, 7 }
 0x3d8   : > { %v775_v8 = vrot.slane %v2294_v14, 7  ;;  %v729_v12 = vmul.f32 %v2277_v7, %v723_v49  ;;  %v822_v4 = vrot.slane %v2250_v56, %v663_v53  ;;  %vm827_vm4 = vcmp.ge.s32.totalorder %v2246_v52, 6 }
 0x3d9   : > { %v689_v54 = vadd.f32 %v687_v46, %v668_v45  ;;  %v751_v3 = vadd.f32 %v749_v19, %v730_v50  ;;  %v765_v15 = vsel %vm759_vm13, %v757_v58, 0.0  ;;  %v807_v24 = vmul.f32 0.0, %v2300_v17 }
 0x3da   : > { %v778_v19 = vsel %vm776_vm14, %v775_v8, %v774_v6  ;;  %v750_v33 = vmul.f32 %v748_v13, %v744_v2  ;;  %v817_v53 = vsel %vm811_vm1, %v652_v29, 0.0  ;;  %v838_v35 = vrot.slane %v2256_v60, %v684_v55 }
 0x3db   : > { %v710_v11 = vadd.f32 %v708_v57, %v689_v54  ;;  %v772_v16 = vadd.f32 %v770_v51, %v751_v3  ;;  %v786_v56 = vsel %vm780_vm15, %v778_v19, 0.0  ;;  %vm843_vm5 = vcmp.ge.s32.totalorder %v2246_v52, 5 }
 0x3dc   : > { %v771_v38 = vmul.f32 %v769_v20, %v765_v15  ;;  %v833_v41 = vsel %vm827_vm4, %v673_v30, 0.0  ;;  %v823_v45 = vmul.f32 %v822_v4, %v817_v53  ;;  %v854_v13 = vrot.slane %v2256_v60, %v705_v59 }
 0x3dd   : > { %v731_v7 = vadd.f32 %v729_v12, %v710_v11  ;;  %v793_v34 = vadd.f32 %v791_v61, %v772_v16  ;;  %vm859_vm7 = vcmp.ge.s32.totalorder %v2246_v52, 4  ;;  %v792_v29 = vmul.f32 %v790_v44, %v786_v56  ;;  %v1236_v56 = vld [vmem:[#allocation14] ss:$0 sm:$0xff] }
 0x3de   : > { %v849_v46 = vsel %vm843_vm5, %v694_v39, 0.0  ;;  %v870_v55 = vrot.slane %v2256_v60, %v726_v62  ;;  %v651_v20 = vsel %vm650_vm2, %v648_v18, %v649_v22  ;;  %v839_v49 = vmul.f32 %v838_v35, %v833_v41 }
 0x3df   : > { %v752_v37 = vadd.f32 %v750_v33, %v731_v7  ;;  %v809_v42 = vadd.f32 %v807_v24, %v793_v34  ;;  %vm875_vm10 = vcmp.ge.s32.totalorder %v2246_v52, 3  ;;  %v808_v44 = vmul.f32 %v2300_v17, %v2283_v10  ;;  %v1235_v7 = vld [vmem:[#allocation13] ss:$0 sm:$0xff] }
 0x3e0   : > { %v865_v39 = vsel %vm859_vm7, %v715_v43, 0.0  ;;  %v886_v62 = vrot.slane %v2256_v60, %v747_v5  ;;  %v672_v18 = vsel %vm671_vm3, %v669_v25, %v670_v23  ;;  %v855_v50 = vmul.f32 %v854_v13, %v849_v46 }
 0x3e1   : > { %v773_v63 = vadd.f32 %v771_v38, %v752_v37  ;;  %v825_v30 = vadd.f32 %v823_v45, %v809_v42  ;;  %vm891_vm2 = vcmp.ge.s32.totalorder %v2246_v52, 2  ;;  %v824_v54 = vmul.f32 %v822_v4, %v651_v20 }
 0x3e2   : > { %v881_v57 = vsel %vm875_vm10, %v736_v47, 0.0  ;;  %v902_v17 = vrot.slane %v2256_v60, %v768_v9  ;;  %v693_v5 = vsel %vm692_vm6, %v690_v26, %v691_v27  ;;  %v871_v23 = vmul.f32 %v870_v55, %v865_v39 }
 0x3e3   : > { %v794_v59 = vadd.f32 %v792_v29, %v773_v63  ;;  %v841_v22 = vadd.f32 %v839_v49, %v825_v30  ;;  %vm907_vm3 = vcmp.ge.s32.totalorder %v2246_v52, 1  ;;  %v840_v61 = vmul.f32 %v838_v35, %v672_v18 }
 0x3e4   : > { %v897_v2 = vsel %vm891_vm2, %v757_v58, 0.0  ;;  %v714_v9 = vsel %vm713_vm8, %v711_v31, %v712_v28  ;;  %v887_v3 = vmul.f32 %v886_v62, %v881_v57  ;;  %v918_v26 = vrot.slane %v2256_v60, %v789_v21 }
 0x3e5   : > { %v810_v51 = vadd.f32 %v808_v44, %v794_v59  ;;  %v857_v43 = vadd.f32 %v855_v50, %v841_v22  ;;  %v856_v11 = vmul.f32 %v854_v13, %v693_v5  ;;  %v913_v12 = vsel %vm907_vm3, %v778_v19, 0.0 }
 0x3e6   : > { %v735_v58 = vsel %vm734_vm9, %v732_v36, %v733_v32  ;;  %v903_v15 = vmul.f32 %v902_v17, %v897_v2  ;;  %v872_v28 = vmul.f32 %v870_v55, %v714_v9  ;;  %v756_v60 = vsel %vm755_vm11, %v753_v48, %v754_v40  ;;  %v1239_v55 = vld [vmem:[#allocation17] ss:$0 sm:$0xff] }
 0x3e7   : > { %v826_v25 = vadd.f32 %v824_v54, %v810_v51  ;;  %v873_v47 = vadd.f32 %v871_v23, %v857_v43  ;;  %v919_v31 = vmul.f32 %v918_v26, %v913_v12  ;;  %v888_v24 = vmul.f32 %v886_v62, %v735_v58 }
 0x3e8   : > { %v777_v32 = vsel %vm776_vm14, %v774_v6, %v775_v8  ;;  %v904_v53 = vmul.f32 %v902_v17, %v756_v60 }
 0x3e9   : > { %v842_v27 = vadd.f32 %v840_v61, %v826_v25  ;;  %v889_v4 = vadd.f32 %v887_v3, %v873_v47  ;;  %v920_v37 = vmul.f32 %v918_v26, %v777_v32 }
 0x3eb   : > { %v858_v16 = vadd.f32 %v856_v11, %v842_v27  ;;  %v905_v21 = vadd.f32 %v903_v15, %v889_v4 }
 0x3ed   : > { %v874_v19 = vadd.f32 %v872_v28, %v858_v16  ;;  %v921_v36 = vadd.f32 %v919_v31, %v905_v21 }
 0x3ef   : > { %v890_v33 = vadd.f32 %v888_v24, %v874_v19  ;;  %v930_v34 = vmul.f32 %v1235_v7, %v921_v36 }
 0x3f1   : > { %v906_v35 = vadd.f32 %v904_v53, %v890_v33  ;;  %v939_v40 = vadd.f32 %v1236_v56, %v930_v34 }
 0x3f3   : > { %v922_v48 = vadd.f32 %v920_v37, %v906_v35  ;;  %v1237_v38 = vmul.f32 -1.442695, %v939_v40 }
 0x3f5   : > { %v931_v41 = vmul.f32 %v1235_v7, %v922_v48  ;;  %1434 = vpow2.f32 %v1237_v38 }
 0x3f7   : > { %v940_v42 = vadd.f32 %v1236_v56, %v931_v41 }
 0x3f9   : > { %v1238_v45 = vmul.f32 -1.442695, %v940_v42 }
 0x3fb   : > { %1436 = vpow2.f32 %v1238_v45 }
 0x3ff   : > { %v1435_v14 = vpop.eup %1434 }
 0x400   : > { %v947_v10 = vadd.f32 1.0, %v1435_v14 }
 0x402   : > { %1438 = vrcp.f32 %v947_v10 }
 0x405   : > { %v1437_v52 = vpop.eup %1436 }
 0x406   : > { %v948_v6 = vadd.f32 1.0, %v1437_v52 }
 0x408   : > { %1440 = vrcp.f32 %v948_v6 }
 0x40c   : > { %v1439_v8 = vpop.eup %1438 }
 0x40d   : > { %v953_v63 = vmul.f32 %v1439_v8, %v939_v40 }
 0x412   : > { %v1441_v13 = vpop.eup %1440 }
 0x413   : > { %v954_v29 = vmul.f32 %v1441_v13, %v940_v42 }
 0x415   : > { %v959_v46 = vpack.c.bf16 %v954_v29, %v953_v63 }
 0x417   : > { %1269 = vmatmul.mubr.msk.bf16.vlgmr.msra.gmra.mrb[0].mxu1 %vm502_vm0, %v959_v46 }
 0x4ea   : > { %v1016_v20 = vpop.f32.mrb[0].mxu1 }
 0x4eb   : > { %v1017_v30 = vadd.f32 %v1239_v55, %v1016_v20  ;;  %v1270_v49 = vpop.f32.mrb[1].mxu1 }
 0x4ec   : > { %v1019_v59 = vpop.f32.mrb[2].mxu1 }
 0x4ed   : > { %v1023_v44 = vadd.f32 %v1017_v30, %v2233_v0  ;;  %v1020_v39 = vadd.f32 %v1239_v55, %v1019_v59  ;;  %v1271_v62 = vpop.f32.mrb[3].mxu1 }
 0x4ef   : > { %1025 = vst.msk [vmem:[%s496_s12] sm:$0xff] %vm502_vm0, %v1023_v44  ;;  %v1024_v18 = vadd.f32 %v1020_v39, %v2235_v1 }
 0x4f1   : > { %1026 = vst.msk [vmem:[%s496_s12 + $0x8] sm:$0xff] %vm502_vm0, %v1024_v18 }
 0x4f2   : > { %1737 = shalt.err (!%p1734_p0)
}
 0x4f3   : > { %s1738_s11 = scalar_lea.hbm %s2468_s17, 256  ;;  %s1742_s12 = scalar_lea.hbm %s2563_s22, 512 }
 0x4f4   : > { %p1739_p5 = scmp.ne.s32.totalorder %s2468_s17, %s1738_s11  ;;  %p1743_p10 = scmp.lt.u32.totalorder %s2468_s17, %s2563_s22 }
 0x4f5   : > { %p1744_p4 = scmp.lt.u32.totalorder %s1742_s12, %s1738_s11  ;;  %p1746_p1 = scmp.lt.u32.totalorder %s1738_s11, %s2468_s17 }
 0x4f6   : > { %p1740_p9 = pnand %p1739_p5, %p2564_p3 }
 0x4f7   : > { %p1745_p13 = por %p1744_p4, %p1743_p10 }
 0x4f8   : > { %p1741_p7 = pneg %p1740_p9 }
 0x4f9   : > { %p1747_p2 = por %p1746_p1, %p1745_p13 }
 0x4fb   : > { %p1748_p8 = pnand %p1747_p2, %p1741_p7 }
 0x4fd   : > { %1751 = shalt.err (!%p1748_p8)
}
 0x4fe   : > { %s1830_s20 = smov 128   ;;  %s1831_s10 = smov 8  }
 0x4ff   : > { %1310 = dma.vmem_to_hbm [thread:$0]  (%p2564_p3), %s2470_s3, 256, %s2468_s17, %s1028_s19, %s1830_s20, %s1830_s20, %s1831_s10  }
 0x500 PF: > { %s1056_s24 = sand.u32 1, %s1798_s13   ;;  %p2565_p6 = scmp.ne.s32.totalorder %s2549_s18, 0 }
 0x501   : > { %p2566_p11 = scmp.ge.s32.totalorder %s1810_s16, 2  ;;  %s1057_s21 = scalar_lea.sflag [#allocation4], %s1056_s24 }
 0x503   : > { %p1345_p12 = pnand %p2566_p11, %p2565_p6 }
 0x505   : > { %1793 = dma.done.wait (!%p1345_p12), %s1057_s21, 256  }
 0x506   : > { %1795 = vsyncadd (!%p1345_p12), %s1057_s21, 4294967040  ;;  %p28_p0 = scmp.ge.s32.totalorder %s2127_s23, 4   ;;  %s2567_s13 = smov %s1802_s14 }
 0x507   : > { %s2568_s14 = smov %s1806_s15  ;;  %s2569_s15 = smov %s2139_s30 }
 0x508   : > { %s2570_s16 = smov %s2127_s23  ;;  %30 = sbr.rel (!%p28_p0) target bundleno = 14 (0xe), region = 141 }
 0x50f   :  { %1062 = vsyncpa [#allocation3], 1 }
 0x510   :  { %1064 = vsyncpa [#allocation3 + $0x1], 1 }
 0x511   :  { %1065 = vsyncpa [#allocation6], 1 }
 0x512   :  { %1066 = vsyncpa [#allocation9], 1 }
 0x513   :  { %1067 = vsyncpa [#allocation12], 1 }
 0x514   :  { %1068 = vsyncpa [#allocation15], 1 }
 0x515   :  { %1069 = vsyncpa [#allocation18], 1 }
 0x516   :  { %1070 = vsyncpa [#allocation4], 1 }
 0x517   :  { %1072 = vsyncpa [#allocation4 + $0x1], 1 }

// kernel: transformer_layer.7
= control target key start
LH: loop header
LB: loop body
LE: loop exit
PB: predicated region body
PF: predicated region fallthrough
CT: control target
= control target key end

     0   :  { %s3586_s0 = inlined_call_operand.hbm [shape: f32[2,16,32], index: 0, kind: input, shape index: {}]   ;;  %s3587_s1 = inlined_call_operand.hbm [shape: bf16[2,16,32], index: 1, kind: input, shape index: {}]   ;;  %s3588_s2 = inlined_call_operand.hbm [shape: bf16[2,16,32], index: 2, kind: input, shape index: {}]   ;;  %s3589_s3 = inlined_call_operand.hbm [shape: bf16[1,32,128], index: 3, kind: input, shape index: {}]   ;;  %s3590_s4 = inlined_call_operand.hbm [shape: f32[1,32], index: 4, kind: input, shape index: {}]   ;;  %s3591_s5 = inlined_call_operand.hbm [shape: f32[1,32], index: 5, kind: input, shape index: {}]   ;;  %s3592_s6 = inlined_call_operand.hbm [shape: bf16[32,32], index: 6, kind: input, shape index: {}]   ;;  %s3593_s7 = inlined_call_operand.hbm [shape: f32[1,32], index: 7, kind: input, shape index: {}]   ;;  %s3594_s8 = inlined_call_operand.hbm [shape: f32[1,32], index: 8, kind: input, shape index: {}]   ;;  %s3595_s9 = inlined_call_operand.hbm [shape: f32[1,32], index: 9, kind: input, shape index: {}]   ;;  %s3596_s10 = inlined_call_operand.hbm [shape: bf16[32,32], index: 10, kind: input, shape index: {}]   ;;  %s3597_s11 = inlined_call_operand.hbm [shape: f32[1,32], index: 11, kind: input, shape index: {}]   ;;  %s3598_s12 = inlined_call_operand.hbm [shape: f32[2,16,32], index: 12, kind: output, shape index: {}]  }
   0x1   :  { %3632 = sst [smem:[#allocation42_spill]] %s3586_s0 }
   0x2   :  { %3633 = sst [smem:[#allocation43_spill]] %s3587_s1 }
   0x3   :  { %3634 = sst [smem:[#allocation44_spill]] %s3589_s3 }
   0x4   :  { %3635 = sst [smem:[#allocation45_spill]] %s3591_s5 }
   0x5   :  { %3636 = sst [smem:[#allocation46_spill]] %s3593_s7 }
   0x6   :  { %3637 = sst [smem:[#allocation47_spill]] %s3595_s9 }
   0x7   :  { %3638 = sst [smem:[#allocation48_spill]] %s3596_s10 }
   0x8   :  { %3639 = sst [smem:[#allocation49_spill]] %s3597_s11 }
   0x9   :  { %3640 = sst [smem:[#allocation50_spill]] %s3598_s12 }
   0xa   :  { %17 = vsyncpa [#allocation4], 0 }
   0xb   :  { %19 = vsyncpa [#allocation4 + $0x1], 0 }
   0xc   :  { %20 = vsyncpa [#allocation7], 0 }
   0xd   :  { %22 = vsyncpa [#allocation7 + $0x1], 0 }
   0xe   :  { %23 = vsyncpa [#allocation10], 0 }
   0xf   :  { %24 = vsyncpa [#allocation13], 0 }
  0x10   :  { %25 = vsyncpa [#allocation16], 0 }
  0x11   :  { %26 = vsyncpa [#allocation19], 0 }
  0x12   :  { %27 = vsyncpa [#allocation22], 0 }
  0x13   :  { %28 = vsyncpa [#allocation5], 0 }
  0x14   :  { %30 = vsyncpa [#allocation5 + $0x1], 0  ;;  %s2894_s21 = smov 0   ;;  %s2896_s22 = smov 0  }
  0x15   :  { %s2898_s23 = smov 0   ;;  %s2900_s24 = smov 0  }
  0x16   :  { %s2902_s25 = smov 0   ;;  %s2904_s26 = smov 0  }
  0x17 LB: > { %3641 = sst [smem:[#allocation32_spill]] %s2779_s21  ;;  %s2925_s27 = sadd.s32 4294967295, %s2799_s26   ;;  %s2799_s26 = sphi %s2904_s26, %s36_s26   ;;  %s2795_s25 = sphi %s2902_s25, %s3706_s25   ;;  %s2791_s24 = sphi %s2900_s24, %s3705_s24   ;;  %s2787_s23 = sphi %s2898_s23, %s3701_s23   ;;  %s2783_s22 = sphi %s2896_s22, %s3704_s22   ;;  %s2779_s21 = sphi %s2894_s21, %s3703_s21  }
  0x18   : > { %3642 = sst [smem:[#allocation33_spill]] %s2787_s23  ;;  %p1932_p0 = scmp.ge.s32.totalorder %s2799_s26, 1 }
  0x19   : > { %3643 = sst [smem:[#allocation34_spill]] %s2791_s24  ;;  %p3604_p1 = scmp.eq.s32.totalorder %s2925_s27, 0 }
  0x1a   : > { %3644 = sst [smem:[#allocation35_spill]] %s2799_s26  ;;  %p355_p2 = scmp.lt.s32.totalorder %s2799_s26, 3 }
  0x1b   : > { %3645 = sst [smem:[#allocation36_spill]] %s2925_s27  ;;  %s2801_s29 = smov [#allocation9]  }
  0x1c   : > { %p2930_p3 = pnand %p1932_p0, %p355_p2  ;;  %s370_s30 = sshll.u32 %s2801_s29, 4  ;;  %s2934_s30 = int_to_ptr.vmem [resolvable:$true] %s370_s30 }
  0x1d   : > { %s2802_s14 = smov [#allocation12]   ;;  %s2803_s16 = smov [#allocation15]  }
  0x1e   : > { %s3646_s28 = scalar_select %p2930_p3, 1, 0 }
  0x1f   : > { %p2169_p4 = pneg %p2930_p3  ;;  %s395_s15 = sshll.u32 %s2802_s14, 4  ;;  %s2945_s15 = int_to_ptr.vmem [resolvable:$true] %s395_s15 }
  0x20   : > { %3647 = sst [smem:[#allocation37_spill]] %s3646_s28  ;;  %s2947_s17 = sshll.u32 %s2803_s16, 4  ;;  %s420_s17 = int_to_ptr.vmem [resolvable:$true] %s2947_s17 }
  0x21   : > { %p2941_p6 = pnand %p2169_p4, %p3604_p1  ;;  %s3649_s3 = sld [smem:[#allocation44_spill]] }
  0x23   : > { %s3648_s13 = scalar_select %p2941_p6, 1, 0 }
  0x24   : > { %p2957_p8 = pneg %p2941_p6 }
  0x26   : > { %s3650_s24 = scalar_select %p2957_p8, 1, 0 }
  0x27   : > { %s2351_s20 = scalar_lea.hbm %s3649_s3, 256 }
  0x28   : > { %p2352_p7 = scmp.ne.s32.totalorder %s3649_s3, %s2351_s20  ;;  %p2358_p11 = scmp.lt.u32.totalorder %s2351_s20, %s3649_s3 }
  0x2a   : > { %p2354_p9 = pnand %p2957_p8, %p2352_p7 }
  0x2c   : > { %p2355_p10 = pneg %p2354_p9 }
  0x2e   : > { %p2360_p12 = pnand %p2358_p11, %p2355_p10 }
  0x30   : > { %2363 = shalt.err (!%p2360_p12)
}
  0x31   : > { %s2364_s12 = scalar_lea.vmem %s2934_s30, 256  ;;  %p2372_p4 = scmp.lt.s32.totalorder %s2934_s30, %s2934_s30 }
  0x32   : > { %p2365_p13 = scmp.ne.s32.totalorder %s2934_s30, %s2364_s12  ;;  %p2373_p5 = scmp.lt.s32.totalorder %s2364_s12, %s2364_s12 }
  0x34   : > { %p2367_p0 = pnand %p2365_p13, %p2957_p8  ;;  %p2374_p7 = por %p2373_p5, %p2372_p4 }
  0x36   : > { %p2368_p2 = pneg %p2367_p0 }
  0x38   : > { %p2375_p9 = pnand %p2374_p7, %p2368_p2 }
  0x3a   : > { %2378 = shalt.err (!%p2375_p9)
}
  0x3b   : > { %s3606_s18 = smov 64   ;;  %s3608_s19 = smov 4  }
  0x3c   : > { %2172 = dma.hbm_to_vmem [thread:$0]  (!%p2941_p6), %s3649_s3, 256, %s2934_s30, [#allocation10], %s3606_s18, %s3606_s18, %s3608_s19  }
  0x3d   : > { %s3651_s5 = sld [smem:[#allocation45_spill]] }
  0x43   : > { %s2379_s12 = scalar_lea.hbm %s3651_s5, 16 }
  0x44   : > { %p2380_p5 = scmp.ne.s32.totalorder %s3651_s5, %s2379_s12  ;;  %p2386_p12 = scmp.lt.u32.totalorder %s2379_s12, %s3651_s5 }
  0x46   : > { %p2382_p10 = pnand %p2380_p5, %p2957_p8 }
  0x48   : > { %p2383_p11 = pneg %p2382_p10 }
  0x4a   : > { %p2388_p13 = pnand %p2386_p12, %p2383_p11 }
  0x4c   : > { %2391 = shalt.err (!%p2388_p13)
}
  0x4d   : > { %s2392_s30 = scalar_lea.vmem %s2945_s15, 16  ;;  %s2399_s0 = scalar_lea.vmem %s2945_s15, 32 }
  0x4e   : > { %p2393_p0 = scmp.ne.s32.totalorder %s2945_s15, %s2392_s30  ;;  %p2400_p7 = scmp.lt.s32.totalorder %s2945_s15, %s2945_s15 }
  0x4f   : > { %p2401_p9 = scmp.lt.s32.totalorder %s2399_s0, %s2392_s30 }
  0x50   : > { %p2395_p2 = pnand %p2393_p0, %p2957_p8 }
  0x51   : > { %p2402_p5 = por %p2401_p9, %p2400_p7 }
  0x52   : > { %p2396_p4 = pneg %p2395_p2 }
  0x54   : > { %p2403_p10 = pnand %p2402_p5, %p2396_p4 }
  0x56   : > { %2406 = shalt.err (!%p2403_p10)
}
  0x57   : > { %2178 = dma.hbm_to_vmem [thread:$0]  (!%p2941_p6), %s3651_s5, 16, %s2945_s15, [#allocation13]  }
  0x58   : > { %s3652_s7 = sld [smem:[#allocation46_spill]] }
  0x5e   : > { %s2407_s29 = scalar_lea.hbm %s3652_s7, 16 }
  0x5f   : > { %p2408_p11 = scmp.ne.s32.totalorder %s3652_s7, %s2407_s29  ;;  %p2414_p0 = scmp.lt.u32.totalorder %s2407_s29, %s3652_s7 }
  0x61   : > { %p2410_p12 = pnand %p2408_p11, %p2957_p8 }
  0x63   : > { %p2411_p13 = pneg %p2410_p12 }
  0x65   : > { %p2416_p2 = pnand %p2414_p0, %p2411_p13 }
  0x67   : > { %2419 = shalt.err (!%p2416_p2)
}
  0x68   : > { %s2420_s0 = scalar_lea.vmem %s420_s17, 16  ;;  %s2427_s15 = scalar_lea.vmem %s420_s17, 32 }
  0x69   : > { %p2421_p4 = scmp.ne.s32.totalorder %s420_s17, %s2420_s0  ;;  %p2428_p5 = scmp.lt.s32.totalorder %s420_s17, %s420_s17 }
  0x6a   : > { %p2429_p10 = scmp.lt.s32.totalorder %s2427_s15, %s2420_s0 }
  0x6b   : > { %p2423_p7 = pnand %p2421_p4, %p2957_p8 }
  0x6c   : > { %p2430_p1 = por %p2429_p10, %p2428_p5 }
  0x6d   : > { %p2424_p9 = pneg %p2423_p7 }
  0x6f   : > { %p2431_p3 = pnand %p2430_p1, %p2424_p9 }
  0x71   : > { %2434 = shalt.err (!%p2431_p3)
}
  0x72   : > { %2184 = dma.hbm_to_vmem [thread:$0]  (!%p2941_p6), %s3652_s7, 16, %s420_s17, [#allocation16]  }
  0x73   : > { %s2806_s28 = smov [#allocation18]   ;;  %s3653_s9 = sld [smem:[#allocation47_spill]] }
  0x74   : > { %s441_s20 = sshll.u32 %s2806_s28, 4  ;;  %s442_s20 = int_to_ptr.vmem [resolvable:$true] %s441_s20 }
  0x79   : > { %s2435_s16 = scalar_lea.hbm %s3653_s9, 16 }
  0x7a   : > { %p2436_p11 = scmp.ne.s32.totalorder %s3653_s9, %s2435_s16  ;;  %p2442_p12 = scmp.lt.u32.totalorder %s2435_s16, %s3653_s9 }
  0x7c   : > { %p2438_p1 = pnand %p2436_p11, %p2957_p8 }
  0x7e   : > { %p2439_p3 = pneg %p2438_p1 }
  0x80   : > { %p2444_p13 = pnand %p2442_p12, %p2439_p3 }
  0x82   : > { %2447 = shalt.err (!%p2444_p13)
}
  0x83   : > { %s2448_s17 = scalar_lea.vmem %s442_s20, 16  ;;  %s2455_s10 = scalar_lea.vmem %s442_s20, 32 }
  0x84   : > { %p2449_p0 = scmp.ne.s32.totalorder %s442_s20, %s2448_s17  ;;  %p2456_p7 = scmp.lt.s32.totalorder %s442_s20, %s442_s20 }
  0x85   : > { %p2457_p9 = scmp.lt.s32.totalorder %s2455_s10, %s2448_s17 }
  0x86   : > { %p2451_p2 = pnand %p2449_p0, %p2957_p8 }
  0x87   : > { %p2458_p5 = por %p2457_p9, %p2456_p7 }
  0x88   : > { %p2452_p4 = pneg %p2451_p2 }
  0x8a   : > { %p2459_p10 = pnand %p2458_p5, %p2452_p4 }
  0x8c   : > { %2462 = shalt.err (!%p2459_p10)
}
  0x8d   : > { %2190 = dma.hbm_to_vmem [thread:$0]  (!%p2941_p6), %s3653_s9, 16, %s442_s20, [#allocation19]  }
  0x8e   : > { %s1931_s29 = sadd.s32 4294967294, %s2799_s26   ;;  %s48_s14 = sadd.s32 1, %s2795_s25 }
  0x8f   : > { %p50_p11 = scmp.ge.s32.totalorder %s48_s14, 2  ;;  %s57_s16 = sadd.s32 1, %s2787_s23 }
  0x90   : > { %p64_p1 = scmp.ne.s32.totalorder %s2787_s23, %s2783_s22  ;;  %p65_p3 = scmp.eq.s32.totalorder %s2799_s26, 0 }
  0x91   : > { %s3708_s14 = smov (%p50_p11, %s48_s14), 0  ;;  %p70_p13 = scmp.ne.s32.totalorder %s2783_s22, %s2779_s21 }
  0x92   : > { %3654 = sst [smem:[#allocation38_spill]] %s3708_s14  ;;  %p3050_p12 = por %p65_p3, %p64_p1 }
  0x93   : > { %s52_s20 = ssub.s32 %s2795_s25, %s3708_s14  ;;  %p342_p0 = scmp.eq.s32.totalorder %s2925_s27, 1 }
  0x94   : > { %p55_p2 = scmp.eq.s32.totalorder %s52_s20, 0  ;;  %p3656_p4 = scmp.eq.s32.totalorder %s2925_s27, 0 }
  0x95   : > { %p3065_p9 = por %p342_p0, %p64_p1  ;;  %p348_p5 = scmp.eq.s32.totalorder %s1931_s29, 1 }
  0x96   : > { %p3061_p7 = por %p3656_p4, %p70_p13  ;;  %p2220_p11 = scmp.lt.s32.totalorder %s2799_s26, 2 }
  0x97   : > { %s3658_s0 = scalar_select %p3065_p9, 1, 0 }
  0x98   : > { %s3657_s30 = scalar_select %p3061_p7, 1, 0 }
  0x99   : > { %3659 = sst [smem:[#allocation39_spill]] %s3658_s0  ;;  %p3072_p10 = por %p348_p5, %p70_p13 }
  0x9a   : > { %s3070_s15 = scalar_select %p55_p2, %s2787_s23, %s57_s16  }
  0x9b   : > { %s3661_s17 = scalar_select %p3072_p10, 1, 0 }
  0x9c   : > { %3660 = sst [smem:[#allocation40_spill]] %s3070_s15  ;;  %s3078_s10 = sand.u32 1, %s2787_s23  }
  0x9d   : > { %3662 = sst [smem:[#allocation41_spill]] %s3661_s17  ;;  %s499_s11 = sand.u32 1, %s2799_s26  }
  0x9e   : > { %p3083_p3 = pnand %p2220_p11, %p3050_p12  ;;  %s3610_s20 = sshll.u32 %s3078_s10, 3 }
  0x9f   : > { %s3611_s29 = sshll.u32 %s2795_s25, 7  ;;  %s3664_s1 = sld [smem:[#allocation43_spill]] }
  0xa0   : > { %s3663_s28 = scalar_select %p3083_p3, 1, 0 }
  0xa1   : > { %s503_s3 = scalar_lea.vmem [#allocation6], %s3610_s20  ;;  %s3100_s5 = scalar_lea.sflag [#allocation7], %s499_s11 }
  0xa2   : > { %s510_s12 = sshll.u32 %s503_s3, 4  ;;  %p3106_p12 = pneg %p3083_p3  ;;  %s3098_s12 = int_to_ptr.vmem [resolvable:$true] %s510_s12 }
  0xa4   : > { %s3665_s9 = scalar_select %p3106_p12, 1, 0 }
  0xa5   : > { %s3094_s19 = scalar_lea.hbm %s3664_s1, %s3611_s29  ;;  %s2468_s20 = scalar_lea.hbm %s3664_s1, 256 }
  0xa6   : > { %s2463_s7 = scalar_lea.hbm %s3094_s19, 128  ;;  %p2469_p2 = scmp.lt.u32.totalorder %s3094_s19, %s3664_s1 }
  0xa7   : > { %p2464_p1 = scmp.ne.s32.totalorder %s3094_s19, %s2463_s7  ;;  %p2470_p4 = scmp.lt.u32.totalorder %s2468_s20, %s2463_s7 }
  0xa8   : > { %p2472_p11 = scmp.lt.u32.totalorder %s2463_s7, %s3094_s19 }
  0xa9   : > { %p2466_p13 = pnand %p3106_p12, %p2464_p1  ;;  %p2471_p5 = por %p2470_p4, %p2469_p2 }
  0xab   : > { %p2467_p0 = pneg %p2466_p13  ;;  %p2473_p10 = por %p2472_p11, %p2471_p5 }
  0xad   : > { %p2474_p9 = pnand %p2473_p10, %p2467_p0 }
  0xaf   : > { %2477 = shalt.err (!%p2474_p9)
}
  0xb0   : > { %s2478_s11 = scalar_lea.vmem %s3098_s12, 128  ;;  %s2807_s18 = smov [#allocation6]  }
  0xb1   : > { %p2479_p1 = scmp.ne.s32.totalorder %s3098_s12, %s2478_s11  ;;  %s2483_s16 = sshll.u32 %s2807_s18, 4  ;;  %s2484_s16 = int_to_ptr.vmem [resolvable:$false] %s2483_s16 }
  0xb2   : > { %s2485_s29 = scalar_lea.vmem %s2484_s16, 256  ;;  %p2486_p6 = scmp.lt.s32.totalorder %s3098_s12, %s2484_s16 }
  0xb3   : > { %p2481_p13 = pnand %p2479_p1, %p3106_p12  ;;  %p2487_p8 = scmp.lt.s32.totalorder %s2485_s29, %s2478_s11 }
  0xb5   : > { %p2482_p7 = pneg %p2481_p13  ;;  %p2488_p2 = por %p2487_p8, %p2486_p6 }
  0xb7   : > { %p2489_p4 = pnand %p2488_p2, %p2482_p7 }
  0xb9   : > { %2492 = shalt.err (!%p2489_p4)
}
  0xba   : > { %s3666_s7 = smov 4   ;;  %s3667_s20 = smov 64  }
  0xbb   : > { %2203 = dma.hbm_to_vmem [thread:$0]  (!%p3083_p3), %s3094_s19, 128, %s3098_s12, %s3100_s5, %s3667_s20, %s3667_s20, %s3666_s7  }
  0xbc   : > { %s3668_s3 = sshll.u32 %s2795_s25, 7  ;;  %s3669_s16 = sshll.u32 %s3078_s10, 3 }
  0xbd   : > { %s3138_s11 = scalar_lea.hbm %s3588_s2, %s3668_s3  ;;  %s524_s29 = scalar_lea.vmem [#allocation8], %s3669_s16 }
  0xbe   : > { %s531_s14 = sshll.u32 %s524_s29, 4  ;;  %s2808_s15 = smov [#allocation11]   ;;  %s3142_s14 = int_to_ptr.vmem [resolvable:$true] %s531_s14 }
  0xbf   : > { %s384_s23 = sshll.u32 %s2808_s15, 4  ;;  %s2809_s26 = smov [#allocation14]   ;;  %s385_s23 = int_to_ptr.vmem [resolvable:$true] %s384_s23 }
  0xc0   : > { %s405_s17 = sshll.u32 %s2809_s26, 4  ;;  %s2493_s19 = scalar_lea.hbm %s3590_s4, 16  ;;  %s406_s17 = int_to_ptr.vmem [resolvable:$true] %s405_s17 }
  0xc1   : > { %p2494_p6 = scmp.ne.s32.totalorder %s3590_s4, %s2493_s19  ;;  %p3670_p8 = scmp.ne.s32.totalorder %s3650_s24, 0 }
  0xc2   : > { %p2500_p10 = scmp.lt.u32.totalorder %s2493_s19, %s3590_s4 }
  0xc3   : > { %p2496_p7 = pnand %p2494_p6, %p3670_p8 }
  0xc5   : > { %p2497_p9 = pneg %p2496_p7 }
  0xc7   : > { %p2502_p0 = pnand %p2500_p10, %p2497_p9 }
  0xc9   : > { %2505 = shalt.err (!%p2502_p0)
}
  0xca   : > { %s2506_s15 = scalar_lea.vmem %s385_s23, 16  ;;  %s2513_s21 = scalar_lea.vmem %s385_s23, 32 }
  0xcb   : > { %p2507_p5 = scmp.ne.s32.totalorder %s385_s23, %s2506_s15  ;;  %p2514_p13 = scmp.lt.s32.totalorder %s385_s23, %s385_s23 }
  0xcc   : > { %p2515_p2 = scmp.lt.s32.totalorder %s2513_s21, %s2506_s15 }
  0xcd   : > { %p2509_p11 = pnand %p2507_p5, %p3670_p8 }
  0xce   : > { %p2516_p4 = por %p2515_p2, %p2514_p13 }
  0xcf   : > { %p2510_p1 = pneg %p2509_p11 }
  0xd1   : > { %p2517_p3 = pnand %p2516_p4, %p2510_p1 }
  0xd3   : > { %2520 = shalt.err (!%p2517_p3)
}
  0xd4   : > { %p3671_p6 = scmp.ne.s32.totalorder %s3648_s13, 0  ;;  %s2521_s16 = scalar_lea.hbm %s3592_s6, 256 }
  0xd5   : > { %p2522_p7 = scmp.ne.s32.totalorder %s3592_s6, %s2521_s16  ;;  %p2528_p3 = scmp.lt.u32.totalorder %s2521_s16, %s3592_s6 }
  0xd6   : > { %2175 = dma.hbm_to_vmem [thread:$0]  (!%p3671_p6), %s3590_s4, 16, %s385_s23, [#allocation10]  }
  0xd7   : > { %p2524_p9 = pnand %p2522_p7, %p3670_p8 }
  0xd9   : > { %p2525_p10 = pneg %p2524_p9 }
  0xdb   : > { %p2530_p0 = pnand %p2528_p3, %p2525_p10 }
  0xdd   : > { %2533 = shalt.err (!%p2530_p0)
}
  0xde   : > { %s2534_s3 = scalar_lea.vmem %s406_s17, 256  ;;  %p2542_p13 = scmp.lt.s32.totalorder %s406_s17, %s406_s17 }
  0xdf   : > { %p2535_p5 = scmp.ne.s32.totalorder %s406_s17, %s2534_s3  ;;  %p2543_p2 = scmp.lt.s32.totalorder %s2534_s3, %s2534_s3 }
  0xe1   : > { %p2537_p11 = pnand %p2535_p5, %p3670_p8  ;;  %p2544_p4 = por %p2543_p2, %p2542_p13 }
  0xe3   : > { %p2538_p1 = pneg %p2537_p11 }
  0xe5   : > { %p2545_p12 = pnand %p2544_p4, %p2538_p1 }
  0xe7   : > { %2548 = shalt.err (!%p2545_p12)
}
  0xe8   : > { %2181 = dma.hbm_to_vmem [thread:$0]  (!%p3671_p6), %s3592_s6, 256, %s406_s17, [#allocation13], %s3667_s20, %s3667_s20, %s3666_s7  }
  0xe9   : > { %s2810_s21 = smov [#allocation17]   ;;  %s2811_s27 = smov [#allocation20]  }
  0xea   : > { %s430_s26 = sshll.u32 %s2810_s21, 4  ;;  %s451_s0 = sshll.u32 %s2811_s27, 4  ;;  %s431_s26 = int_to_ptr.vmem [resolvable:$true] %s430_s26  ;;  %s452_s0 = int_to_ptr.vmem [resolvable:$true] %s451_s0 }
  0xeb   : > { %s2549_s29 = scalar_lea.hbm %s3594_s8, 16 }
  0xec   : > { %p2550_p12 = scmp.ne.s32.totalorder %s3594_s8, %s2549_s29  ;;  %p2556_p10 = scmp.lt.u32.totalorder %s2549_s29, %s3594_s8 }
  0xee   : > { %p2552_p7 = pnand %p2550_p12, %p3670_p8 }
  0xf0   : > { %p2553_p9 = pneg %p2552_p7 }
  0xf2   : > { %p2558_p3 = pnand %p2556_p10, %p2553_p9 }
  0xf4   : > { %2561 = shalt.err (!%p2558_p3)
}
  0xf5   : > { %s2562_s17 = scalar_lea.vmem %s431_s26, 16  ;;  %s2569_s23 = scalar_lea.vmem %s431_s26, 32 }
  0xf6   : > { %p2563_p0 = scmp.ne.s32.totalorder %s431_s26, %s2562_s17  ;;  %p2570_p1 = scmp.lt.s32.totalorder %s431_s26, %s431_s26 }
  0xf7   : > { %p2571_p13 = scmp.lt.s32.totalorder %s2569_s23, %s2562_s17 }
  0xf8   : > { %p2565_p5 = pnand %p2563_p0, %p3670_p8 }
  0xf9   : > { %p2572_p2 = por %p2571_p13, %p2570_p1 }
  0xfa   : > { %p2566_p11 = pneg %p2565_p5 }
  0xfc   : > { %p2573_p4 = pnand %p2572_p2, %p2566_p11 }
  0xfe   : > { %2576 = shalt.err (!%p2573_p4)
}
  0xff   : > { %2187 = dma.hbm_to_vmem [thread:$0]  (!%p3671_p6), %s3594_s8, 16, %s431_s26, [#allocation16]  }
 0x100   : > { %s3672_s16 = sld [smem:[#allocation48_spill]] }
 0x106   : > { %s2577_s29 = scalar_lea.hbm %s3672_s16, 256 }
 0x107   : > { %p2578_p12 = scmp.ne.s32.totalorder %s3672_s16, %s2577_s29  ;;  %p2584_p10 = scmp.lt.u32.totalorder %s2577_s29, %s3672_s16 }
 0x109   : > { %p2580_p7 = pnand %p2578_p12, %p3670_p8 }
 0x10b   : > { %p2581_p9 = pneg %p2580_p7 }
 0x10d   : > { %p2586_p3 = pnand %p2584_p10, %p2581_p9 }
 0x10f   : > { %2589 = shalt.err (!%p2586_p3)
}
 0x110   : > { %s2590_s17 = scalar_lea.vmem %s452_s0, 256  ;;  %p2598_p1 = scmp.lt.s32.totalorder %s452_s0, %s452_s0 }
 0x111   : > { %p2591_p0 = scmp.ne.s32.totalorder %s452_s0, %s2590_s17  ;;  %p2599_p13 = scmp.lt.s32.totalorder %s2590_s17, %s2590_s17 }
 0x113   : > { %p2593_p5 = pnand %p2591_p0, %p3670_p8  ;;  %p2600_p2 = por %p2599_p13, %p2598_p1 }
 0x115   : > { %p2594_p11 = pneg %p2593_p5 }
 0x117   : > { %p2601_p4 = pnand %p2600_p2, %p2594_p11 }
 0x119   : > { %2604 = shalt.err (!%p2601_p4)
}
 0x11a   : > { %2193 = dma.hbm_to_vmem [thread:$0]  (!%p3671_p6), %s3672_s16, 256, %s452_s0, [#allocation19], %s3667_s20, %s3667_s20, %s3666_s7  }
 0x11b   : > { %s2812_s15 = smov [#allocation21]   ;;  %s1943_s27 = sshll.u32 %s3078_s10, 4 }
 0x11c   : > { %s465_s21 = sshll.u32 %s2812_s15, 4  ;;  %s3673_s19 = sld [smem:[#allocation49_spill]]  ;;  %s466_s21 = int_to_ptr.vmem [resolvable:$true] %s465_s21 }
 0x122   : > { %s2605_s12 = scalar_lea.hbm %s3673_s19, 16 }
 0x123   : > { %p2606_p12 = scmp.ne.s32.totalorder %s3673_s19, %s2605_s12  ;;  %p2612_p10 = scmp.lt.u32.totalorder %s2605_s12, %s3673_s19 }
 0x125   : > { %p2608_p7 = pnand %p2606_p12, %p3670_p8 }
 0x127   : > { %p2609_p9 = pneg %p2608_p7 }
 0x129   : > { %p2614_p3 = pnand %p2612_p10, %p2609_p9 }
 0x12b   : > { %2617 = shalt.err (!%p2614_p3)
}
 0x12c   : > { %s2618_s0 = scalar_lea.vmem %s466_s21, 16  ;;  %s2625_s23 = scalar_lea.vmem %s466_s21, 32 }
 0x12d   : > { %p2619_p0 = scmp.ne.s32.totalorder %s466_s21, %s2618_s0  ;;  %p2626_p1 = scmp.lt.s32.totalorder %s466_s21, %s466_s21 }
 0x12e   : > { %p2627_p13 = scmp.lt.s32.totalorder %s2625_s23, %s2618_s0 }
 0x12f   : > { %p2621_p5 = pnand %p2619_p0, %p3670_p8 }
 0x130   : > { %p2628_p2 = por %p2627_p13, %p2626_p1 }
 0x131   : > { %p2622_p11 = pneg %p2621_p5 }
 0x133   : > { %p2629_p4 = pnand %p2628_p2, %p2622_p11 }
 0x135   : > { %2632 = shalt.err (!%p2629_p4)
}
 0x136   : > { %2196 = dma.hbm_to_vmem [thread:$0]  (!%p3671_p6), %s3673_s19, 16, %s466_s21, [#allocation22]  }
 0x137   : > { %s2003_s29 = sshll.u32 %s2795_s25, 8  ;;  %s3674_s1 = sld [smem:[#allocation42_spill]] }
 0x138   : > { %s480_s17 = scalar_lea.vmem [#allocation3], %s1943_s27  ;;  %s477_s13 = scalar_lea.sflag [#allocation4], %s3078_s10 }
 0x139   : > { %s489_s26 = sshll.u32 %s480_s17, 4  ;;  %p3675_p12 = scmp.ne.s32.totalorder %s3665_s9, 0  ;;  %s3247_s26 = int_to_ptr.vmem [resolvable:$true] %s489_s26 }
 0x13d   : > { %s3245_s3 = scalar_lea.hbm %s3674_s1, %s2003_s29  ;;  %s2638_s15 = scalar_lea.hbm %s3674_s1, 512 }
 0x13e   : > { %s2633_s0 = scalar_lea.hbm %s3245_s3, 256  ;;  %p2639_p9 = scmp.lt.u32.totalorder %s3245_s3, %s3674_s1 }
 0x13f   : > { %p2634_p8 = scmp.ne.s32.totalorder %s3245_s3, %s2633_s0  ;;  %p2640_p10 = scmp.lt.u32.totalorder %s2638_s15, %s2633_s0 }
 0x140   : > { %p2642_p0 = scmp.lt.u32.totalorder %s2633_s0, %s3245_s3 }
 0x141   : > { %p2636_p7 = pnand %p2634_p8, %p3675_p12  ;;  %p2641_p3 = por %p2640_p10, %p2639_p9 }
 0x143   : > { %p2637_p6 = pneg %p2636_p7  ;;  %p2643_p5 = por %p2642_p0, %p2641_p3 }
 0x145   : > { %p2644_p11 = pnand %p2643_p5, %p2637_p6 }
 0x147   : > { %2647 = shalt.err (!%p2644_p11)
}
 0x148   : > { %s2648_s27 = scalar_lea.vmem %s3247_s26, 256  ;;  %s2813_s12 = smov [#allocation3]  }
 0x149   : > { %p2649_p1 = scmp.ne.s32.totalorder %s3247_s26, %s2648_s27  ;;  %s2653_s24 = sshll.u32 %s2813_s12, 4  ;;  %s2654_s24 = int_to_ptr.vmem [resolvable:$false] %s2653_s24 }
 0x14a   : > { %s2655_s17 = scalar_lea.vmem %s2654_s24, 512  ;;  %p2656_p4 = scmp.lt.s32.totalorder %s3247_s26, %s2654_s24 }
 0x14b   : > { %p2651_p13 = pnand %p2649_p1, %p3675_p12  ;;  %p2657_p8 = scmp.lt.s32.totalorder %s2655_s17, %s2648_s27 }
 0x14d   : > { %p2652_p2 = pneg %p2651_p13  ;;  %p2658_p7 = por %p2657_p8, %p2656_p4 }
 0x14f   : > { %p2659_p9 = pnand %p2658_p7, %p2652_p2 }
 0x151   : > { %2662 = shalt.err (!%p2659_p9)
}
 0x152   : > { %s2814_s0 = smov 128   ;;  %s2815_s21 = smov 8  }
 0x153   : > { %p3676_p6 = scmp.ne.s32.totalorder %s3663_s28, 0  ;;  %s2663_s23 = scalar_lea.hbm %s3138_s11, 128 }
 0x154   : > { %p2664_p10 = scmp.ne.s32.totalorder %s3138_s11, %s2663_s23  ;;  %s2668_s29 = scalar_lea.hbm %s3588_s2, 256 }
 0x155   : > { %2200 = dma.hbm_to_vmem [thread:$0]  (!%p3676_p6), %s3245_s3, 256, %s3247_s26, %s477_s13, %s2814_s0, %s2814_s0, %s2815_s21  }
 0x156   : > { %p2666_p3 = pnand %p2664_p10, %p3675_p12  ;;  %p2669_p5 = scmp.lt.u32.totalorder %s3138_s11, %s3588_s2 }
 0x157   : > { %p2670_p11 = scmp.lt.u32.totalorder %s2668_s29, %s2663_s23  ;;  %p2672_p13 = scmp.lt.u32.totalorder %s2663_s23, %s3138_s11 }
 0x158   : > { %p2667_p0 = pneg %p2666_p3 }
 0x159   : > { %p2671_p1 = por %p2670_p11, %p2669_p5 }
 0x15b   : > { %p2673_p2 = por %p2672_p13, %p2671_p1 }
 0x15d   : > { %p2674_p4 = pnand %p2673_p2, %p2667_p0 }
 0x15f   : > { %2677 = shalt.err (!%p2674_p4)
}
 0x160   : > { %s2678_s10 = scalar_lea.vmem %s3142_s14, 128  ;;  %s2816_s3 = smov [#allocation8]  }
 0x161   : > { %p2679_p8 = scmp.ne.s32.totalorder %s3142_s14, %s2678_s10  ;;  %s2683_s26 = sshll.u32 %s2816_s3, 4  ;;  %s2684_s26 = int_to_ptr.vmem [resolvable:$false] %s2683_s26 }
 0x162   : > { %s2685_s13 = scalar_lea.vmem %s2684_s26, 256  ;;  %p2686_p10 = scmp.lt.s32.totalorder %s3142_s14, %s2684_s26 }
 0x163   : > { %p2681_p7 = pnand %p2679_p8, %p3675_p12  ;;  %p2687_p3 = scmp.lt.s32.totalorder %s2685_s13, %s2678_s10 }
 0x165   : > { %p2682_p9 = pneg %p2681_p7  ;;  %p2688_p5 = por %p2687_p3, %p2686_p10 }
 0x167   : > { %p2689_p11 = pnand %p2688_p5, %p2682_p9 }
 0x169   : > { %2692 = shalt.err (!%p2689_p11)
}
 0x16a   : > { %2206 = dma.hbm_to_vmem [thread:$0]  (!%p3676_p6), %s3138_s11, 128, %s3142_s14, %s3100_s5, %s3667_s20, %s3667_s20, %s3666_s7  }
 0x16b   : > { %s3677_s9 = sld [smem:[#allocation37_spill]] }
 0x171   : > { %p3678_p12 = scmp.ne.s32.totalorder %s3677_s9, 0 }
 0x172   : > { %s3301_s24 = sand.u32 (!%p3678_p12), 1, %s2783_s22   ;;  %p3679_p0 = scmp.ne.s32.totalorder (!%p3678_p12), %s3657_s30, 0 }
 0x173   : > { %543 = sbr.rel (%p3678_p12) target bundleno = 3803 (0xedb), region = 68  ;;  %s1953_s17 = sshll.u32 (!%p3678_p12), %s3301_s24, 4 }
 0x174   : > { %s546_s0 = scalar_lea.sflag (!%p3678_p12), [#allocation4], %s3301_s24  ;;  %s549_s28 = scalar_lea.vmem (!%p3678_p12), [#allocation3], %s1953_s17 }
 0x17a   : > { %2746 = dma.done.wait (%p3679_p0), %s546_s0, 256  }
 0x17b   : > { %2748 = vsyncadd (%p3679_p0), %s546_s0, 4294967040  ;;  %s3680_s5 = sld [smem:[#allocation36_spill]]  ;;  %s1954_s7 = sshll.u32 %s3301_s24, 3 }
 0x17c   : > { %s3313_s11 = scalar_lea.vmem [#allocation6], %s1954_s7 }
 0x181   : > { %s554_s14 = sand.u32 1, %s3680_s5  }
 0x182   : > { %s555_s20 = scalar_lea.sflag [#allocation7], %s554_s14 }
 0x183   : > { %2750 = dma.done.wait (%p3679_p0), %s555_s20, 256  }
 0x184   : > { %2752 = vsyncadd (%p3679_p0), %s555_s20, 4294967040  ;;  %s3319_s21 = scalar_lea.vmem [#allocation8], %s1954_s7  ;;  %p3681_p6 = scmp.eq.s32.totalorder %s3680_s5, 0 }
 0x186   : > { %2754 = dma.done.wait (%p3681_p6), [#allocation10], 272   ;;  %p3682_p1 = pmov %p3681_p6 }
 0x188   : > { %2756 = vsyncadd (%p3682_p1), [#allocation10], 4294967024  ;;  %p3683_p13 = pmov %p3682_p1 }
 0x189   : > { %p3684_p2 = pmov %p3682_p1 }
 0x18a   : > { %2758 = dma.done.wait (%p3683_p13), [#allocation13], 272  }
 0x18b   : > { %2760 = vsyncadd (%p3684_p2), [#allocation13], 4294967024  ;;  %p3685_p4 = pmov %p3682_p1 }
 0x18c   : > { %p3686_p8 = pmov %p3682_p1 }
 0x18d   : > { %2762 = dma.done.wait (%p3685_p4), [#allocation16], 32  }
 0x18e   : > { %2764 = vsyncadd (%p3686_p8), [#allocation16], 4294967264  ;;  %p3687_p7 = pmov %p3682_p1 }
 0x18f   : > { %p3688_p9 = pmov %p3682_p1 }
 0x190   : > { %2766 = dma.done.wait (%p3687_p7), [#allocation19], 272  }
 0x191   : > { %2768 = vsyncadd (%p3688_p9), [#allocation19], 4294967024  ;;  %p3689_p10 = pmov %p3682_p1 }
 0x192   : > { %p3690_p3 = pmov %p3682_p1 }
 0x193   : > { %2770 = dma.done.wait (%p3689_p10), [#allocation22], 16  }
 0x194   : > { %2772 = vsyncadd (%p3690_p3), [#allocation22], 4294967280  ;;  %vm662_vm0 = vcmask 261120   ;;  %v3341_v0 = vld [vmem:[%s549_s28] sm:$0xff]  ;;  %v3343_v1 = vld [vmem:[%s549_s28 + $0x8] sm:$0xff]  ;;  %v2817_v15 = vmov 0.0   ;;  %v792_v61 = vlaneseq }
 0x195   : > { %v663_v2 = vsel %vm662_vm0, %v3341_v0, 0.0  ;;  %v666_v3 = vsel %vm662_vm0, %v3343_v1, 0.0  ;;  %v2303_v14 = vld [vmem:[#allocation14] sm:$0xff]   ;;  %2037 = vmatprep.subr.bf16.mxu0 %v2817_v15  ;;  %2045 = vmatprep.subr.bf16.mxu1 %v2817_v15  ;;  %v2304_v16 = vld [vmem:[#allocation14 + $0x8] sm:$0xff]   ;;  %vm2818_vm1 = vmmov 0   ;;  %vm809_vm2 = vcmask 1043456  }
 0x196   : > { %664 = vadd.xlane.f32.xlu0 %v663_v2  ;;  %2038 = vmatpush3.bf16.msra.mxu0 %v2303_v14  ;;  %v1966_v25 = vld [vmem:[#allocation11] ss:$0 sm:$0xff]  ;;  %v1967_v29 = vld [vmem:[#allocation12] ss:$0 sm:$0xff]  ;;  %v803_v34 = vld [vmem:[#allocation9] sm:$0xf] }
 0x197   : > { %2041 = vmatprep.mubr.msk.bf16.mxu0 %vm2818_vm1, %v2817_v15  ;;  %2039 = vmatprep.subr.bf16.mxu0 %v2817_v15  ;;  %v811_v35 = vsel %vm809_vm2, %v803_v34, 0  ;;  %v1968_v36 = vld [vmem:[#allocation15] ss:$0 sm:$0xff]  ;;  %v1972_v40 = vld [vmem:[#allocation17] ss:$0 sm:$0xff]  ;;  %vm805_vm3 = vcmask 64512  }
 0x198   : > { %2047 = vmatprep.mubr.msk.bf16.mxu1 %vm2818_vm1, %v2817_v15  ;;  %2046 = vmatpush3.bf16.msra.mxu1 %v811_v35  ;;  %v1973_v41 = vld [vmem:[#allocation18] ss:$0 sm:$0xff]  ;;  %s2819_s30 = smov 256   ;;  %s2820_s23 = smov 264   ;;  %v3383_v62 = vshrl.u32 %v792_v61, 7  ;;  %v3385_v63 = vand.u32 127, %v792_v61 }
 0x199   : > { %2051 = vmatprep.subr.bf16.mxu1 %v2817_v15  ;;  %v2305_v45 = vld [vmem:[%s3313_s11] sm:$0xff]   ;;  %vm919_vm5 = vcmask 130048   ;;  %s2821_s15 = smov 120   ;;  %s2822_s18 = smov 112   ;;  %vm1203_vm7 = vcmask 130112   ;;  %vm1410_vm8 = vcmask 195712  }
 0x19a   : > { %667 = vadd.xlane.f32.xlu0 %v666_v3  ;;  %2040 = vmatpush3.bf16.msra.mxu0 %v2304_v16  ;;  %v870_v52 = vsel %vm805_vm3, %v2305_v45, 0  ;;  %v3388_v3 = vadd.s32 8, %v3383_v62  ;;  %vm915_vm4 = vcmp.gt.s32.totalorder %v3385_v63, %v3383_v62  ;;  %s2823_s29 = smov 104   ;;  %s2824_s27 = smov 8   ;;  %vm1617_vm9 = vcmask 261312  }
 0x19b   : > { %2057 = vmatprep.subr.bf16.mxu0 %v2817_v15  ;;  %s2825_s12 = smov 16   ;;  %s2826_s10 = smov 24  }
 0x19c   : > { %vm916_vm6 = vcmp.gt.s32.totalorder %v3385_v63, %v3388_v3  ;;  %s3691_s3 = sld [smem:[#allocation34_spill]]  ;;  %s3692_s26 = sld [smem:[#allocation39_spill]] }
 0x19d   : > { %s653_s9 = scalar_lea.vmem [#allocation23], %s1953_s17  ;;  %s3693_s14 = sld [smem:[#allocation50_spill]] }
 0x19e   : > { %s1712_s0 = sshll.u32 %s653_s9, 4  ;;  %s1697_s17 = scalar_lea.sflag [#allocation5], %s3301_s24  ;;  %s3535_s0 = int_to_ptr.vmem [resolvable:$true] %s1712_s0 }
 0x19f   : > { %s2693_s20 = scalar_lea.vmem %s3535_s0, 256 }
 0x1a0   : > { %p2694_p5 = scmp.ne.s32.totalorder %s3535_s0, %s2693_s20 }
 0x1a2   : > { %s2006_s13 = sshll.u32 %s3691_s3, 8  ;;  %p3694_p11 = scmp.ne.s32.totalorder %s3692_s26, 0 }
 0x1a3   : > { %s3532_s7 = scalar_lea.hbm %s3693_s14, %s2006_s13 }
 0x1a4   : > { %p2695_p12 = pnand %p2694_p5, %p3694_p11 }
 0x1a6   : > { %p2696_p0 = pneg %p2695_p12 }
 0x223   : > { %v665_v4 = vpop.xlane.xlu0 %664 }
 0x224   : > { %v670_v5 = vmul.f32 0.03125, %v665_v4 }
 0x226   : > { %v672_v6 = vsub.f32 %v3341_v0, %v670_v5 }
 0x227   : > { %v668_v7 = vpop.xlane.xlu0 %667 }
 0x228   : > { %v671_v8 = vmul.f32 0.03125, %v668_v7  ;;  %v674_v9 = vmul.f32 %v672_v6, %v672_v6 }
 0x22a   : > { %v673_v10 = vsub.f32 %v3343_v1, %v671_v8  ;;  %v676_v11 = vsel %vm662_vm0, %v674_v9, 0.0 }
 0x22b   : > { %677 = vadd.xlane.f32.xlu1 %v676_v11 }
 0x22c   : > { %v675_v12 = vmul.f32 %v673_v10, %v673_v10 }
 0x22e   : > { %v679_v13 = vsel %vm662_vm0, %v675_v12, 0.0 }
 0x22f   : > { %680 = vadd.xlane.f32.xlu1 %v679_v13  ;;  %v999_v13 = vld [vmem:[#allocation9 + $0x4] sm:$0xf] }
 0x230   : > { %v1007_v14 = vsel %vm809_vm2, %v999_v13, 0 }
 0x2b8   : > { %v678_v17 = vpop.xlane.xlu1 %677 }
 0x2b9   : > { %v682_v18 = vmul.f32 0.03125, %v678_v17 }
 0x2bb   : > { %v684_v19 = vadd.f32 1e-05, %v682_v18 }
 0x2bc   : > { %v681_v20 = vpop.xlane.xlu1 %680 }
 0x2bd   : > { %2315 = vrsqrt.f32 %v684_v19  ;;  %v683_v21 = vmul.f32 0.03125, %v681_v20 }
 0x2bf   : > { %v685_v22 = vadd.f32 1e-05, %v683_v21 }
 0x2c1   : > { %2317 = vrsqrt.f32 %v685_v22 }
 0x2c7   : > { %v2316_v23 = vpop.eup %2315 }
 0x2c8   : > { %v688_v24 = vmul.f32 %v2316_v23, %v672_v6 }
 0x2ca   : > { %v696_v28 = vmul.f32 %v1966_v25, %v688_v24 }
 0x2cb   : > { %v2318_v26 = vpop.eup %2317 }
 0x2cc   : > { %v689_v27 = vmul.f32 %v2318_v26, %v673_v10  ;;  %v704_v31 = vadd.f32 %v1967_v29, %v696_v28  ;;  %v2307_v28 = vld [vmem:[%s3319_s21] sm:$0xff]  }
 0x2ce   : > { %v697_v30 = vmul.f32 %v1966_v25, %v689_v27  ;;  %v2306_v27 = vld [vmem:[%s3313_s11] sm:$0xff]  }
 0x2d0   : > { %v705_v32 = vadd.f32 %v1967_v29, %v697_v30 }
 0x2d2   : > { %v710_v33 = vpack.c.bf16 %v705_v32, %v704_v31 }
 0x2d4   : > { %2042 = vmatmul.mubr.msk.bf16.vlgmr.msra.gmra.mrb[0].mxu0 %vm662_vm0, %v710_v33 }
 0x2d5   : > { %2059 = vmatprep.mubr.msk.bf16.mxu0 %vm2818_vm1, %v2817_v15  ;;  %2058 = vmatpush3.bf16.msra.mxu0 %v2307_v28 }
 0x2d6   : > { %2069 = vmatprep.subr.bf16.mxu0 %v2817_v15 }
 0x3a7   : > { %v767_v37 = vpop.f32.mrb[0].mxu0 }
 0x3a8   : > { %v768_v38 = vadd.f32 %v1968_v36, %v767_v37  ;;  %v2043_v39 = vpop.f32.mrb[1].mxu0 }
 0x3a9   : > { %v770_v42 = vpop.f32.mrb[2].mxu0 }
 0x3aa   : > { %v771_v43 = vadd.f32 %v1968_v36, %v770_v42  ;;  %v2044_v44 = vpop.f32.mrb[3].mxu0  ;;  %v781_v46 = vadd.f32 %v1972_v40, %v768_v38  ;;  %v790_v47 = vadd.f32 %v1973_v41, %v768_v38 }
 0x3ac   : > { %v782_v48 = vadd.f32 %v1972_v40, %v771_v43  ;;  %v791_v49 = vadd.f32 %v1973_v41, %v771_v43 }
 0x3ae   : > { %v3367_v50 = vpack.c.bf16 %v782_v48, %v781_v46  ;;  %v3369_v51 = vpack.c.bf16 %v791_v49, %v790_v47 }
 0x3b0   : > { %2048 = vmatmul.mubr.msk.bf16.vlgmr.msra.gmra.mrb[0].mxu1 %vm805_vm3, %v3369_v51 }
 0x3b1   : > { %2052 = vmatpush3.bf16.xpose.msra.mxu1 %v870_v52  ;;  %2053 = vmatprep.mubr.msk.bf16.mxu1 %vm2818_vm1, %v2817_v15 }
 0x3b2   : > { %2063 = vmatprep.subr.bf16.mxu1 %v2817_v15 }
 0x3b8   : > { %2054 = vmatmul.mubr.msk.bf16.vlgmr.msra.gmra.mrb[4].mxu1 %vm805_vm3, %v3367_v50 }
 0x3b9   : > { %2065 = vmatprep.mubr.msk.bf16.mxu1 %vm2818_vm1, %v2817_v15  ;;  %2064 = vmatpush3.bf16.msra.mxu1 %v1007_v14 }
 0x3ba   : > { %2075 = vmatprep.subr.bf16.mxu1 %v2817_v15 }
 0x483   : > { %v847_v53 = vpop.f32.mrb[0].mxu1 }
 0x484   : > { %855 = vrot.lane.b32.xlu0 %v847_v53, %s2819_s30  ;;  %v2049_v54 = vpop.f32.mrb[1].mxu1 }
 0x485   : > { %v850_v55 = vpop.f32.mrb[2].mxu1 }
 0x486   : > { %859 = vrot.lane.b32.xlu1 %v850_v55, %s2820_s23  ;;  %v2050_v56 = vpop.f32.mrb[3].mxu1 }
 0x48b   : > { %v906_v57 = vpop.f32.mrb[4].mxu1 }
 0x48c   : > { %v2055_v58 = vpop.f32.mrb[5].mxu1 }
 0x48d   : > { %v909_v59 = vpop.f32.mrb[6].mxu1 }
 0x48e   : > { %v2056_v60 = vpop.f32.mrb[7].mxu1 }
 0x4f6   : > { %v856_v2 = vpop.permute.xlu0 %855 }
 0x4f7   : > { %v907_v4 = vadd.f32 %v906_v57, %v856_v2 }
 0x4f8   : > { %v860_v5 = vpop.permute.xlu1 %859 }
 0x4f9   : > { %v913_v6 = vmul.f32 0.17677669, %v907_v4  ;;  %v910_v7 = vadd.f32 %v909_v59, %v860_v5  ;;  %v1208_v4 = vld [vmem:[#allocation9 + $0x8] sm:$0xf] }
 0x4fa   : > { %v1215_v5 = vsel %vm809_vm2, %v1208_v4, 0 }
 0x4fb   : > { %v914_v8 = vmul.f32 0.17677669, %v910_v7  ;;  %v917_v9 = vsel %vm915_vm4, -1e+09, %v913_v6  ;;  %v2308_v6 = vld [vmem:[%s3313_s11] sm:$0xff]  }
 0x4fc   : > { %v920_v10 = vsel %vm919_vm5, %v917_v9, -inf }
 0x4fd   : > { %921 = vmax.xlane.f32.xlu1 %v920_v10  ;;  %v918_v11 = vsel %vm916_vm6, -1e+09, %v914_v8 }
 0x4fe   : > { %v923_v12 = vsel %vm919_vm5, %v918_v11, -inf }
 0x4ff   : > { %924 = vmax.xlane.f32.xlu0 %v923_v12 }
 0x515   : > { %1001 = vrot.lane.b32.xlu0 %v3369_v51, %s2821_s15 }
 0x519   : > { %1058 = vrot.lane.b32.xlu0 %v3367_v50, %s2821_s15 }
 0x58a   : > { %v922_v16 = vpop.xlane.xlu1 %921 }
 0x58b   : > { %v926_v17 = vsub.f32 %v917_v9, %v922_v16 }
 0x58c   : > { %v925_v18 = vpop.xlane.xlu0 %924 }
 0x58d   : > { %v928_v19 = vmul.f32 1.442695, %v926_v17  ;;  %v927_v20 = vsub.f32 %v918_v11, %v925_v18 }
 0x58f   : > { %2319 = vpow2.f32 %v928_v19  ;;  %v930_v21 = vmul.f32 1.442695, %v927_v20  ;;  %v2309_v19 = vld [vmem:[%s3319_s21] sm:$0xff]  }
 0x590   : > { %v1002_v22 = vpop.permute.xlu0 %1001 }
 0x591   : > { %2321 = vpow2.f32 %v930_v21  ;;  %2066 = vmatmul.mubr.msk.bf16.vlgmr.msra.gmra.mrb[8].mxu1 %vm805_vm3, %v1002_v22 }
 0x592   : > { %2077 = vmatprep.mubr.msk.bf16.mxu1 %vm2818_vm1, %v2817_v15 }
 0x594   : > { %v1059_v38 = vpop.permute.xlu0 %1058 }
 0x599   : > { %v2320_v23 = vpop.eup %2319 }
 0x59a   : > { %v932_v24 = vsel %vm919_vm5, %v2320_v23, 0.0 }
 0x59b   : > { %v2322_v25 = vpop.eup %2321  ;;  %933 = vadd.xlane.f32.xlu1 %v932_v24 }
 0x59c   : > { %v935_v26 = vsel %vm919_vm5, %v2322_v25, 0.0 }
 0x59f   : > { %936 = vadd.xlane.f32.xlu1 %v935_v26 }
 0x5b0   : > { %1065 = vrot.lane.b32.xlu1 %v2306_v27, %s2821_s15 }
 0x628   : > { %v934_v29 = vpop.xlane.xlu1 %933 }
 0x629   : > { %2323 = vrcp.f32 %v934_v29 }
 0x62c   : > { %v937_v30 = vpop.xlane.xlu1 %936 }
 0x62d   : > { %2325 = vrcp.f32 %v937_v30 }
 0x630   : > { %v1066_v33 = vpop.permute.xlu1 %1065 }
 0x631   : > { %v1071_v36 = vsel %vm805_vm3, %v1066_v33, 0 }
 0x633   : > { %v2324_v31 = vpop.eup %2323 }
 0x634   : > { %v940_v34 = vmul.f32 %v2324_v31, %v2320_v23 }
 0x637   : > { %v2326_v32 = vpop.eup %2325 }
 0x638   : > { %v941_v35 = vmul.f32 %v2326_v32, %v2322_v25 }
 0x63a   : > { %v944_v37 = vpack.c.bf16 %v941_v35, %v940_v34 }
 0x63c   : > { %2060 = vmatmul.mubr.msk.bf16.vlgmr.msra.gmra.mrb[4].mxu0 %vm919_vm5, %v944_v37 }
 0x63d   : > { %2070 = vmatpush3.bf16.xpose.msra.mxu0 %v1071_v36  ;;  %2071 = vmatprep.mubr.msk.bf16.mxu0 %vm2818_vm1, %v2817_v15 }
 0x63e   : > { %2081 = vmatprep.subr.bf16.mxu0 %v2817_v15 }
 0x644   : > { %2072 = vmatmul.mubr.msk.bf16.vlgmr.msra.gmra.mrb[8].mxu0 %vm805_vm3, %v1059_v38 }
 0x645   : > { %2083 = vmatprep.mubr.msk.bf16.mxu0 %vm2818_vm1, %v2817_v15  ;;  %2082 = vmatpush3.bf16.msra.mxu0 %v1215_v5 }
 0x646   : > { %2093 = vmatprep.subr.bf16.mxu0 %v2817_v15 }
 0x664   : > { %v1043_v39 = vpop.f32.mrb[8].mxu1 }
 0x665   : > { %1051 = vrot.lane.b32.xlu1 %v1043_v39, %s2819_s30  ;;  %v2067_v40 = vpop.f32.mrb[9].mxu1 }
 0x666   : > { %v1046_v41 = vpop.f32.mrb[10].mxu1 }
 0x667   : > { %1055 = vrot.lane.b32.xlu0 %v1046_v41, %s2820_s23  ;;  %v2068_v42 = vpop.f32.mrb[11].mxu1 }
 0x6d7   : > { %v1052_v47 = vpop.permute.xlu1 %1051 }
 0x6d9   : > { %v1056_v53 = vpop.permute.xlu0 %1055 }
 0x70f   : > { %v988_v43 = vpop.f32.mrb[4].mxu0 }
 0x710   : > { %995 = vst.msk [vmem:[#allocation2] sm:$0xff] %vm805_vm3, %v988_v43  ;;  %v2061_v44 = vpop.f32.mrb[5].mxu0 }
 0x711   : > { %v991_v45 = vpop.f32.mrb[6].mxu0 }
 0x712   : > { %996 = vst.msk [vmem:[#allocation2 + $0x8] sm:$0xff] %vm805_vm3, %v991_v45  ;;  %v2062_v46 = vpop.f32.mrb[7].mxu0 }
 0x717   : > { %v1107_v48 = vpop.f32.mrb[8].mxu0 }
 0x718   : > { %v1108_v49 = vadd.f32 %v1107_v48, %v1052_v47  ;;  %v2073_v52 = vpop.f32.mrb[9].mxu0 }
 0x719   : > { %v1110_v54 = vpop.f32.mrb[10].mxu0 }
 0x71a   : > { %v1114_v55 = vmul.f32 0.17677669, %v1108_v49  ;;  %v1111_v56 = vadd.f32 %v1110_v54, %v1056_v53  ;;  %v2074_v57 = vpop.f32.mrb[11].mxu0 }
 0x71b   : > { %v2310_v57 = vld [vmem:[%s3313_s11] sm:$0xff]   ;;  %s2827_s11 = smov [#allocation23]  }
 0x71c   : > { %v1115_v58 = vmul.f32 0.17677669, %v1111_v56  ;;  %v1116_v59 = vsel %vm915_vm4, -1e+09, %v1114_v55  ;;  %v1415_v55 = vld [vmem:[#allocation9 + $0xc] sm:$0xf] }
 0x71d   : > { %v1118_v60 = vsel %vm919_vm5, %v1116_v59, -inf  ;;  %v1422_v56 = vsel %vm809_vm2, %v1415_v55, 0 }
 0x71e   : > { %1119 = vmax.xlane.f32.xlu1 %v1118_v60  ;;  %v1117_v61 = vsel %vm916_vm6, -1e+09, %v1115_v58 }
 0x71f   : > { %v1121_v2 = vsel %vm919_vm5, %v1117_v61, -inf }
 0x720   : > { %1122 = vmax.xlane.f32.xlu0 %v1121_v2 }
 0x736   : > { %1209 = vrot.lane.b32.xlu0 %v3369_v51, %s2822_s18 }
 0x73a   : > { %1272 = vrot.lane.b32.xlu0 %v2308_v6, %s2822_s18 }
 0x73e   : > { %1265 = vrot.lane.b32.xlu0 %v3367_v50, %s2822_s18 }
 0x7ab   : > { %v1120_v7 = vpop.xlane.xlu1 %1119 }
 0x7ac   : > { %v1124_v8 = vsub.f32 %v1116_v59, %v1120_v7 }
 0x7ad   : > { %v1123_v9 = vpop.xlane.xlu0 %1122 }
 0x7ae   : > { %v1126_v10 = vmul.f32 1.442695, %v1124_v8  ;;  %v1125_v11 = vsub.f32 %v1117_v61, %v1123_v9  ;;  %v2311_v8 = vld [vmem:[%s3319_s21] sm:$0xff]  }
 0x7b0   : > { %2327 = vpow2.f32 %v1126_v10  ;;  %v1128_v12 = vmul.f32 1.442695, %v1125_v11 }
 0x7b1   : > { %v1210_v13 = vpop.permute.xlu0 %1209 }
 0x7b2   : > { %2329 = vpow2.f32 %v1128_v12  ;;  %2084 = vmatmul.mubr.msk.bf16.vlgmr.msra.gmra.mrb[12].mxu0 %vm805_vm3, %v1210_v13 }
 0x7b3   : > { %2095 = vmatprep.mubr.msk.bf16.mxu0 %vm2818_vm1, %v2817_v15 }
 0x7b5   : > { %v1273_v27 = vpop.permute.xlu0 %1272 }
 0x7b6   : > { %v1278_v28 = vsel %vm805_vm3, %v1273_v27, 0 }
 0x7b9   : > { %v1266_v30 = vpop.permute.xlu0 %1265 }
 0x7ba   : > { %v2328_v14 = vpop.eup %2327 }
 0x7bb   : > { %v1130_v16 = vsel %vm919_vm5, %v2328_v14, 0.0 }
 0x7bc   : > { %v2330_v17 = vpop.eup %2329  ;;  %1131 = vadd.xlane.f32.xlu1 %v1130_v16 }
 0x7bd   : > { %v1133_v18 = vsel %vm919_vm5, %v2330_v17, 0.0 }
 0x7c0   : > { %1134 = vadd.xlane.f32.xlu1 %v1133_v18 }
 0x7d1   : > { %1148 = vrot.lane.b32.xlu1 %v2309_v19, %s2821_s15 }
 0x849   : > { %v1132_v20 = vpop.xlane.xlu1 %1131 }
 0x84a   : > { %2331 = vrcp.f32 %v1132_v20 }
 0x84d   : > { %v1135_v21 = vpop.xlane.xlu1 %1134 }
 0x84e   : > { %2333 = vrcp.f32 %v1135_v21 }
 0x851   : > { %v1149_v22 = vpop.permute.xlu1 %1148 }
 0x852   : > { %2076 = vmatpush3.bf16.msra.mxu1 %v1149_v22 }
 0x853   : > { %2087 = vmatprep.subr.bf16.mxu1 %v2817_v15 }
 0x854   : > { %v2332_v23 = vpop.eup %2331 }
 0x855   : > { %v1138_v25 = vmul.f32 %v2332_v23, %v2328_v14 }
 0x858   : > { %v2334_v24 = vpop.eup %2333 }
 0x859   : > { %v1139_v26 = vmul.f32 %v2334_v24, %v2330_v17 }
 0x85b   : > { %v1142_v29 = vpack.c.bf16 %v1139_v26, %v1138_v25 }
 0x85d   : > { %2078 = vmatmul.mubr.msk.bf16.vlgmr.msra.gmra.mrb[12].mxu1 %vm919_vm5, %v1142_v29 }
 0x85e   : > { %2088 = vmatpush3.bf16.xpose.msra.mxu1 %v1278_v28  ;;  %2089 = vmatprep.mubr.msk.bf16.mxu1 %vm2818_vm1, %v2817_v15 }
 0x85f   : > { %2099 = vmatprep.subr.bf16.mxu1 %v2817_v15 }
 0x865   : > { %2090 = vmatmul.mubr.msk.bf16.vlgmr.msra.gmra.mrb[16].mxu1 %vm805_vm3, %v1266_v30 }
 0x866   : > { %2101 = vmatprep.mubr.msk.bf16.mxu1 %vm2818_vm1, %v2817_v15  ;;  %2100 = vmatpush3.bf16.msra.mxu1 %v1422_v56 }
 0x867   : > { %2111 = vmatprep.subr.bf16.mxu1 %v2817_v15 }
 0x885   : > { %v1251_v31 = vpop.f32.mrb[12].mxu0 }
 0x886   : > { %1259 = vrot.lane.b32.xlu1 %v1251_v31, %s2819_s30  ;;  %v2085_v32 = vpop.f32.mrb[13].mxu0 }
 0x887   : > { %v1254_v33 = vpop.f32.mrb[14].mxu0 }
 0x888   : > { %1263 = vrot.lane.b32.xlu0 %v1254_v33, %s2820_s23  ;;  %v2086_v34 = vpop.f32.mrb[15].mxu0 }
 0x8f8   : > { %v1260_v39 = vpop.permute.xlu1 %1259 }
 0x8fa   : > { %v1264_v43 = vpop.permute.xlu0 %1263 }
 0x930   : > { %v3463_v35 = vpop.f32.mrb[12].mxu1 }
 0x931   : > { %v2079_v36 = vpop.f32.mrb[13].mxu1 }
 0x932   : > { %v3465_v37 = vpop.f32.mrb[14].mxu1 }
 0x933   : > { %v2080_v38 = vpop.f32.mrb[15].mxu1 }
 0x938   : > { %v1314_v40 = vpop.f32.mrb[16].mxu1 }
 0x939   : > { %v1315_v41 = vadd.f32 %v1314_v40, %v1260_v39  ;;  %v2091_v42 = vpop.f32.mrb[17].mxu1 }
 0x93a   : > { %v1317_v44 = vpop.f32.mrb[18].mxu1 }
 0x93b   : > { %v1321_v45 = vmul.f32 0.17677669, %v1315_v41  ;;  %v1318_v46 = vadd.f32 %v1317_v44, %v1264_v43  ;;  %v2092_v47 = vpop.f32.mrb[19].mxu1 }
 0x93d   : > { %v1322_v48 = vmul.f32 0.17677669, %v1318_v46  ;;  %v1323_v49 = vsel %vm915_vm4, -1e+09, %v1321_v45  ;;  %v2312_v45 = vld [vmem:[%s3319_s21] sm:$0xff]   ;;  %s2697_s21 = sshll.u32 %s2827_s11, 4  ;;  %s2698_s21 = int_to_ptr.vmem [resolvable:$false] %s2697_s21 }
 0x93e   : > { %v1325_v52 = vsel %vm919_vm5, %v1323_v49, -inf  ;;  %p2700_p6 = scmp.lt.s32.totalorder %s3535_s0, %s2698_s21 }
 0x93f   : > { %1326 = vmax.xlane.f32.xlu1 %v1325_v52  ;;  %v1324_v53 = vsel %vm916_vm6, -1e+09, %v1322_v48 }
 0x940   : > { %v1328_v54 = vsel %vm919_vm5, %v1324_v53, -inf }
 0x941   : > { %1329 = vmax.xlane.f32.xlu0 %v1328_v54 }
 0x957   : > { %1416 = vrot.lane.b32.xlu0 %v3369_v51, %s2823_s29 }
 0x95b   : > { %1479 = vrot.lane.b32.xlu0 %v2310_v57, %s2823_s29 }
 0x95f   : > { %1472 = vrot.lane.b32.xlu0 %v3367_v50, %s2823_s29 }
 0x9cc   : > { %v1327_v58 = vpop.xlane.xlu1 %1326 }
 0x9cd   : > { %v1331_v59 = vsub.f32 %v1323_v49, %v1327_v58 }
 0x9ce   : > { %v1330_v60 = vpop.xlane.xlu0 %1329 }
 0x9cf   : > { %v1333_v61 = vmul.f32 1.442695, %v1331_v59  ;;  %v1332_v2 = vsub.f32 %v1324_v53, %v1330_v60 }
 0x9d1   : > { %2335 = vpow2.f32 %v1333_v61  ;;  %v1335_v4 = vmul.f32 1.442695, %v1332_v2 }
 0x9d2   : > { %v1417_v5 = vpop.permute.xlu0 %1416 }
 0x9d3   : > { %2337 = vpow2.f32 %v1335_v4  ;;  %2102 = vmatmul.mubr.msk.bf16.vlgmr.msra.gmra.mrb[20].mxu1 %vm805_vm3, %v1417_v5 }
 0x9d4   : > { %2113 = vmatprep.mubr.msk.bf16.mxu1 %vm2818_vm1, %v2817_v15 }
 0x9d6   : > { %v1480_v17 = vpop.permute.xlu0 %1479 }
 0x9d7   : > { %v1485_v18 = vsel %vm805_vm3, %v1480_v17, 0 }
 0x9da   : > { %v1473_v20 = vpop.permute.xlu0 %1472 }
 0x9db   : > { %v2336_v51 = vpop.eup %2335 }
 0x9dc   : > { %v1337_v6 = vsel %vm919_vm5, %v2336_v51, 0.0 }
 0x9dd   : > { %v2338_v7 = vpop.eup %2337  ;;  %1338 = vadd.xlane.f32.xlu1 %v1337_v6  ;;  %v2313_v6 = vld [vmem:[#allocation20] sm:$0xff]  }
 0x9de   : > { %v1340_v50 = vsel %vm919_vm5, %v2338_v7, 0.0 }
 0x9e1   : > { %1341 = vadd.xlane.f32.xlu1 %v1340_v50 }
 0x9f2   : > { %1355 = vrot.lane.b32.xlu1 %v2311_v8, %s2822_s18 }
 0xa6a   : > { %v1339_v9 = vpop.xlane.xlu1 %1338 }
 0xa6b   : > { %2339 = vrcp.f32 %v1339_v9 }
 0xa6e   : > { %v1342_v10 = vpop.xlane.xlu1 %1341 }
 0xa6f   : > { %2341 = vrcp.f32 %v1342_v10 }
 0xa72   : > { %v1356_v11 = vpop.permute.xlu1 %1355 }
 0xa73   : > { %2094 = vmatpush3.bf16.msra.mxu0 %v1356_v11 }
 0xa74   : > { %2105 = vmatprep.subr.bf16.mxu0 %v2817_v15 }
 0xa75   : > { %v2340_v12 = vpop.eup %2339 }
 0xa76   : > { %v1345_v14 = vmul.f32 %v2340_v12, %v2336_v51 }
 0xa79   : > { %v2342_v13 = vpop.eup %2341 }
 0xa7a   : > { %v1346_v16 = vmul.f32 %v2342_v13, %v2338_v7  ;;  %v2314_v7 = vld [vmem:[#allocation20 + $0x8] sm:$0xff]  }
 0xa7c   : > { %v1349_v19 = vpack.c.bf16 %v1346_v16, %v1345_v14  ;;  %v1997_v16 = vld [vmem:[#allocation21] ss:$0 sm:$0xff] }
 0xa7e   : > { %2096 = vmatmul.mubr.msk.bf16.vlgmr.msra.gmra.mrb[16].mxu0 %vm919_vm5, %v1349_v19 }
 0xa7f   : > { %2106 = vmatpush3.bf16.xpose.msra.mxu0 %v1485_v18  ;;  %2107 = vmatprep.mubr.msk.bf16.mxu0 %vm2818_vm1, %v2817_v15 }
 0xa80   : > { %2117 = vmatprep.subr.bf16.mxu0 %v2817_v15 }
 0xa86   : > { %2108 = vmatmul.mubr.msk.bf16.vlgmr.msra.gmra.mrb[20].mxu0 %vm805_vm3, %v1473_v20 }
 0xa87   : > { %2121 = vmatprep.mubr.msk.bf16.mxu0 %vm2818_vm1, %v2817_v15  ;;  %2118 = vmatpush3.bf16.msra.mxu0 %v2313_v6 }
 0xa88   : > { %2119 = vmatprep.subr.bf16.mxu0 %v2817_v15 }
 0xa8b   : > { %2120 = vmatpush3.bf16.msra.mxu0 %v2314_v7 }
 0xaa6   : > { %v1458_v21 = vpop.f32.mrb[20].mxu1 }
 0xaa7   : > { %1466 = vrot.lane.b32.xlu1 %v1458_v21, %s2819_s30  ;;  %v2103_v22 = vpop.f32.mrb[21].mxu1  ;;  %s2699_s30 = scalar_lea.vmem %s2698_s21, 512 }
 0xaa8   : > { %v1461_v23 = vpop.f32.mrb[22].mxu1  ;;  %p2701_p1 = scmp.lt.s32.totalorder %s2699_s30, %s2693_s20 }
 0xaa9   : > { %1470 = vrot.lane.b32.xlu0 %v1461_v23, %s2820_s23  ;;  %v2104_v24 = vpop.f32.mrb[23].mxu1 }
 0xaaa   : > { %p2702_p13 = por %p2701_p1, %p2700_p6 }
 0xaac   : > { %p2703_p2 = pnand %p2702_p13, %p2696_p0 }
 0xb19   : > { %v1467_v29 = vpop.permute.xlu1 %1466 }
 0xb1b   : > { %v1471_v33 = vpop.permute.xlu0 %1470 }
 0xb51   : > { %v1395_v25 = vpop.f32.mrb[16].mxu0 }
 0xb52   : > { %v2097_v26 = vpop.f32.mrb[17].mxu0 }
 0xb53   : > { %v1398_v27 = vpop.f32.mrb[18].mxu0 }
 0xb54   : > { %v2098_v28 = vpop.f32.mrb[19].mxu0 }
 0xb59   : > { %v1521_v30 = vpop.f32.mrb[20].mxu0 }
 0xb5a   : > { %v1522_v31 = vadd.f32 %v1521_v30, %v1467_v29  ;;  %v2109_v32 = vpop.f32.mrb[21].mxu0 }
 0xb5b   : > { %v1524_v34 = vpop.f32.mrb[22].mxu0 }
 0xb5c   : > { %v1528_v36 = vmul.f32 0.17677669, %v1522_v31  ;;  %v1525_v38 = vadd.f32 %v1524_v34, %v1471_v33  ;;  %v2110_v39 = vpop.f32.mrb[23].mxu0 }
 0xb5e   : > { %v1529_v40 = vmul.f32 0.17677669, %v1525_v38  ;;  %v1530_v41 = vsel %vm915_vm4, -1e+09, %v1528_v36 }
 0xb5f   : > { %v1532_v42 = vsel %vm919_vm5, %v1530_v41, -inf }
 0xb60   : > { %1533 = vmax.xlane.f32.xlu1 %v1532_v42  ;;  %v1531_v43 = vsel %vm916_vm6, -1e+09, %v1529_v40 }
 0xb61   : > { %v1535_v44 = vsel %vm919_vm5, %v1531_v43, -inf }
 0xb62   : > { %1536 = vmax.xlane.f32.xlu0 %v1535_v44 }
 0xb71   : > { %1562 = vrot.lane.b32.xlu1 %v2312_v45, %s2823_s29 }
 0xb75   : > { %1199 = vrot.lane.b32.xlu1 %v3465_v37, %s2824_s27 }
 0xb79   : > { %1404 = vrot.lane.b32.xlu1 %v1395_v25, %s2825_s12 }
 0xb7d   : > { %1406 = vrot.lane.b32.xlu1 %v1398_v27, %s2825_s12 }
 0xbed   : > { %v1534_v62 = vpop.xlane.xlu1 %1533 }
 0xbee   : > { %v1538_v46 = vsub.f32 %v1530_v41, %v1534_v62 }
 0xbef   : > { %v1537_v47 = vpop.xlane.xlu0 %1536 }
 0xbf0   : > { %v1540_v48 = vmul.f32 1.442695, %v1538_v46  ;;  %v1539_v49 = vsub.f32 %v1531_v43, %v1537_v47 }
 0xbf1   : > { %v1563_v63 = vpop.permute.xlu1 %1562 }
 0xbf2   : > { %2343 = vpow2.f32 %v1540_v48  ;;  %v1542_v3 = vmul.f32 1.442695, %v1539_v49  ;;  %2112 = vmatpush3.bf16.msra.mxu1 %v1563_v63 }
 0xbf4   : > { %2345 = vpow2.f32 %v1542_v3 }
 0xbf5   : > { %v1200_v52 = vpop.permute.xlu1 %1199 }
 0xbf6   : > { %1205 = vst.msk [vmem:[#allocation2 + $0x8] sm:$0xff] %vm1203_vm7, %v1200_v52 }
 0xbf9   : > { %v1405_v53 = vpop.permute.xlu1 %1404 }
 0xbfc   : > { %v2344_v37 = vpop.eup %2343 }
 0xbfd   : > { %v1407_v54 = vpop.permute.xlu1 %1406  ;;  %v1544_v55 = vsel %vm919_vm5, %v2344_v37, 0.0 }
 0xbfe   : > { %v2346_v56 = vpop.eup %2345  ;;  %1412 = vst.msk [vmem:[#allocation2 + $0x8] sm:$0xff] %vm1410_vm8, %v1407_v54  ;;  %1545 = vadd.xlane.f32.xlu0 %v1544_v55 }
 0xbff   : > { %v1547_v57 = vsel %vm919_vm5, %v2346_v56, 0.0 }
 0xc02   : > { %1548 = vadd.xlane.f32.xlu0 %v1547_v57 }
 0xc18   : > { %1197 = vrot.lane.b32.xlu0 %v3463_v35, %s2824_s27 }
 0xc8b   : > { %v1546_v58 = vpop.xlane.xlu0 %1545 }
 0xc8c   : > { %2347 = vrcp.f32 %v1546_v58 }
 0xc8f   : > { %v1549_v59 = vpop.xlane.xlu0 %1548 }
 0xc90   : > { %2349 = vrcp.f32 %v1549_v59 }
 0xc93   : > { %v1198_v60 = vpop.permute.xlu0 %1197 }
 0xc94   : > { %1204 = vst.msk [vmem:[#allocation2] sm:$0xff] %vm1203_vm7, %v1198_v60 }
 0xc95   : > { %1411 = vst.msk [vmem:[#allocation2] sm:$0xff] %vm1410_vm8, %v1405_v53 }
 0xc96   : > { %v2348_v61 = vpop.eup %2347 }
 0xc97   : > { %v1552_v4 = vmul.f32 %v2348_v61, %v2344_v37 }
 0xc9a   : > { %v2350_v2 = vpop.eup %2349 }
 0xc9b   : > { %v1553_v5 = vmul.f32 %v2350_v2, %v2346_v56 }
 0xc9d   : > { %v1556_v51 = vpack.c.bf16 %v1553_v5, %v1552_v4 }
 0xc9f   : > { %2114 = vmatmul.mubr.msk.bf16.vlgmr.msra.gmra.mrb[24].mxu1 %vm919_vm5, %v1556_v51 }
 0xd72   : > { %v1602_v35 = vpop.f32.mrb[24].mxu1 }
 0xd73   : > { %1611 = vrot.lane.b32.xlu0 %v1602_v35, %s2826_s10  ;;  %v2115_v50 = vpop.f32.mrb[25].mxu1 }
 0xd74   : > { %v1605_v8 = vpop.f32.mrb[26].mxu1 }
 0xd75   : > { %1613 = vrot.lane.b32.xlu1 %v1605_v8, %s2826_s10  ;;  %v2116_v9 = vpop.f32.mrb[27].mxu1 }
 0xde5   : > { %v1612_v10 = vpop.permute.xlu0 %1611 }
 0xde6   : > { %1618 = vst.msk [vmem:[#allocation2] sm:$0xff] %vm1617_vm9, %v1612_v10 }
 0xde7   : > { %v1614_v11 = vpop.permute.xlu1 %1613 }
 0xde8   : > { %1619 = vst.msk [vmem:[#allocation2 + $0x8] sm:$0xff] %vm1617_vm9, %v1614_v11 }
 0xded   : > { %v1620_v12 = vld [vmem:[#allocation2] sm:$0xff] }
 0xdef   : > { %v1621_v13 = vld [vmem:[#allocation2 + $0x8] sm:$0xff] }
 0xdf0   : > { %v1626_v14 = vpack.c.bf16 %v1621_v13, %v1620_v12 }
 0xdf2   : > { %2122 = vmatmul.mubr.msk.bf16.vlgmr.msra.gmra.mrb[24].mxu0 %vm662_vm0, %v1626_v14 }
 0xec5   : > { %v1676_v15 = vpop.f32.mrb[24].mxu0 }
 0xec6   : > { %v1683_v17 = vadd.f32 %v1676_v15, %v3341_v0  ;;  %v2123_v18 = vpop.f32.mrb[25].mxu0 }
 0xec7   : > { %v1679_v19 = vpop.f32.mrb[26].mxu0 }
 0xec8   : > { %v1692_v20 = vadd.f32 %v1997_v16, %v1683_v17  ;;  %v1684_v21 = vadd.f32 %v1679_v19, %v3343_v1  ;;  %v2124_v22 = vpop.f32.mrb[27].mxu0 }
 0xeca   : > { %1694 = vst.msk [vmem:[%s653_s9] sm:$0xff] %vm662_vm0, %v1692_v20  ;;  %v1693_v23 = vadd.f32 %v1997_v16, %v1684_v21 }
 0xecc   : > { %1695 = vst.msk [vmem:[%s653_s9 + $0x8] sm:$0xff] %vm662_vm0, %v1693_v23 }
 0xecd   : > { %2706 = shalt.err (!%p2703_p2)
}
 0xece   : > { %s2707_s23 = scalar_lea.hbm %s3532_s7, 256  ;;  %s2711_s29 = scalar_lea.hbm %s3693_s14, 512 }
 0xecf   : > { %p2708_p4 = scmp.ne.s32.totalorder %s3532_s7, %s2707_s23  ;;  %p2712_p9 = scmp.lt.u32.totalorder %s3532_s7, %s3693_s14 }
 0xed0   : > { %p2713_p10 = scmp.lt.u32.totalorder %s2711_s29, %s2707_s23  ;;  %p2715_p5 = scmp.lt.u32.totalorder %s2707_s23, %s3532_s7 }
 0xed1   : > { %p2709_p8 = pnand %p2708_p4, %p3694_p11 }
 0xed2   : > { %p2714_p3 = por %p2713_p10, %p2712_p9 }
 0xed3   : > { %p2710_p7 = pneg %p2709_p8 }
 0xed4   : > { %p2716_p12 = por %p2715_p5, %p2714_p3 }
 0xed6   : > { %p2717_p0 = pnand %p2716_p12, %p2710_p7 }
 0xed8   : > { %2720 = shalt.err (!%p2717_p0)
}
 0xed9   : > { %s2828_s3 = smov 128  }
 0xeda   : > { %2167 = dma.vmem_to_hbm [thread:$0]  (%p3694_p11), %s3535_s0, 256, %s3532_s7, %s1697_s17, %s2828_s3, %s2828_s3, %s2824_s27  }
 0xedb PF: > { %s3695_s13 = sld [smem:[#allocation32_spill]]  ;;  %s3696_s9 = sld [smem:[#allocation41_spill]] }
 0xedc   : > { %s3697_s28 = sld [smem:[#allocation35_spill]] }
 0xee1   : > { %s1727_s5 = sand.u32 1, %s3695_s13   ;;  %p3698_p6 = scmp.ne.s32.totalorder %s3696_s9, 0 }
 0xee2   : > { %p3699_p1 = scmp.ge.s32.totalorder %s3697_s28, 2  ;;  %s1728_s20 = scalar_lea.sflag [#allocation5], %s1727_s5 }
 0xee4   : > { %p2208_p13 = pnand %p3699_p1, %p3698_p6 }
 0xee6   : > { %2774 = dma.done.wait (!%p2208_p13), %s1728_s20, 256  }
 0xee7   : > { %2776 = vsyncadd (!%p2208_p13), %s1728_s20, 4294967040  ;;  %s36_s26 = sadd.s32 1, %s3697_s28   ;;  %s3700_s11 = sld [smem:[#allocation33_spill]] }
 0xee8   : > { %p33_p2 = scmp.ge.s32.totalorder %s36_s26, 4   ;;  %s3701_s23 = sld [smem:[#allocation40_spill]] }
 0xee9   : > { %s3702_s30 = sld [smem:[#allocation38_spill]]  ;;  %s3703_s21 = smov %s2783_s22 }
 0xeea   : > { %s3705_s24 = smov %s2795_s25  ;;  %35 = sbr.rel (!%p33_p2) target bundleno = 23 (0x17), region = 174 }
 0xeed   : > { %s3704_s22 = smov %s3700_s11 }
 0xeef   : > { %s3706_s25 = smov %s3702_s30 }
 0xef1   :  { %1733 = vsyncpa [#allocation4], 1 }
 0xef2   :  { %1735 = vsyncpa [#allocation4 + $0x1], 1 }
 0xef3   :  { %1736 = vsyncpa [#allocation7], 1 }
 0xef4   :  { %1738 = vsyncpa [#allocation7 + $0x1], 1 }
 0xef5   :  { %1739 = vsyncpa [#allocation10], 1 }
 0xef6   :  { %1740 = vsyncpa [#allocation13], 1 }
 0xef7   :  { %1741 = vsyncpa [#allocation16], 1 }
 0xef8   :  { %1742 = vsyncpa [#allocation19], 1 }
 0xef9   :  { %1743 = vsyncpa [#allocation22], 1 }
 0xefa   :  { %1744 = vsyncpa [#allocation5], 1 }
 0xefb   :  { %1746 = vsyncpa [#allocation5 + $0x1], 1 }

// kernel: transformer_layer.9
= control target key start
LH: loop header
LB: loop body
LE: loop exit
PB: predicated region body
PF: predicated region fallthrough
CT: control target
= control target key end

     0   :  { %s2037_s0 = inlined_call_operand.hbm [shape: f32[2,16,32], index: 0, kind: input, shape index: {}]   ;;  %s2038_s1 = inlined_call_operand.hbm [shape: f32[1,32], index: 1, kind: input, shape index: {}]   ;;  %s2039_s2 = inlined_call_operand.hbm [shape: f32[1,32], index: 2, kind: input, shape index: {}]   ;;  %s2040_s3 = inlined_call_operand.hbm [shape: bf16[32,128], index: 3, kind: input, shape index: {}]   ;;  %s2041_s4 = inlined_call_operand.hbm [shape: f32[1,128], index: 4, kind: input, shape index: {}]   ;;  %s2042_s5 = inlined_call_operand.hbm [shape: bf16[128,32], index: 5, kind: input, shape index: {}]   ;;  %s2043_s6 = inlined_call_operand.hbm [shape: f32[1,32], index: 6, kind: input, shape index: {}]   ;;  %s2044_s7 = inlined_call_operand.hbm [shape: f32[1,32], index: 7, kind: input, shape index: {}]   ;;  %s2045_s8 = inlined_call_operand.hbm [shape: f32[1,32], index: 8, kind: input, shape index: {}]   ;;  %s2046_s9 = inlined_call_operand.hbm [shape: f32[2,16,32], index: 9, kind: output, shape index: {}]  }
   0x1   :  { %2053 = sst [smem:[#allocation25_spill]] %s2038_s1 }
   0x2   :  { %2054 = sst [smem:[#allocation26_spill]] %s2040_s3 }
   0x3   :  { %2055 = sst [smem:[#allocation27_spill]] %s2046_s9 }
   0x4   :  { %14 = vsyncpa [#allocation3], 0 }
   0x5   :  { %16 = vsyncpa [#allocation3 + $0x1], 0 }
   0x6   :  { %17 = vsyncpa [#allocation6], 0 }
   0x7   :  { %18 = vsyncpa [#allocation9], 0 }
   0x8   :  { %19 = vsyncpa [#allocation12], 0 }
   0x9   :  { %20 = vsyncpa [#allocation15], 0 }
   0xa   :  { %21 = vsyncpa [#allocation4], 0 }
   0xb   :  { %23 = vsyncpa [#allocation4 + $0x1], 0  ;;  %s1639_s30 = smov 0   ;;  %s1641_s10 = smov 0  }
   0xc   :  { %s1643_s11 = smov 0   ;;  %s1645_s12 = smov 0  }
   0xd   :  { %s1647_s13 = smov 0   ;;  %s1649_s14 = smov 0  }
   0xe LB: > { %2056 = sst [smem:[#allocation24_spill]] %s1561_s12  ;;  %s2050_s15 = sadd.s32 4294967295, %s1569_s14   ;;  %s1569_s14 = sphi %s1649_s14, %s29_s14   ;;  %s1565_s13 = sphi %s1647_s13, %s2081_s13   ;;  %s1561_s12 = sphi %s1645_s12, %s2080_s12   ;;  %s1557_s11 = sphi %s1643_s11, %s2079_s11   ;;  %s1553_s10 = sphi %s1641_s10, %s2078_s10   ;;  %s1549_s30 = sphi %s1639_s30, %s2077_s30  }
   0xf   : > { %p950_p0 = scmp.ge.s32.totalorder %s1569_s14, 1  ;;  %p1673_p1 = scmp.eq.s32.totalorder %s2050_s15, 0 }
  0x10   : > { %p270_p2 = scmp.lt.s32.totalorder %s1569_s14, 3  ;;  %s1571_s18 = smov [#allocation5]  }
  0x11   : > { %s2057_s16 = scalar_select %p1673_p1, 1, 0 }
  0x12   : > { %p1678_p3 = pnand %p950_p0, %p270_p2  ;;  %s283_s19 = sshll.u32 %s1571_s18, 4  ;;  %s284_s19 = int_to_ptr.vmem [resolvable:$true] %s283_s19 }
  0x13   : > { %s1572_s20 = smov [#allocation8]   ;;  %s1573_s23 = smov [#allocation11]  }
  0x14   : > { %s2058_s17 = scalar_select %p1678_p3, 1, 0 }
  0x15   : > { %p1076_p5 = pneg %p1678_p3  ;;  %s304_s21 = sshll.u32 %s1572_s20, 4  ;;  %s1691_s21 = int_to_ptr.vmem [resolvable:$true] %s304_s21 }
  0x16   : > { %s1693_s24 = sshll.u32 %s1573_s23, 4  ;;  %s2060_s1 = sld [smem:[#allocation25_spill]]  ;;  %s329_s24 = int_to_ptr.vmem [resolvable:$true] %s1693_s24 }
  0x17   : > { %p1687_p6 = pnand %p1076_p5, %p1673_p1 }
  0x19   : > { %p1703_p8 = pneg %p1687_p6 }
  0x1c   : > { %s1217_s27 = scalar_lea.hbm %s2060_s1, 16 }
  0x1d   : > { %p1218_p7 = scmp.ne.s32.totalorder %s2060_s1, %s1217_s27  ;;  %p1224_p11 = scmp.lt.u32.totalorder %s1217_s27, %s2060_s1 }
  0x1f   : > { %p1220_p9 = pnand %p1703_p8, %p1218_p7 }
  0x21   : > { %p1221_p10 = pneg %p1220_p9 }
  0x23   : > { %p1226_p12 = pnand %p1224_p11, %p1221_p10 }
  0x25   : > { %1229 = shalt.err (!%p1226_p12)
}
  0x26   : > { %s1230_s25 = scalar_lea.vmem %s284_s19, 16  ;;  %s1237_s26 = scalar_lea.vmem %s284_s19, 32 }
  0x27   : > { %p1231_p13 = scmp.ne.s32.totalorder %s284_s19, %s1230_s25  ;;  %p1238_p5 = scmp.lt.s32.totalorder %s284_s19, %s284_s19 }
  0x28   : > { %p1239_p4 = scmp.lt.s32.totalorder %s1237_s26, %s1230_s25 }
  0x29   : > { %p1233_p0 = pnand %p1231_p13, %p1703_p8 }
  0x2a   : > { %p1240_p3 = por %p1239_p4, %p1238_p5 }
  0x2b   : > { %p1234_p2 = pneg %p1233_p0 }
  0x2d   : > { %p1241_p1 = pnand %p1240_p3, %p1234_p2 }
  0x2f   : > { %1244 = shalt.err (!%p1241_p1)
}
  0x30   : > { %1079 = dma.hbm_to_vmem [thread:$0]  (!%p1687_p6), %s2060_s1, 16, %s284_s19, [#allocation6]  }
  0x31   : > { %s2062_s3 = sld [smem:[#allocation26_spill]] }
  0x37   : > { %s1245_s23 = scalar_lea.hbm %s2062_s3, 256 }
  0x38   : > { %p1246_p7 = scmp.ne.s32.totalorder %s2062_s3, %s1245_s23  ;;  %p1252_p1 = scmp.lt.u32.totalorder %s1245_s23, %s2062_s3 }
  0x3a   : > { %p1248_p9 = pnand %p1246_p7, %p1703_p8 }
  0x3c   : > { %p1249_p4 = pneg %p1248_p9 }
  0x3e   : > { %p1254_p3 = pnand %p1252_p1, %p1249_p4 }
  0x40   : > { %1257 = shalt.err (!%p1254_p3)
}
  0x41   : > { %s1258_s19 = scalar_lea.vmem %s1691_s21, 256  ;;  %p1266_p13 = scmp.lt.s32.totalorder %s1691_s21, %s1691_s21 }
  0x42   : > { %p1259_p10 = scmp.ne.s32.totalorder %s1691_s21, %s1258_s19  ;;  %p1267_p0 = scmp.lt.s32.totalorder %s1258_s19, %s1258_s19 }
  0x44   : > { %p1261_p11 = pnand %p1259_p10, %p1703_p8  ;;  %p1268_p2 = por %p1267_p0, %p1266_p13 }
  0x46   : > { %p1262_p12 = pneg %p1261_p11 }
  0x48   : > { %p1269_p5 = pnand %p1268_p2, %p1262_p12 }
  0x4a   : > { %1272 = shalt.err (!%p1269_p5)
}
  0x4b   : > { %s1574_s9 = smov 64   ;;  %s1575_s15 = smov 4  }
  0x4c   : > { %1085 = dma.hbm_to_vmem [thread:$0]  (!%p1687_p6), %s2062_s3, 256, %s1691_s21, [#allocation9], %s1574_s9, %s1574_s9, %s1575_s15  }
  0x4d   : > { %s1273_s23 = scalar_lea.hbm %s2042_s5, 1024 }
  0x4e   : > { %p1274_p7 = scmp.ne.s32.totalorder %s2042_s5, %s1273_s23  ;;  %p1280_p1 = scmp.lt.u32.totalorder %s1273_s23, %s2042_s5 }
  0x50   : > { %p1276_p9 = pnand %p1274_p7, %p1703_p8 }
  0x52   : > { %p1277_p4 = pneg %p1276_p9 }
  0x54   : > { %p1282_p3 = pnand %p1280_p1, %p1277_p4 }
  0x56   : > { %1285 = shalt.err (!%p1282_p3)
}
  0x57   : > { %s1286_s28 = scalar_lea.vmem %s329_s24, 1024  ;;  %p1294_p13 = scmp.lt.s32.totalorder %s329_s24, %s329_s24 }
  0x58   : > { %p1287_p10 = scmp.ne.s32.totalorder %s329_s24, %s1286_s28  ;;  %p1295_p0 = scmp.lt.s32.totalorder %s1286_s28, %s1286_s28 }
  0x5a   : > { %p1289_p11 = pnand %p1287_p10, %p1703_p8  ;;  %p1296_p2 = por %p1295_p0, %p1294_p13 }
  0x5c   : > { %p1290_p12 = pneg %p1289_p11 }
  0x5e   : > { %p1297_p5 = pnand %p1296_p2, %p1290_p12 }
  0x60   : > { %1300 = shalt.err (!%p1297_p5)
}
  0x61   : > { %1091 = dma.hbm_to_vmem [thread:$0]  (!%p1687_p6), %s2042_s5, 1024, %s329_s24, [#allocation12], %s1574_s9, %s1574_s9, %s1575_s15  }
  0x62   : > { %s1576_s1 = smov [#allocation14]   ;;  %s1577_s20 = smov [#allocation7]  }
  0x63   : > { %s353_s27 = sshll.u32 %s1576_s1, 4  ;;  %s294_s23 = sshll.u32 %s1577_s20, 4  ;;  %s354_s27 = int_to_ptr.vmem [resolvable:$true] %s353_s27  ;;  %s295_s23 = int_to_ptr.vmem [resolvable:$true] %s294_s23 }
  0x64   : > { %s1301_s19 = scalar_lea.hbm %s2044_s7, 16 }
  0x65   : > { %p1302_p7 = scmp.ne.s32.totalorder %s2044_s7, %s1301_s19  ;;  %p1308_p1 = scmp.lt.u32.totalorder %s1301_s19, %s2044_s7 }
  0x67   : > { %p1304_p9 = pnand %p1302_p7, %p1703_p8 }
  0x69   : > { %p1305_p4 = pneg %p1304_p9 }
  0x6b   : > { %p1310_p3 = pnand %p1308_p1, %p1305_p4 }
  0x6d   : > { %1313 = shalt.err (!%p1310_p3)
}
  0x6e   : > { %s1314_s24 = scalar_lea.vmem %s354_s27, 16  ;;  %s1321_s9 = scalar_lea.vmem %s354_s27, 32 }
  0x6f   : > { %p1315_p10 = scmp.ne.s32.totalorder %s354_s27, %s1314_s24  ;;  %p1322_p13 = scmp.lt.s32.totalorder %s354_s27, %s354_s27 }
  0x70   : > { %p1323_p0 = scmp.lt.s32.totalorder %s1321_s9, %s1314_s24 }
  0x71   : > { %p1317_p11 = pnand %p1315_p10, %p1703_p8 }
  0x72   : > { %p1324_p2 = por %p1323_p0, %p1322_p13 }
  0x73   : > { %p1318_p12 = pneg %p1317_p11 }
  0x75   : > { %p1325_p5 = pnand %p1324_p2, %p1318_p12 }
  0x77   : > { %1328 = shalt.err (!%p1325_p5)
}
  0x78   : > { %1097 = dma.hbm_to_vmem [thread:$0]  (!%p1687_p6), %s2044_s7, 16, %s354_s27, [#allocation15]  }
  0x79   : > { %s1329_s1 = scalar_lea.hbm %s2039_s2, 16 }
  0x7a   : > { %p1330_p7 = scmp.ne.s32.totalorder %s2039_s2, %s1329_s1  ;;  %p1336_p1 = scmp.lt.u32.totalorder %s1329_s1, %s2039_s2 }
  0x7c   : > { %p1332_p9 = pnand %p1330_p7, %p1703_p8 }
  0x7e   : > { %p1333_p4 = pneg %p1332_p9 }
  0x80   : > { %p1338_p3 = pnand %p1336_p1, %p1333_p4 }
  0x82   : > { %1341 = shalt.err (!%p1338_p3)
}
  0x83   : > { %s1342_s28 = scalar_lea.vmem %s295_s23, 16  ;;  %s1349_s27 = scalar_lea.vmem %s295_s23, 32 }
  0x84   : > { %p1343_p10 = scmp.ne.s32.totalorder %s295_s23, %s1342_s28  ;;  %p1350_p13 = scmp.lt.s32.totalorder %s295_s23, %s295_s23 }
  0x85   : > { %p1351_p0 = scmp.lt.s32.totalorder %s1349_s27, %s1342_s28 }
  0x86   : > { %p1345_p11 = pnand %p1343_p10, %p1703_p8 }
  0x87   : > { %p1352_p2 = por %p1351_p0, %p1350_p13 }
  0x88   : > { %p1346_p12 = pneg %p1345_p11 }
  0x8a   : > { %p1353_p5 = pnand %p1352_p2, %p1346_p12 }
  0x8c   : > { %1356 = shalt.err (!%p1353_p5)
}
  0x8d   : > { %1082 = dma.hbm_to_vmem [thread:$0]  (!%p1687_p6), %s2039_s2, 16, %s295_s23, [#allocation6]  }
  0x8e   : > { %s1578_s9 = smov [#allocation10]   ;;  %s1579_s15 = smov [#allocation13]  }
  0x8f   : > { %s318_s3 = sshll.u32 %s1578_s9, 4  ;;  %s342_s12 = sshll.u32 %s1579_s15, 4  ;;  %s319_s3 = int_to_ptr.vmem [resolvable:$true] %s318_s3  ;;  %s343_s12 = int_to_ptr.vmem [resolvable:$true] %s342_s12 }
  0x90   : > { %s1357_s20 = scalar_lea.hbm %s2041_s4, 16 }
  0x91   : > { %p1358_p7 = scmp.ne.s32.totalorder %s2041_s4, %s1357_s20  ;;  %p1364_p1 = scmp.lt.u32.totalorder %s1357_s20, %s2041_s4 }
  0x93   : > { %p1360_p9 = pnand %p1358_p7, %p1703_p8 }
  0x95   : > { %p1361_p4 = pneg %p1360_p9 }
  0x97   : > { %p1366_p3 = pnand %p1364_p1, %p1361_p4 }
  0x99   : > { %1369 = shalt.err (!%p1366_p3)
}
  0x9a   : > { %s1370_s23 = scalar_lea.vmem %s319_s3, 16  ;;  %s1377_s27 = scalar_lea.vmem %s319_s3, 32 }
  0x9b   : > { %p1371_p10 = scmp.ne.s32.totalorder %s319_s3, %s1370_s23  ;;  %p1378_p13 = scmp.lt.s32.totalorder %s319_s3, %s319_s3 }
  0x9c   : > { %p1379_p0 = scmp.lt.s32.totalorder %s1377_s27, %s1370_s23 }
  0x9d   : > { %p1373_p11 = pnand %p1371_p10, %p1703_p8 }
  0x9e   : > { %p1380_p2 = por %p1379_p0, %p1378_p13 }
  0x9f   : > { %p1374_p12 = pneg %p1373_p11 }
  0xa1   : > { %p1381_p5 = pnand %p1380_p2, %p1374_p12 }
  0xa3   : > { %1384 = shalt.err (!%p1381_p5)
}
  0xa4   : > { %1088 = dma.hbm_to_vmem [thread:$0]  (!%p1687_p6), %s2041_s4, 16, %s319_s3, [#allocation9]  }
  0xa5   : > { %s1385_s29 = scalar_lea.hbm %s2043_s6, 16 }
  0xa6   : > { %p1386_p7 = scmp.ne.s32.totalorder %s2043_s6, %s1385_s29  ;;  %p1392_p1 = scmp.lt.u32.totalorder %s1385_s29, %s2043_s6 }
  0xa8   : > { %p1388_p9 = pnand %p1386_p7, %p1703_p8 }
  0xaa   : > { %p1389_p4 = pneg %p1388_p9 }
  0xac   : > { %p1394_p3 = pnand %p1392_p1, %p1389_p4 }
  0xae   : > { %1397 = shalt.err (!%p1394_p3)
}
  0xaf   : > { %s1398_s19 = scalar_lea.vmem %s343_s12, 16  ;;  %s1405_s3 = scalar_lea.vmem %s343_s12, 32 }
  0xb0   : > { %p1399_p10 = scmp.ne.s32.totalorder %s343_s12, %s1398_s19  ;;  %p1406_p13 = scmp.lt.s32.totalorder %s343_s12, %s343_s12 }
  0xb1   : > { %p1407_p0 = scmp.lt.s32.totalorder %s1405_s3, %s1398_s19 }
  0xb2   : > { %p1401_p11 = pnand %p1399_p10, %p1703_p8 }
  0xb3   : > { %p1408_p2 = por %p1407_p0, %p1406_p13 }
  0xb4   : > { %p1402_p12 = pneg %p1401_p11 }
  0xb6   : > { %p1409_p5 = pnand %p1408_p2, %p1402_p12 }
  0xb8   : > { %1412 = shalt.err (!%p1409_p5)
}
  0xb9   : > { %1094 = dma.hbm_to_vmem [thread:$0]  (!%p1687_p6), %s2043_s6, 16, %s343_s12, [#allocation12]  }
  0xba   : > { %s1580_s27 = smov [#allocation16]   ;;  %s1413_s15 = scalar_lea.hbm %s2045_s8, 16 }
  0xbb   : > { %s364_s21 = sshll.u32 %s1580_s27, 4  ;;  %p1414_p7 = scmp.ne.s32.totalorder %s2045_s8, %s1413_s15  ;;  %s365_s21 = int_to_ptr.vmem [resolvable:$true] %s364_s21 }
  0xbc   : > { %p1420_p1 = scmp.lt.u32.totalorder %s1413_s15, %s2045_s8 }
  0xbd   : > { %p1416_p9 = pnand %p1414_p7, %p1703_p8 }
  0xbf   : > { %p1417_p4 = pneg %p1416_p9 }
  0xc1   : > { %p1422_p3 = pnand %p1420_p1, %p1417_p4 }
  0xc3   : > { %1425 = shalt.err (!%p1422_p3)
}
  0xc4   : > { %s1426_s12 = scalar_lea.vmem %s365_s21, 16  ;;  %s1433_s26 = scalar_lea.vmem %s365_s21, 32 }
  0xc5   : > { %p1427_p10 = scmp.ne.s32.totalorder %s365_s21, %s1426_s12  ;;  %p1434_p13 = scmp.lt.s32.totalorder %s365_s21, %s365_s21 }
  0xc6   : > { %p1435_p0 = scmp.lt.s32.totalorder %s1433_s26, %s1426_s12 }
  0xc7   : > { %p1429_p11 = pnand %p1427_p10, %p1703_p8 }
  0xc8   : > { %p1436_p2 = por %p1435_p0, %p1434_p13 }
  0xc9   : > { %p1430_p12 = pneg %p1429_p11 }
  0xcb   : > { %p1437_p5 = pnand %p1436_p2, %p1430_p12 }
  0xcd   : > { %1440 = shalt.err (!%p1437_p5)
}
  0xce   : > { %1100 = dma.hbm_to_vmem [thread:$0]  (!%p1687_p6), %s2045_s8, 16, %s365_s21, [#allocation15]  }
  0xcf   : > { %s949_s18 = sadd.s32 4294967294, %s1569_s14   ;;  %s41_s28 = sadd.s32 1, %s1565_s13 }
  0xd0   : > { %p43_p8 = scmp.ge.s32.totalorder %s41_s28, 2  ;;  %s50_s22 = sadd.s32 1, %s1557_s11 }
  0xd1   : > { %p57_p7 = scmp.ne.s32.totalorder %s1557_s11, %s1553_s10  ;;  %p58_p9 = scmp.eq.s32.totalorder %s1569_s14, 0 }
  0xd2   : > { %s2083_s28 = smov (%p43_p8, %s41_s28), 0  ;;  %p63_p1 = scmp.ne.s32.totalorder %s1553_s10, %s1549_s30 }
  0xd3   : > { %p1859_p4 = por %p58_p9, %p57_p7  ;;  %s45_s27 = ssub.s32 %s1565_s13, %s2083_s28 }
  0xd4   : > { %s2064_s21 = sadd.s32 4294967295, %s1569_s14   ;;  %p48_p3 = scmp.eq.s32.totalorder %s45_s27, 0 }
  0xd5   : > { %p257_p6 = scmp.eq.s32.totalorder %s2064_s21, 1  ;;  %p2065_p10 = scmp.ne.s32.totalorder %s2057_s16, 0 }
  0xd6   : > { %p263_p13 = scmp.eq.s32.totalorder %s949_s18, 1  ;;  %p1117_p2 = scmp.lt.s32.totalorder %s1569_s14, 2 }
  0xd7   : > { %p1871_p11 = por %p2065_p10, %p63_p1  ;;  %p1875_p12 = por %p257_p6, %p57_p7 }
  0xd8   : > { %s1880_s15 = scalar_select %p48_p3, %s1557_s11, %s50_s22  }
  0xd9   : > { %s2067_s9 = scalar_select %p1875_p12, 1, 0 }
  0xda   : > { %p1882_p0 = por %p263_p13, %p63_p1  ;;  %s375_s1 = sand.u32 1, %s1557_s11  }
  0xdb   : > { %s998_s20 = sshll.u32 %s1565_s13, 8  ;;  %s960_s25 = sshll.u32 %s375_s1, 4 }
  0xdc   : > { %s2068_s29 = scalar_select %p1882_p0, 1, 0 }
  0xdd   : > { %s1892_s19 = scalar_lea.hbm %s2037_s0, %s998_s20  ;;  %s379_s3 = scalar_lea.vmem [#allocation2], %s960_s25 }
  0xde   : > { %s388_s18 = sshll.u32 %s379_s3, 4  ;;  %p1896_p5 = pnand %p1117_p2, %p1859_p4  ;;  %s1900_s18 = int_to_ptr.vmem [resolvable:$true] %s388_s18 }
  0xdf   : > { %s1902_s27 = scalar_lea.sflag [#allocation3], %s375_s1  ;;  %s1441_s21 = scalar_lea.hbm %s1892_s19, 256 }
  0xe0   : > { %p1442_p8 = scmp.ne.s32.totalorder %s1892_s19, %s1441_s21  ;;  %p1443_p7 = pneg %p1896_p5 }
  0xe1   : > { %s1446_s25 = scalar_lea.hbm %s2037_s0, 512  ;;  %p1447_p4 = scmp.lt.u32.totalorder %s1892_s19, %s2037_s0 }
  0xe2   : > { %p1444_p9 = pnand %p1443_p7, %p1442_p8  ;;  %p1448_p6 = scmp.lt.u32.totalorder %s1446_s25, %s1441_s21 }
  0xe3   : > { %p1450_p10 = scmp.lt.u32.totalorder %s1441_s21, %s1892_s19 }
  0xe4   : > { %p1445_p1 = pneg %p1444_p9  ;;  %p1449_p3 = por %p1448_p6, %p1447_p4 }
  0xe6   : > { %p1451_p13 = por %p1450_p10, %p1449_p3 }
  0xe8   : > { %p1452_p2 = pnand %p1451_p13, %p1445_p1 }
  0xea   : > { %1455 = shalt.err (!%p1452_p2)
}
  0xeb   : > { %s1456_s1 = scalar_lea.vmem %s1900_s18, 256  ;;  %s1581_s3 = smov [#allocation2]  }
  0xec   : > { %p1457_p8 = scmp.ne.s32.totalorder %s1900_s18, %s1456_s1  ;;  %s1461_s20 = sshll.u32 %s1581_s3, 4  ;;  %s1462_s20 = int_to_ptr.vmem [resolvable:$false] %s1461_s20 }
  0xed   : > { %s1463_s23 = scalar_lea.vmem %s1462_s20, 512  ;;  %p1464_p12 = scmp.lt.s32.totalorder %s1900_s18, %s1462_s20 }
  0xee   : > { %p1459_p9 = pnand %p1457_p8, %p1443_p7  ;;  %p1465_p4 = scmp.lt.s32.totalorder %s1463_s23, %s1456_s1 }
  0xf0   : > { %p1460_p0 = pneg %p1459_p9  ;;  %p1466_p6 = por %p1465_p4, %p1464_p12 }
  0xf2   : > { %p1467_p3 = pnand %p1466_p6, %p1460_p0 }
  0xf4   : > { %1470 = shalt.err (!%p1467_p3)
}
  0xf5   : > { %s1582_s21 = smov 128   ;;  %s1583_s25 = smov 8  }
  0xf6   : > { %1104 = dma.hbm_to_vmem [thread:$0]  (!%p1896_p5), %s1892_s19, 256, %s1900_s18, %s1902_s27, %s1582_s21, %s1582_s21, %s1583_s25  }
  0xf7   : > { %p2070_p7 = scmp.ne.s32.totalorder %s2058_s17, 0 }
  0xf8   : > { %s1933_s12 = sand.u32 (!%p2070_p7), 1, %s1553_s10  }
  0xf9   : > { %400 = sbr.rel (%p2070_p7) target bundleno = 1380 (0x564), region = 56  ;;  %s964_s26 = sshll.u32 (!%p2070_p7), %s1933_s12, 4 }
  0xfa   : > { %s403_s1 = scalar_lea.sflag (!%p2070_p7), [#allocation3], %s1933_s12  ;;  %s406_s3 = scalar_lea.vmem (!%p2070_p7), [#allocation2], %s964_s26 }
 0x100   : > { %1524 = dma.done.wait (%p1871_p11), %s403_s1, 256  }
 0x101   : > { %1526 = vsyncadd (%p1871_p11), %s403_s1, 4294967040  ;;  %p2071_p12 = scmp.ne.s32.totalorder %s2057_s16, 0 }
 0x103   : > { %1528 = dma.done.wait (%p2071_p12), [#allocation6], 32  }
 0x104   : > { %1530 = vsyncadd (%p2071_p12), [#allocation6], 4294967264 }
 0x105   : > { %1532 = dma.done.wait (%p2071_p12), [#allocation9], 272  }
 0x106   : > { %1534 = vsyncadd (%p2071_p12), [#allocation9], 4294967024 }
 0x107   : > { %1536 = dma.done.wait (%p2071_p12), [#allocation12], 1040  }
 0x108   : > { %1538 = vsyncadd (%p2071_p12), [#allocation12], 4294966256 }
 0x109   : > { %1540 = dma.done.wait (%p2071_p12), [#allocation15], 32  }
 0x10a   : > { %1542 = vsyncadd (%p2071_p12), [#allocation15], 4294967264  ;;  %vm502_vm0 = vcmask 261120   ;;  %v1959_v0 = vld [vmem:[%s406_s3] sm:$0xff]  ;;  %v1961_v1 = vld [vmem:[%s406_s3 + $0x8] sm:$0xff]  ;;  %v1584_v15 = vmov 0.0  }
 0x10b   : > { %v503_v2 = vsel %vm502_vm0, %v1959_v0, 0.0  ;;  %v506_v3 = vsel %vm502_vm0, %v1961_v1, 0.0  ;;  %v1191_v14 = vld [vmem:[#allocation8] sm:$0xff]   ;;  %1012 = vmatprep.subr.bf16.mxu0 %v1584_v15  ;;  %1020 = vmatprep.subr.bf16.mxu1 %v1584_v15  ;;  %v1192_v16 = vld [vmem:[#allocation8 + $0x8] sm:$0xff]   ;;  %vm1585_vm1 = vmmov 0   ;;  %v1193_v34 = vld [vmem:[#allocation11] sm:$0xff]  }
 0x10c   : > { %504 = vadd.xlane.f32.xlu0 %v503_v2  ;;  %1013 = vmatpush3.bf16.msra.mxu0 %v1191_v14  ;;  %v974_v25 = vld [vmem:[#allocation5] ss:$0 sm:$0xff]  ;;  %v975_v29 = vld [vmem:[#allocation7] ss:$0 sm:$0xff]  ;;  %v1195_v36 = vld [vmem:[#allocation11 + $0x10] sm:$0xff]   ;;  %s2072_s16 = sld [smem:[#allocation24_spill]] }
 0x10d   : > { %1016 = vmatprep.mubr.msk.bf16.mxu0 %vm1585_vm1, %v1584_v15  ;;  %1014 = vmatprep.subr.bf16.mxu0 %v1584_v15  ;;  %v1194_v35 = vld [vmem:[#allocation11 + $0x8] sm:$0xff]   ;;  %v1196_v37 = vld [vmem:[#allocation11 + $0x18] sm:$0xff]   ;;  %v1197_v38 = vld [vmem:[#allocation11 + $0x20] sm:$0xff]   ;;  %s472_s24 = scalar_lea.vmem [#allocation17], %s964_s26  ;;  %s2073_s27 = sld [smem:[#allocation27_spill]] }
 0x10e   : > { %1036 = vmatprep.mubr.msk.bf16.mxu1 %vm1585_vm1, %v1584_v15  ;;  %1021 = vmatpush3.bf16.msra.mxu1 %v1193_v34  ;;  %v1198_v39 = vld [vmem:[#allocation11 + $0x28] sm:$0xff]   ;;  %v1199_v40 = vld [vmem:[#allocation11 + $0x30] sm:$0xff]   ;;  %v1200_v41 = vld [vmem:[#allocation11 + $0x38] sm:$0xff]   ;;  %s785_s19 = sshll.u32 %s472_s24, 4  ;;  %s770_s23 = scalar_lea.sflag [#allocation4], %s1933_s12  ;;  %s1986_s19 = int_to_ptr.vmem [resolvable:$true] %s785_s19 }
 0x10f   : > { %1022 = vmatprep.subr.bf16.mxu1 %v1584_v15  ;;  %v976_v42 = vld [vmem:[#allocation10] ss:$0 sm:$0xff]  ;;  %v982_v60 = vld [vmem:[#allocation13] ss:$0 sm:$0xff]  ;;  %s1471_s21 = scalar_lea.vmem %s1986_s19, 256  ;;  %p2074_p0 = scmp.ne.s32.totalorder %s2067_s9, 0 }
 0x110   : > { %507 = vadd.xlane.f32.xlu0 %v506_v3  ;;  %1015 = vmatpush3.bf16.msra.mxu0 %v1192_v16  ;;  %p1472_p11 = scmp.ne.s32.totalorder %s1986_s19, %s1471_s21  ;;  %s1586_s25 = smov [#allocation17]  }
 0x111   : > { %s1475_s26 = sshll.u32 %s1586_s25, 4  ;;  %s1476_s26 = int_to_ptr.vmem [resolvable:$false] %s1475_s26 }
 0x112   : > { %1023 = vmatpush3.bf16.msra.mxu1 %v1194_v35  ;;  %s999_s17 = sshll.u32 %s2072_s16, 8  ;;  %p1473_p5 = pnand %p1472_p11, %p2074_p0 }
 0x113   : > { %1024 = vmatprep.subr.bf16.mxu1 %v1584_v15  ;;  %s1984_s20 = scalar_lea.hbm %s2073_s27, %s999_s17  ;;  %s1477_s1 = scalar_lea.vmem %s1476_s26, 512 }
 0x114   : > { %p1474_p1 = pneg %p1473_p5  ;;  %p1478_p10 = scmp.lt.s32.totalorder %s1986_s19, %s1476_s26 }
 0x115   : > { %p1479_p13 = scmp.lt.s32.totalorder %s1477_s1, %s1471_s21 }
 0x116   : > { %1025 = vmatpush3.bf16.msra.mxu1 %v1195_v36 }
 0x117   : > { %1026 = vmatprep.subr.bf16.mxu1 %v1584_v15  ;;  %p1480_p2 = por %p1479_p13, %p1478_p10 }
 0x119   : > { %p1481_p8 = pnand %p1480_p2, %p1474_p1 }
 0x11a   : > { %1027 = vmatpush3.bf16.msra.mxu1 %v1196_v37 }
 0x11b   : > { %1028 = vmatprep.subr.bf16.mxu1 %v1584_v15 }
 0x11e   : > { %1029 = vmatpush3.bf16.msra.mxu1 %v1197_v38 }
 0x11f   : > { %1030 = vmatprep.subr.bf16.mxu1 %v1584_v15 }
 0x122   : > { %1031 = vmatpush3.bf16.msra.mxu1 %v1198_v39 }
 0x123   : > { %1032 = vmatprep.subr.bf16.mxu1 %v1584_v15 }
 0x126   : > { %1033 = vmatpush3.bf16.msra.mxu1 %v1199_v40 }
 0x127   : > { %1034 = vmatprep.subr.bf16.mxu1 %v1584_v15 }
 0x12a   : > { %1035 = vmatpush3.bf16.msra.mxu1 %v1200_v41 }
 0x199   : > { %v505_v4 = vpop.xlane.xlu0 %504 }
 0x19a   : > { %v510_v5 = vmul.f32 0.03125, %v505_v4 }
 0x19c   : > { %v512_v6 = vsub.f32 %v1959_v0, %v510_v5 }
 0x19d   : > { %v508_v7 = vpop.xlane.xlu0 %507 }
 0x19e   : > { %v511_v8 = vmul.f32 0.03125, %v508_v7  ;;  %v514_v9 = vmul.f32 %v512_v6, %v512_v6 }
 0x1a0   : > { %v513_v10 = vsub.f32 %v1961_v1, %v511_v8  ;;  %v516_v11 = vsel %vm502_vm0, %v514_v9, 0.0 }
 0x1a1   : > { %517 = vadd.xlane.f32.xlu1 %v516_v11 }
 0x1a2   : > { %v515_v12 = vmul.f32 %v513_v10, %v513_v10 }
 0x1a4   : > { %v519_v13 = vsel %vm502_vm0, %v515_v12, 0.0 }
 0x1a5   : > { %520 = vadd.xlane.f32.xlu1 %v519_v13 }
 0x22e   : > { %v518_v17 = vpop.xlane.xlu1 %517 }
 0x22f   : > { %v522_v18 = vmul.f32 0.03125, %v518_v17 }
 0x231   : > { %v524_v19 = vadd.f32 1e-05, %v522_v18 }
 0x232   : > { %v521_v20 = vpop.xlane.xlu1 %520 }
 0x233   : > { %1201 = vrsqrt.f32 %v524_v19  ;;  %v523_v21 = vmul.f32 0.03125, %v521_v20 }
 0x235   : > { %v525_v22 = vadd.f32 1e-05, %v523_v21 }
 0x237   : > { %1203 = vrsqrt.f32 %v525_v22 }
 0x23d   : > { %v1202_v23 = vpop.eup %1201 }
 0x23e   : > { %v528_v24 = vmul.f32 %v1202_v23, %v512_v6 }
 0x240   : > { %v536_v28 = vmul.f32 %v974_v25, %v528_v24 }
 0x241   : > { %v1204_v26 = vpop.eup %1203 }
 0x242   : > { %v529_v27 = vmul.f32 %v1204_v26, %v513_v10  ;;  %v544_v31 = vadd.f32 %v975_v29, %v536_v28  ;;  %v991_v26 = vld [vmem:[#allocation14] ss:$0 sm:$0xff] }
 0x244   : > { %v537_v30 = vmul.f32 %v974_v25, %v529_v27 }
 0x246   : > { %v545_v32 = vadd.f32 %v975_v29, %v537_v30  ;;  %v992_v29 = vld [vmem:[#allocation16] ss:$0 sm:$0xff] }
 0x248   : > { %v546_v33 = vpack.c.bf16 %v545_v32, %v544_v31 }
 0x24a   : > { %1017 = vmatmul.mubr.msk.bf16.vlgmr.msra.gmra.mrb[0].mxu0 %vm502_vm0, %v546_v33 }
 0x31d   : > { %v602_v43 = vpop.f32.mrb[0].mxu0 }
 0x31e   : > { %v603_v44 = vadd.f32 %v976_v42, %v602_v43  ;;  %v1018_v45 = vpop.f32.mrb[1].mxu0 }
 0x31f   : > { %v605_v46 = vpop.f32.mrb[2].mxu0 }
 0x320   : > { %v980_v47 = vmul.f32 -1.442695, %v603_v44  ;;  %v606_v48 = vadd.f32 %v976_v42, %v605_v46  ;;  %v1019_v49 = vpop.f32.mrb[3].mxu0 }
 0x322   : > { %1205 = vpow2.f32 %v980_v47  ;;  %v981_v50 = vmul.f32 -1.442695, %v606_v48 }
 0x324   : > { %1207 = vpow2.f32 %v981_v50 }
 0x32c   : > { %v1206_v51 = vpop.eup %1205 }
 0x32d   : > { %v615_v52 = vadd.f32 1.0, %v1206_v51 }
 0x32e   : > { %v1208_v53 = vpop.eup %1207 }
 0x32f   : > { %1209 = vrcp.f32 %v615_v52  ;;  %v616_v54 = vadd.f32 1.0, %v1208_v53 }
 0x331   : > { %1211 = vrcp.f32 %v616_v54 }
 0x339   : > { %v1210_v55 = vpop.eup %1209 }
 0x33a   : > { %v621_v57 = vmul.f32 %v1210_v55, %v603_v44 }
 0x33b   : > { %v1212_v56 = vpop.eup %1211 }
 0x33c   : > { %v622_v58 = vmul.f32 %v1212_v56, %v606_v48 }
 0x33e   : > { %v623_v59 = vpack.c.bf16 %v622_v58, %v621_v57 }
 0x340   : > { %1037 = vmatmul.mubr.bf16.vlgmr.msra.gmra.mrb[0].mxu1 %v623_v59 }
 0x413   : > { %v712_v61 = vpop.f32.mrb[0].mxu1 }
 0x414   : > { %v713_v62 = vadd.f32 %v982_v60, %v712_v61  ;;  %v1038_v63 = vpop.f32.mrb[1].mxu1 }
 0x415   : > { %v715_v2 = vpop.f32.mrb[2].mxu1 }
 0x416   : > { %v719_v3 = vmul.f32 0.5, %v713_v62  ;;  %v716_v4 = vadd.f32 %v982_v60, %v715_v2  ;;  %v1039_v5 = vpop.f32.mrb[3].mxu1 }
 0x418   : > { %v720_v6 = vmul.f32 0.5, %v716_v4  ;;  %v721_v7 = vadd.f32 %v719_v3, %v1959_v0 }
 0x41a   : > { %v725_v8 = vsel %vm502_vm0, %v721_v7, 0.0  ;;  %v722_v9 = vadd.f32 %v720_v6, %v1961_v1 }
 0x41b   : > { %726 = vadd.xlane.f32.xlu0 %v725_v8 }
 0x41c   : > { %v728_v10 = vsel %vm502_vm0, %v722_v9, 0.0 }
 0x41d   : > { %729 = vadd.xlane.f32.xlu1 %v728_v10 }
 0x4a8   : > { %v727_v11 = vpop.xlane.xlu0 %726 }
 0x4a9   : > { %v731_v12 = vmul.f32 0.03125, %v727_v11 }
 0x4aa   : > { %v730_v13 = vpop.xlane.xlu1 %729 }
 0x4ab   : > { %v733_v14 = vsub.f32 %v721_v7, %v731_v12  ;;  %v732_v15 = vmul.f32 0.03125, %v730_v13 }
 0x4ad   : > { %v734_v16 = vsub.f32 %v722_v9, %v732_v15  ;;  %v735_v17 = vmul.f32 %v733_v14, %v733_v14 }
 0x4af   : > { %v737_v18 = vsel %vm502_vm0, %v735_v17, 0.0  ;;  %v736_v19 = vmul.f32 %v734_v16, %v734_v16 }
 0x4b0   : > { %738 = vadd.xlane.f32.xlu0 %v737_v18 }
 0x4b1   : > { %v740_v0 = vsel %vm502_vm0, %v736_v19, 0.0 }
 0x4b2   : > { %741 = vadd.xlane.f32.xlu1 %v740_v0 }
 0x53d   : > { %v739_v1 = vpop.xlane.xlu0 %738 }
 0x53e   : > { %v743_v20 = vmul.f32 0.03125, %v739_v1 }
 0x53f   : > { %v742_v21 = vpop.xlane.xlu1 %741 }
 0x540   : > { %v745_v22 = vadd.f32 1e-05, %v743_v20  ;;  %v744_v23 = vmul.f32 0.03125, %v742_v21 }
 0x542   : > { %1213 = vrsqrt.f32 %v745_v22  ;;  %v746_v24 = vadd.f32 1e-05, %v744_v23 }
 0x544   : > { %1215 = vrsqrt.f32 %v746_v24 }
 0x54c   : > { %v1214_v25 = vpop.eup %1213 }
 0x54d   : > { %v749_v27 = vmul.f32 %v1214_v25, %v733_v14 }
 0x54e   : > { %v1216_v28 = vpop.eup %1215 }
 0x54f   : > { %v757_v30 = vmul.f32 %v991_v26, %v749_v27  ;;  %v750_v31 = vmul.f32 %v1216_v28, %v734_v16 }
 0x551   : > { %v765_v32 = vadd.f32 %v992_v29, %v757_v30  ;;  %v758_v33 = vmul.f32 %v991_v26, %v750_v31 }
 0x553   : > { %v766_v34 = vadd.f32 %v992_v29, %v758_v33  ;;  %767 = vst.msk [vmem:[%s472_s24] sm:$0xff] %vm502_vm0, %v765_v32 }
 0x555   : > { %768 = vst.msk [vmem:[%s472_s24 + $0x8] sm:$0xff] %vm502_vm0, %v766_v34 }
 0x556   : > { %1484 = shalt.err (!%p1481_p8)
}
 0x557   : > { %s1485_s3 = scalar_lea.hbm %s1984_s20, 256  ;;  %s1489_s24 = scalar_lea.hbm %s2073_s27, 512 }
 0x558   : > { %p1486_p9 = scmp.ne.s32.totalorder %s1984_s20, %s1485_s3  ;;  %p1490_p3 = scmp.lt.u32.totalorder %s1984_s20, %s2073_s27 }
 0x559   : > { %p1491_p7 = scmp.lt.u32.totalorder %s1489_s24, %s1485_s3  ;;  %p1493_p11 = scmp.lt.u32.totalorder %s1485_s3, %s1984_s20 }
 0x55a   : > { %p1487_p4 = pnand %p1486_p9, %p2074_p0 }
 0x55b   : > { %p1492_p12 = por %p1491_p7, %p1490_p3 }
 0x55c   : > { %p1488_p6 = pneg %p1487_p4 }
 0x55d   : > { %p1494_p5 = por %p1493_p11, %p1492_p12 }
 0x55f   : > { %p1495_p1 = pnand %p1494_p5, %p1488_p6 }
 0x561   : > { %1498 = shalt.err (!%p1495_p1)
}
 0x562   : > { %s1587_s21 = smov 128   ;;  %s1588_s25 = smov 8  }
 0x563   : > { %1074 = dma.vmem_to_hbm [thread:$0]  (%p2074_p0), %s1986_s19, 256, %s1984_s20, %s770_s23, %s1587_s21, %s1587_s21, %s1588_s25  }
 0x564 PF: > { %s800_s26 = sand.u32 1, %s1549_s30   ;;  %p2075_p10 = scmp.ne.s32.totalorder %s2068_s29, 0 }
 0x565   : > { %p2076_p13 = scmp.ge.s32.totalorder %s1569_s14, 2  ;;  %s801_s1 = scalar_lea.sflag [#allocation4], %s800_s26 }
 0x567   : > { %p1106_p2 = pnand %p2076_p13, %p2075_p10 }
 0x569   : > { %1544 = dma.done.wait (!%p1106_p2), %s801_s1, 256  }
 0x56a   : > { %1546 = vsyncadd (!%p1106_p2), %s801_s1, 4294967040  ;;  %s29_s14 = sadd.s32 1, %s1569_s14   ;;  %s2077_s30 = smov %s1553_s10 }
 0x56b   : > { %p26_p8 = scmp.ge.s32.totalorder %s29_s14, 4   ;;  %s2078_s10 = smov %s1557_s11 }
 0x56c   : > { %s2079_s11 = smov %s1880_s15  ;;  %s2080_s12 = smov %s1565_s13 }
 0x56d   : > { %s2081_s13 = smov %s2083_s28  ;;  %28 = sbr.rel (!%p26_p8) target bundleno = 14 (0xe), region = 133 }
 0x574   :  { %806 = vsyncpa [#allocation3], 1 }
 0x575   :  { %808 = vsyncpa [#allocation3 + $0x1], 1 }
 0x576   :  { %809 = vsyncpa [#allocation6], 1 }
 0x577   :  { %810 = vsyncpa [#allocation9], 1 }
 0x578   :  { %811 = vsyncpa [#allocation12], 1 }
 0x579   :  { %812 = vsyncpa [#allocation15], 1 }
 0x57a   :  { %813 = vsyncpa [#allocation4], 1 }
 0x57b   :  { %815 = vsyncpa [#allocation4 + $0x1], 1 }

</bundles_post_ra>
